<compile_context>
chip_gen: v7x
topology: tpu7x:2x2x1
jax: 0.10.0
libtpu: 0.0.40
codegen_flags: <defaults>
</compile_context>

<pallas_src>
import functools

import jax
import jax.numpy as jnp
from jax.experimental import pallas as pl
from jax.experimental.pallas import tpu as pltpu

EPS = 1e-5          # nn.BatchNorm2d default eps
NEG_SLOPE = 0.1     # nn.LeakyReLU(0.1)


def _round_up(x, m):
    return (x + m - 1) // m * m


def _cdiv(a, b):
    return (a + b - 1) // b


@functools.partial(
    jax.jit,
    static_argnames=("stride", "padding", "compute_dtype", "max_slab_rows"))
def cnn_block(x, weight, gamma, beta, *, stride=1, padding=1,
              compute_dtype=jnp.bfloat16, max_slab_rows=1024):
    """x: (N, C, H, W) f32 NCHW; weight: (OC, C, KH, KW) f32. Returns NCHW f32."""
    N, C, H, W = x.shape
    OC, _, KH, KW = weight.shape
    OH = (H + 2 * padding - KH) // stride + 1
    OW = (W + 2 * padding - KW) // stride + 1

    # ---- tiling choices ---------------------------------------------------------
    OCpad = _round_up(OC, 128)                     # lane-dense stores / full MXU N dim
    TOH = OH if OH * OW <= max_slab_rows else max(1, max_slab_rows // OW)
    n_slabs = _cdiv(OH, TOH)                       # in-kernel slab loop bounds VMEM
    OH_pad = n_slabs * TOH
    HW_pad = OH_pad * OW

    # Padded NHWC input (1x input bytes; ~1/9 of the old im2col traffic).  Extra
    # bottom rows for OH_pad > OH are zeros; stats mask them, phase 2 writes them to
    # discarded output rows.
    Hp = max(H + 2 * padding, (OH_pad - 1) * stride + KH)
    Wp = W + 2 * padding
    xp = jnp.transpose(x, (0, 2, 3, 1))
    xp = jnp.pad(xp, ((0, 0),
                      (padding, Hp - H - padding),
                      (padding, padding),
                      (0, 0))).astype(compute_dtype)

    # Per-tap weights: w_taps[kh*KW + kw, c, oc] = weight[oc, c, kh, kw].
    w_taps = jnp.transpose(weight, (2, 3, 1, 0)).reshape(KH * KW, C, OC)
    w_taps = jnp.pad(w_taps, ((0, 0), (0, 0), (0, OCpad - OC))).astype(compute_dtype)

    # ---- shared in-kernel conv tile: KH*KW accumulated shifted matmuls -----------
    def conv_slab(x_ref, w_ref, slab):
        """f32 conv output for output rows [slab*TOH, (slab+1)*TOH) of this image."""
        oh0 = slab * TOH
        acc = jnp.zeros((TOH * OW, OCpad), jnp.float32)
        for kh in range(KH):
            for kw in range(KW):
                if stride == 1:
                    patch = x_ref[0, oh0 + kh:oh0 + kh + TOH, kw:kw + OW, :]
                else:
                    patch = x_ref[0,
                                  pl.ds(oh0 * stride + kh, TOH, stride=stride),
                                  pl.ds(kw, OW, stride=stride), :]
                acc = acc + jnp.dot(patch.reshape(TOH * OW, C),
                                    w_ref[kh * KW + kw],
                                    preferred_element_type=jnp.float32)
        return acc

    # ---- phase 1: per-image per-channel sum / sum-of-squares ---------------------
    def stats_kernel(x_ref, w_ref, sum_ref, sumsq_ref):
        s = jnp.zeros((1, OCpad), jnp.float32)
        ss = jnp.zeros((1, OCpad), jnp.float32)
        for slab in range(n_slabs):
            y = conv_slab(x_ref, w_ref, slab)
            vr = min(TOH, OH - slab * TOH)          # static valid-row count
            if vr < TOH:                            # mask padded output rows exactly
                y = y[:vr * OW, :]
            s = s + jnp.sum(y, axis=0, keepdims=True)          # VPU/XLU reduce
            ss = ss + jnp.sum(y * y, axis=0, keepdims=True)
        sum_ref[...] = s.reshape(1, 1, OCpad)
        sumsq_ref[...] = ss.reshape(1, 1, OCpad)

    p_sum, p_sumsq = pl.pallas_call(
        stats_kernel,
        out_shape=(jax.ShapeDtypeStruct((N, 1, OCpad), jnp.float32),
                   jax.ShapeDtypeStruct((N, 1, OCpad), jnp.float32)),
        grid=(N,),
        in_specs=[
            pl.BlockSpec((1, Hp, Wp, C), lambda n: (n, 0, 0, 0)),    # image block
            pl.BlockSpec((KH * KW, C, OCpad), lambda n: (0, 0, 0)),  # weights (resident)
        ],
        out_specs=(pl.BlockSpec((1, 1, OCpad), lambda n: (n, 0, 0)),
                   pl.BlockSpec((1, 1, OCpad), lambda n: (n, 0, 0))),
        compiler_params=pltpu.CompilerParams(
            dimension_semantics=("parallel",)),      # v7x megacore over images
    )(xp, w_taps)

    # ---- fold BN (train-mode batch statistics) into per-channel scale/shift ------
    count = jnp.float32(N * OH * OW)
    ch_sum = jnp.sum(p_sum.reshape(N, OCpad), axis=0)
    ch_sumsq = jnp.sum(p_sumsq.reshape(N, OCpad), axis=0)
    mean = ch_sum / count
    # TODO(synk): one-pass E[y^2] - mean^2 can lose precision for very large N*OH*OW;
    # switch to Chan-style per-image (mean, M2) combination if these stats feed training.
    var = jnp.maximum(ch_sumsq / count - mean * mean, 0.0)
    gamma_p = jnp.pad(gamma.astype(jnp.float32), (0, OCpad - OC))
    beta_p = jnp.pad(beta.astype(jnp.float32), (0, OCpad - OC))
    scale_v = gamma_p * jax.lax.rsqrt(var + EPS)
    shift_v = beta_p - mean * scale_v
    scale = scale_v.reshape(1, OCpad)
    shift = shift_v.reshape(1, OCpad)

    # ---- phase 2: recompute conv, apply BN affine + LeakyReLU, write transposed ---
    def bn_act_kernel(x_ref, w_ref, scale_ref, shift_ref, out_ref):
        sc = scale_ref[...]
        sh = shift_ref[...]
        for slab in range(n_slabs):
            y = conv_slab(x_ref, w_ref, slab)
            z = y * sc + sh
            z = jnp.where(z >= 0.0, z, NEG_SLOPE * z)
            # (TOH*OW, OCpad) -> (OCpad, TOH*OW): XLU transpose under mem-bound slack,
            # so the final NCHW output needs no extra XLA transpose pass.
            out_ref[0, :, slab * TOH * OW:(slab + 1) * TOH * OW] = z.T

    out_pad = pl.pallas_call(
        bn_act_kernel,
        out_shape=jax.ShapeDtypeStruct((N, OCpad, HW_pad), jnp.float32),
        grid=(N,),
        in_specs=[
            pl.BlockSpec((1, Hp, Wp, C), lambda n: (n, 0, 0, 0)),
            pl.BlockSpec((KH * KW, C, OCpad), lambda n: (0, 0, 0)),
            pl.BlockSpec((1, OCpad), lambda n: (0, 0)),
            pl.BlockSpec((1, OCpad), lambda n: (0, 0)),
        ],
        out_specs=pl.BlockSpec((1, OCpad, HW_pad), lambda n: (n, 0, 0)),
        compiler_params=pltpu.CompilerParams(
            dimension_semantics=("parallel",)),
    )(xp, w_taps, scale, shift)

    # (N, OCpad, OH_pad*OW) -> (N, OC, OH, OW).  When OC % 128 == 0 and OH_pad == OH
    # this is a zero-copy reshape; otherwise it slices exactly the true output bytes.
    return out_pad[:, :OC, :OH * OW].reshape(N, OC, OH, OW)


def _reference(x, weight, gamma, beta, *, stride=1, padding=1):
    """Pure-JAX reference matching PyTorch CNNBlock forward (train-mode BN)."""
    y = jax.lax.conv_general_dilated(
        x, weight, window_strides=(stride, stride),
        padding=((padding, padding), (padding, padding)),
        dimension_numbers=("NCHW", "OIHW", "NCHW"))
    mean = jnp.mean(y, axis=(0, 2, 3), keepdims=True)
    var = jnp.mean(jnp.square(y - mean), axis=(0, 2, 3), keepdims=True)
    y_hat = (y - mean) * jax.lax.rsqrt(var + EPS)
    y_bn = y_hat * gamma.reshape(1, -1, 1, 1) + beta.reshape(1, -1, 1, 1)
    return jnp.where(y_bn >= 0, y_bn, NEG_SLOPE * y_bn)


if __name__ == "__main__":
    # CNNBlock(in_channels=4, out_channels=8, kernel_size=3, stride=1, padding=1)
    N, C_IN, C_OUT, H, W = 2, 4, 8, 16, 16
    KH = KW = 3

    key = jax.random.PRNGKey(0)
    kx, kw_ = jax.random.split(key)
    x = jax.random.normal(kx, (N, C_IN, H, W), dtype=jnp.float32)
    weight = 0.1 * jax.random.normal(kw_, (C_OUT, C_IN, KH, KW), dtype=jnp.float32)
    gamma = jnp.ones((C_OUT,), dtype=jnp.float32)   # PyTorch BN default affine init
    beta = jnp.zeros((C_OUT,), dtype=jnp.float32)

    ref = _reference(x, weight, gamma, beta, stride=1, padding=1)

    # f32 MXU path: matches PyTorch's f32 forward tightly.
    out_f32 = jax.block_until_ready(
        cnn_block(x, weight, gamma, beta, stride=1, padding=1,
                  compute_dtype=jnp.float32))
    assert out_f32.shape == (N, C_OUT, H, W), out_f32.shape
    assert jnp.allclose(out_f32, ref, atol=1e-3, rtol=1e-3), \
        float(jnp.max(jnp.abs(out_f32 - ref)))

    # bf16 MXU path (recommended on v6e/v7x): identical structure, looser tolerance
    # (stats are computed from the bf16-rounded conv inputs; self-consistent).
    out_bf16 = jax.block_until_ready(
        cnn_block(x, weight, gamma, beta, stride=1, padding=1,
                  compute_dtype=jnp.bfloat16))
    assert out_bf16.shape == (N, C_OUT, H, W), out_bf16.shape
    assert jnp.allclose(out_bf16, ref, atol=7e-2, rtol=7e-2), \
        float(jnp.max(jnp.abs(out_bf16 - ref)))

    print("KERNEL_OK")
</pallas_src>

<mosaic_0001>
module attributes {stable_mosaic.version = 11 : i64} {
  func.func @stats_kernel(%arg0: i32, %arg1: memref<1x18x18x4xf32, #tpu.memory_space<vmem>>, %arg2: memref<9x4x128xf32, #tpu.memory_space<vmem>>, %arg3: memref<1x1x128xf32, #tpu.memory_space<vmem>>, %arg4: memref<1x1x128xf32, #tpu.memory_space<vmem>>) attributes {dimension_semantics = [#tpu.dimension_semantics<parallel>], iteration_bounds = array<i64: 2>, scalar_prefetch = 0 : i64, scratch_operands = 0 : i64, tpu.core_type = #tpu.core_type<tc>, window_params = [{transform_indices = @transform_0, window_bounds = array<i64: 1, 18, 18, 4>}, {pipeline_mode = #tpu.pipeline_mode<synchronous>, transform_indices = @transform_1, window_bounds = array<i64: 9, 4, 128>}, {transform_indices = @transform_2, window_bounds = array<i64: 1, 1, 128>}, {transform_indices = @transform_3, window_bounds = array<i64: 1, 1, 128>}]} {
    %cst = arith.constant 0.000000e+00 : f32
    %0 = vector.broadcast %cst : f32 to vector<1x128xf32>
    %cst_0 = arith.constant 0.000000e+00 : f32
    %1 = vector.broadcast %cst_0 : f32 to vector<1x128xf32>
    %cst_1 = arith.constant 0.000000e+00 : f32
    %2 = vector.broadcast %cst_1 : f32 to vector<256x128xf32>
    %c0 = arith.constant 0 : index
    %c0_2 = arith.constant 0 : index
    %c0_3 = arith.constant 0 : index
    %c0_4 = arith.constant 0 : index
    %3 = vector.load %arg1[%c0, %c0_2, %c0_3, %c0_4] : memref<1x18x18x4xf32, #tpu.memory_space<vmem>>, vector<1x16x16x4xf32>
    %4 = vector.shape_cast %3 : vector<1x16x16x4xf32> to vector<16x16x4xf32>
    %5 = vector.shape_cast %4 : vector<16x16x4xf32> to vector<256x4xf32>
    %c0_5 = arith.constant 0 : index
    %c0_6 = arith.constant 0 : index
    %c0_7 = arith.constant 0 : index
    %6 = vector.load %arg2[%c0_5, %c0_6, %c0_7] : memref<9x4x128xf32, #tpu.memory_space<vmem>>, vector<1x4x128xf32>
    %7 = vector.shape_cast %6 : vector<1x4x128xf32> to vector<4x128xf32>
    %cst_8 = arith.constant dense<0.000000e+00> : vector<256x128xf32>
    %8 = tpu.matmul %5, %7, %cst_8 {dimension_numbers = #tpu.dot_dimension_numbers<[1], [0], [0], [1], [0, 0, 1, 1], [], []>} : vector<256x4xf32>, vector<4x128xf32>, vector<256x128xf32> -> vector<256x128xf32>
    %9 = arith.addf %2, %8 : vector<256x128xf32>
    %c0_9 = arith.constant 0 : index
    %c0_10 = arith.constant 0 : index
    %c1 = arith.constant 1 : index
    %c0_11 = arith.constant 0 : index
    %10 = vector.load %arg1[%c0_9, %c0_10, %c1, %c0_11] : memref<1x18x18x4xf32, #tpu.memory_space<vmem>>, vector<1x16x16x4xf32>
    %11 = vector.shape_cast %10 : vector<1x16x16x4xf32> to vector<16x16x4xf32>
    %12 = vector.shape_cast %11 : vector<16x16x4xf32> to vector<256x4xf32>
    %c1_12 = arith.constant 1 : index
    %c0_13 = arith.constant 0 : index
    %c0_14 = arith.constant 0 : index
    %13 = vector.load %arg2[%c1_12, %c0_13, %c0_14] : memref<9x4x128xf32, #tpu.memory_space<vmem>>, vector<1x4x128xf32>
    %14 = vector.shape_cast %13 : vector<1x4x128xf32> to vector<4x128xf32>
    %cst_15 = arith.constant dense<0.000000e+00> : vector<256x128xf32>
    %15 = tpu.matmul %12, %14, %cst_15 {dimension_numbers = #tpu.dot_dimension_numbers<[1], [0], [0], [1], [0, 0, 1, 1], [], []>} : vector<256x4xf32>, vector<4x128xf32>, vector<256x128xf32> -> vector<256x128xf32>
    %16 = arith.addf %9, %15 : vector<256x128xf32>
    %c0_16 = arith.constant 0 : index
    %c0_17 = arith.constant 0 : index
    %c2 = arith.constant 2 : index
    %c0_18 = arith.constant 0 : index
    %17 = vector.load %arg1[%c0_16, %c0_17, %c2, %c0_18] : memref<1x18x18x4xf32, #tpu.memory_space<vmem>>, vector<1x16x16x4xf32>
    %18 = vector.shape_cast %17 : vector<1x16x16x4xf32> to vector<16x16x4xf32>
    %19 = vector.shape_cast %18 : vector<16x16x4xf32> to vector<256x4xf32>
    %c2_19 = arith.constant 2 : index
    %c0_20 = arith.constant 0 : index
    %c0_21 = arith.constant 0 : index
    %20 = vector.load %arg2[%c2_19, %c0_20, %c0_21] : memref<9x4x128xf32, #tpu.memory_space<vmem>>, vector<1x4x128xf32>
    %21 = vector.shape_cast %20 : vector<1x4x128xf32> to vector<4x128xf32>
    %cst_22 = arith.constant dense<0.000000e+00> : vector<256x128xf32>
    %22 = tpu.matmul %19, %21, %cst_22 {dimension_numbers = #tpu.dot_dimension_numbers<[1], [0], [0], [1], [0, 0, 1, 1], [], []>} : vector<256x4xf32>, vector<4x128xf32>, vector<256x128xf32> -> vector<256x128xf32>
    %23 = arith.addf %16, %22 : vector<256x128xf32>
    %c0_23 = arith.constant 0 : index
    %c1_24 = arith.constant 1 : index
    %c0_25 = arith.constant 0 : index
    %c0_26 = arith.constant 0 : index
    %24 = vector.load %arg1[%c0_23, %c1_24, %c0_25, %c0_26] : memref<1x18x18x4xf32, #tpu.memory_space<vmem>>, vector<1x16x16x4xf32>
    %25 = vector.shape_cast %24 : vector<1x16x16x4xf32> to vector<16x16x4xf32>
    %26 = vector.shape_cast %25 : vector<16x16x4xf32> to vector<256x4xf32>
    %c3 = arith.constant 3 : index
    %c0_27 = arith.constant 0 : index
    %c0_28 = arith.constant 0 : index
    %27 = vector.load %arg2[%c3, %c0_27, %c0_28] : memref<9x4x128xf32, #tpu.memory_space<vmem>>, vector<1x4x128xf32>
    %28 = vector.shape_cast %27 : vector<1x4x128xf32> to vector<4x128xf32>
    %cst_29 = arith.constant dense<0.000000e+00> : vector<256x128xf32>
    %29 = tpu.matmul %26, %28, %cst_29 {dimension_numbers = #tpu.dot_dimension_numbers<[1], [0], [0], [1], [0, 0, 1, 1], [], []>} : vector<256x4xf32>, vector<4x128xf32>, vector<256x128xf32> -> vector<256x128xf32>
    %30 = arith.addf %23, %29 : vector<256x128xf32>
    %c0_30 = arith.constant 0 : index
    %c1_31 = arith.constant 1 : index
    %c1_32 = arith.constant 1 : index
    %c0_33 = arith.constant 0 : index
    %31 = vector.load %arg1[%c0_30, %c1_31, %c1_32, %c0_33] : memref<1x18x18x4xf32, #tpu.memory_space<vmem>>, vector<1x16x16x4xf32>
    %32 = vector.shape_cast %31 : vector<1x16x16x4xf32> to vector<16x16x4xf32>
    %33 = vector.shape_cast %32 : vector<16x16x4xf32> to vector<256x4xf32>
    %c4 = arith.constant 4 : index
    %c0_34 = arith.constant 0 : index
    %c0_35 = arith.constant 0 : index
    %34 = vector.load %arg2[%c4, %c0_34, %c0_35] : memref<9x4x128xf32, #tpu.memory_space<vmem>>, vector<1x4x128xf32>
    %35 = vector.shape_cast %34 : vector<1x4x128xf32> to vector<4x128xf32>
    %cst_36 = arith.constant dense<0.000000e+00> : vector<256x128xf32>
    %36 = tpu.matmul %33, %35, %cst_36 {dimension_numbers = #tpu.dot_dimension_numbers<[1], [0], [0], [1], [0, 0, 1, 1], [], []>} : vector<256x4xf32>, vector<4x128xf32>, vector<256x128xf32> -> vector<256x128xf32>
    %37 = arith.addf %30, %36 : vector<256x128xf32>
    %c0_37 = arith.constant 0 : index
    %c1_38 = arith.constant 1 : index
    %c2_39 = arith.constant 2 : index
    %c0_40 = arith.constant 0 : index
    %38 = vector.load %arg1[%c0_37, %c1_38, %c2_39, %c0_40] : memref<1x18x18x4xf32, #tpu.memory_space<vmem>>, vector<1x16x16x4xf32>
    %39 = vector.shape_cast %38 : vector<1x16x16x4xf32> to vector<16x16x4xf32>
    %40 = vector.shape_cast %39 : vector<16x16x4xf32> to vector<256x4xf32>
    %c5 = arith.constant 5 : index
    %c0_41 = arith.constant 0 : index
    %c0_42 = arith.constant 0 : index
    %41 = vector.load %arg2[%c5, %c0_41, %c0_42] : memref<9x4x128xf32, #tpu.memory_space<vmem>>, vector<1x4x128xf32>
    %42 = vector.shape_cast %41 : vector<1x4x128xf32> to vector<4x128xf32>
    %cst_43 = arith.constant dense<0.000000e+00> : vector<256x128xf32>
    %43 = tpu.matmul %40, %42, %cst_43 {dimension_numbers = #tpu.dot_dimension_numbers<[1], [0], [0], [1], [0, 0, 1, 1], [], []>} : vector<256x4xf32>, vector<4x128xf32>, vector<256x128xf32> -> vector<256x128xf32>
    %44 = arith.addf %37, %43 : vector<256x128xf32>
    %c0_44 = arith.constant 0 : index
    %c2_45 = arith.constant 2 : index
    %c0_46 = arith.constant 0 : index
    %c0_47 = arith.constant 0 : index
    %45 = vector.load %arg1[%c0_44, %c2_45, %c0_46, %c0_47] : memref<1x18x18x4xf32, #tpu.memory_space<vmem>>, vector<1x16x16x4xf32>
    %46 = vector.shape_cast %45 : vector<1x16x16x4xf32> to vector<16x16x4xf32>
    %47 = vector.shape_cast %46 : vector<16x16x4xf32> to vector<256x4xf32>
    %c6 = arith.constant 6 : index
    %c0_48 = arith.constant 0 : index
    %c0_49 = arith.constant 0 : index
    %48 = vector.load %arg2[%c6, %c0_48, %c0_49] : memref<9x4x128xf32, #tpu.memory_space<vmem>>, vector<1x4x128xf32>
    %49 = vector.shape_cast %48 : vector<1x4x128xf32> to vector<4x128xf32>
    %cst_50 = arith.constant dense<0.000000e+00> : vector<256x128xf32>
    %50 = tpu.matmul %47, %49, %cst_50 {dimension_numbers = #tpu.dot_dimension_numbers<[1], [0], [0], [1], [0, 0, 1, 1], [], []>} : vector<256x4xf32>, vector<4x128xf32>, vector<256x128xf32> -> vector<256x128xf32>
    %51 = arith.addf %44, %50 : vector<256x128xf32>
    %c0_51 = arith.constant 0 : index
    %c2_52 = arith.constant 2 : index
    %c1_53 = arith.constant 1 : index
    %c0_54 = arith.constant 0 : index
    %52 = vector.load %arg1[%c0_51, %c2_52, %c1_53, %c0_54] : memref<1x18x18x4xf32, #tpu.memory_space<vmem>>, vector<1x16x16x4xf32>
    %53 = vector.shape_cast %52 : vector<1x16x16x4xf32> to vector<16x16x4xf32>
    %54 = vector.shape_cast %53 : vector<16x16x4xf32> to vector<256x4xf32>
    %c7 = arith.constant 7 : index
    %c0_55 = arith.constant 0 : index
    %c0_56 = arith.constant 0 : index
    %55 = vector.load %arg2[%c7, %c0_55, %c0_56] : memref<9x4x128xf32, #tpu.memory_space<vmem>>, vector<1x4x128xf32>
    %56 = vector.shape_cast %55 : vector<1x4x128xf32> to vector<4x128xf32>
    %cst_57 = arith.constant dense<0.000000e+00> : vector<256x128xf32>
    %57 = tpu.matmul %54, %56, %cst_57 {dimension_numbers = #tpu.dot_dimension_numbers<[1], [0], [0], [1], [0, 0, 1, 1], [], []>} : vector<256x4xf32>, vector<4x128xf32>, vector<256x128xf32> -> vector<256x128xf32>
    %58 = arith.addf %51, %57 : vector<256x128xf32>
    %c0_58 = arith.constant 0 : index
    %c2_59 = arith.constant 2 : index
    %c2_60 = arith.constant 2 : index
    %c0_61 = arith.constant 0 : index
    %59 = vector.load %arg1[%c0_58, %c2_59, %c2_60, %c0_61] : memref<1x18x18x4xf32, #tpu.memory_space<vmem>>, vector<1x16x16x4xf32>
    %60 = vector.shape_cast %59 : vector<1x16x16x4xf32> to vector<16x16x4xf32>
    %61 = vector.shape_cast %60 : vector<16x16x4xf32> to vector<256x4xf32>
    %c8 = arith.constant 8 : index
    %c0_62 = arith.constant 0 : index
    %c0_63 = arith.constant 0 : index
    %62 = vector.load %arg2[%c8, %c0_62, %c0_63] : memref<9x4x128xf32, #tpu.memory_space<vmem>>, vector<1x4x128xf32>
    %63 = vector.shape_cast %62 : vector<1x4x128xf32> to vector<4x128xf32>
    %cst_64 = arith.constant dense<0.000000e+00> : vector<256x128xf32>
    %64 = tpu.matmul %61, %63, %cst_64 {dimension_numbers = #tpu.dot_dimension_numbers<[1], [0], [0], [1], [0, 0, 1, 1], [], []>} : vector<256x4xf32>, vector<4x128xf32>, vector<256x128xf32> -> vector<256x128xf32>
    %65 = arith.addf %58, %64 : vector<256x128xf32>
    %cst_65 = arith.constant dense<0.000000e+00> : vector<128xf32>
    %66 = vector.multi_reduction <add>, %65, %cst_65 [0] : vector<256x128xf32> to vector<128xf32>
    %67 = vector.shape_cast %66 : vector<128xf32> to vector<1x128xf32>
    %68 = arith.addf %0, %67 : vector<1x128xf32>
    %69 = arith.mulf %65, %65 : vector<256x128xf32>
    %cst_66 = arith.constant dense<0.000000e+00> : vector<128xf32>
    %70 = vector.multi_reduction <add>, %69, %cst_66 [0] : vector<256x128xf32> to vector<128xf32>
    %71 = vector.shape_cast %70 : vector<128xf32> to vector<1x128xf32>
    %72 = arith.addf %1, %71 : vector<1x128xf32>
    %73 = vector.shape_cast %68 : vector<1x128xf32> to vector<1x1x128xf32>
    %c0_67 = arith.constant 0 : index
    %c0_68 = arith.constant 0 : index
    %c0_69 = arith.constant 0 : index
    %74 = vector.load %arg3[%c0_67, %c0_68, %c0_69] : memref<1x1x128xf32, #tpu.memory_space<vmem>>, vector<1x1x128xf32>
    tpu.vector_store %arg3[%c0_67, %c0_68, %c0_69], %73 {strides = array<i32>} : memref<1x1x128xf32, #tpu.memory_space<vmem>>, vector<1x1x128xf32>,
    %75 = vector.shape_cast %72 : vector<1x128xf32> to vector<1x1x128xf32>
    %c0_70 = arith.constant 0 : index
    %c0_71 = arith.constant 0 : index
    %c0_72 = arith.constant 0 : index
    %76 = vector.load %arg4[%c0_70, %c0_71, %c0_72] : memref<1x1x128xf32, #tpu.memory_space<vmem>>, vector<1x1x128xf32>
    tpu.vector_store %arg4[%c0_70, %c0_71, %c0_72], %75 {strides = array<i32>} : memref<1x1x128xf32, #tpu.memory_space<vmem>>, vector<1x1x128xf32>,
    return
  }
  func.func @transform_0(%arg0: i32) -> (i32, i32, i32, i32) {
    %c0_i32 = arith.constant 0 : i32
    %c0_i32_0 = arith.constant 0 : i32
    %c0_i32_1 = arith.constant 0 : i32
    %c0_i32_2 = arith.constant 0 : i32
    return %arg0, %c0_i32, %c0_i32_0, %c0_i32_1 : i32, i32, i32, i32
  }
  func.func @transform_1(%arg0: i32) -> (i32, i32, i32) {
    %c0_i32 = arith.constant 0 : i32
    %c0_i32_0 = arith.constant 0 : i32
    %c0_i32_1 = arith.constant 0 : i32
    %c0_i32_2 = arith.constant 0 : i32
    return %c0_i32, %c0_i32_0, %c0_i32_1 : i32, i32, i32
  }
  func.func @transform_2(%arg0: i32) -> (i32, i32, i32) {
    %c0_i32 = arith.constant 0 : i32
    %c0_i32_0 = arith.constant 0 : i32
    %c0_i32_1 = arith.constant 0 : i32
    return %arg0, %c0_i32, %c0_i32_0 : i32, i32, i32
  }
  func.func @transform_3(%arg0: i32) -> (i32, i32, i32) {
    %c0_i32 = arith.constant 0 : i32
    %c0_i32_0 = arith.constant 0 : i32
    %c0_i32_1 = arith.constant 0 : i32
    return %arg0, %c0_i32, %c0_i32_0 : i32, i32, i32
  }
}

module attributes {stable_mosaic.version = 11 : i64} {
  func.func @bn_act_kernel(%arg0: i32, %arg1: memref<1x18x18x4xf32, #tpu.memory_space<vmem>>, %arg2: memref<9x4x128xf32, #tpu.memory_space<vmem>>, %arg3: memref<1x128xf32, #tpu.memory_space<vmem>>, %arg4: memref<1x128xf32, #tpu.memory_space<vmem>>, %arg5: memref<1x128x256xf32, #tpu.memory_space<vmem>>) attributes {dimension_semantics = [#tpu.dimension_semantics<parallel>], iteration_bounds = array<i64: 2>, scalar_prefetch = 0 : i64, scratch_operands = 0 : i64, tpu.core_type = #tpu.core_type<tc>, window_params = [{transform_indices = @transform_0, window_bounds = array<i64: 1, 18, 18, 4>}, {pipeline_mode = #tpu.pipeline_mode<synchronous>, transform_indices = @transform_1, window_bounds = array<i64: 9, 4, 128>}, {pipeline_mode = #tpu.pipeline_mode<synchronous>, transform_indices = @transform_2, window_bounds = array<i64: 1, 128>}, {pipeline_mode = #tpu.pipeline_mode<synchronous>, transform_indices = @transform_3, window_bounds = array<i64: 1, 128>}, {transform_indices = @transform_4, window_bounds = array<i64: 1, 128, 256>}]} {
    %c0 = arith.constant 0 : index
    %c0_0 = arith.constant 0 : index
    %0 = vector.load %arg3[%c0, %c0_0] : memref<1x128xf32, #tpu.memory_space<vmem>>, vector<1x128xf32>
    %c0_1 = arith.constant 0 : index
    %c0_2 = arith.constant 0 : index
    %1 = vector.load %arg4[%c0_1, %c0_2] : memref<1x128xf32, #tpu.memory_space<vmem>>, vector<1x128xf32>
    %cst = arith.constant 0.000000e+00 : f32
    %2 = vector.broadcast %cst : f32 to vector<256x128xf32>
    %c0_3 = arith.constant 0 : index
    %c0_4 = arith.constant 0 : index
    %c0_5 = arith.constant 0 : index
    %c0_6 = arith.constant 0 : index
    %3 = vector.load %arg1[%c0_3, %c0_4, %c0_5, %c0_6] : memref<1x18x18x4xf32, #tpu.memory_space<vmem>>, vector<1x16x16x4xf32>
    %4 = vector.shape_cast %3 : vector<1x16x16x4xf32> to vector<16x16x4xf32>
    %5 = vector.shape_cast %4 : vector<16x16x4xf32> to vector<256x4xf32>
    %c0_7 = arith.constant 0 : index
    %c0_8 = arith.constant 0 : index
    %c0_9 = arith.constant 0 : index
    %6 = vector.load %arg2[%c0_7, %c0_8, %c0_9] : memref<9x4x128xf32, #tpu.memory_space<vmem>>, vector<1x4x128xf32>
    %7 = vector.shape_cast %6 : vector<1x4x128xf32> to vector<4x128xf32>
    %cst_10 = arith.constant dense<0.000000e+00> : vector<256x128xf32>
    %8 = tpu.matmul %5, %7, %cst_10 {dimension_numbers = #tpu.dot_dimension_numbers<[1], [0], [0], [1], [0, 0, 1, 1], [], []>} : vector<256x4xf32>, vector<4x128xf32>, vector<256x128xf32> -> vector<256x128xf32>
    %9 = arith.addf %2, %8 : vector<256x128xf32>
    %c0_11 = arith.constant 0 : index
    %c0_12 = arith.constant 0 : index
    %c1 = arith.constant 1 : index
    %c0_13 = arith.constant 0 : index
    %10 = vector.load %arg1[%c0_11, %c0_12, %c1, %c0_13] : memref<1x18x18x4xf32, #tpu.memory_space<vmem>>, vector<1x16x16x4xf32>
    %11 = vector.shape_cast %10 : vector<1x16x16x4xf32> to vector<16x16x4xf32>
    %12 = vector.shape_cast %11 : vector<16x16x4xf32> to vector<256x4xf32>
    %c1_14 = arith.constant 1 : index
    %c0_15 = arith.constant 0 : index
    %c0_16 = arith.constant 0 : index
    %13 = vector.load %arg2[%c1_14, %c0_15, %c0_16] : memref<9x4x128xf32, #tpu.memory_space<vmem>>, vector<1x4x128xf32>
    %14 = vector.shape_cast %13 : vector<1x4x128xf32> to vector<4x128xf32>
    %cst_17 = arith.constant dense<0.000000e+00> : vector<256x128xf32>
    %15 = tpu.matmul %12, %14, %cst_17 {dimension_numbers = #tpu.dot_dimension_numbers<[1], [0], [0], [1], [0, 0, 1, 1], [], []>} : vector<256x4xf32>, vector<4x128xf32>, vector<256x128xf32> -> vector<256x128xf32>
    %16 = arith.addf %9, %15 : vector<256x128xf32>
    %c0_18 = arith.constant 0 : index
    %c0_19 = arith.constant 0 : index
    %c2 = arith.constant 2 : index
    %c0_20 = arith.constant 0 : index
    %17 = vector.load %arg1[%c0_18, %c0_19, %c2, %c0_20] : memref<1x18x18x4xf32, #tpu.memory_space<vmem>>, vector<1x16x16x4xf32>
    %18 = vector.shape_cast %17 : vector<1x16x16x4xf32> to vector<16x16x4xf32>
    %19 = vector.shape_cast %18 : vector<16x16x4xf32> to vector<256x4xf32>
    %c2_21 = arith.constant 2 : index
    %c0_22 = arith.constant 0 : index
    %c0_23 = arith.constant 0 : index
    %20 = vector.load %arg2[%c2_21, %c0_22, %c0_23] : memref<9x4x128xf32, #tpu.memory_space<vmem>>, vector<1x4x128xf32>
    %21 = vector.shape_cast %20 : vector<1x4x128xf32> to vector<4x128xf32>
    %cst_24 = arith.constant dense<0.000000e+00> : vector<256x128xf32>
    %22 = tpu.matmul %19, %21, %cst_24 {dimension_numbers = #tpu.dot_dimension_numbers<[1], [0], [0], [1], [0, 0, 1, 1], [], []>} : vector<256x4xf32>, vector<4x128xf32>, vector<256x128xf32> -> vector<256x128xf32>
    %23 = arith.addf %16, %22 : vector<256x128xf32>
    %c0_25 = arith.constant 0 : index
    %c1_26 = arith.constant 1 : index
    %c0_27 = arith.constant 0 : index
    %c0_28 = arith.constant 0 : index
    %24 = vector.load %arg1[%c0_25, %c1_26, %c0_27, %c0_28] : memref<1x18x18x4xf32, #tpu.memory_space<vmem>>, vector<1x16x16x4xf32>
    %25 = vector.shape_cast %24 : vector<1x16x16x4xf32> to vector<16x16x4xf32>
    %26 = vector.shape_cast %25 : vector<16x16x4xf32> to vector<256x4xf32>
    %c3 = arith.constant 3 : index
    %c0_29 = arith.constant 0 : index
    %c0_30 = arith.constant 0 : index
    %27 = vector.load %arg2[%c3, %c0_29, %c0_30] : memref<9x4x128xf32, #tpu.memory_space<vmem>>, vector<1x4x128xf32>
    %28 = vector.shape_cast %27 : vector<1x4x128xf32> to vector<4x128xf32>
    %cst_31 = arith.constant dense<0.000000e+00> : vector<256x128xf32>
    %29 = tpu.matmul %26, %28, %cst_31 {dimension_numbers = #tpu.dot_dimension_numbers<[1], [0], [0], [1], [0, 0, 1, 1], [], []>} : vector<256x4xf32>, vector<4x128xf32>, vector<256x128xf32> -> vector<256x128xf32>
    %30 = arith.addf %23, %29 : vector<256x128xf32>
    %c0_32 = arith.constant 0 : index
    %c1_33 = arith.constant 1 : index
    %c1_34 = arith.constant 1 : index
    %c0_35 = arith.constant 0 : index
    %31 = vector.load %arg1[%c0_32, %c1_33, %c1_34, %c0_35] : memref<1x18x18x4xf32, #tpu.memory_space<vmem>>, vector<1x16x16x4xf32>
    %32 = vector.shape_cast %31 : vector<1x16x16x4xf32> to vector<16x16x4xf32>
    %33 = vector.shape_cast %32 : vector<16x16x4xf32> to vector<256x4xf32>
    %c4 = arith.constant 4 : index
    %c0_36 = arith.constant 0 : index
    %c0_37 = arith.constant 0 : index
    %34 = vector.load %arg2[%c4, %c0_36, %c0_37] : memref<9x4x128xf32, #tpu.memory_space<vmem>>, vector<1x4x128xf32>
    %35 = vector.shape_cast %34 : vector<1x4x128xf32> to vector<4x128xf32>
    %cst_38 = arith.constant dense<0.000000e+00> : vector<256x128xf32>
    %36 = tpu.matmul %33, %35, %cst_38 {dimension_numbers = #tpu.dot_dimension_numbers<[1], [0], [0], [1], [0, 0, 1, 1], [], []>} : vector<256x4xf32>, vector<4x128xf32>, vector<256x128xf32> -> vector<256x128xf32>
    %37 = arith.addf %30, %36 : vector<256x128xf32>
    %c0_39 = arith.constant 0 : index
    %c1_40 = arith.constant 1 : index
    %c2_41 = arith.constant 2 : index
    %c0_42 = arith.constant 0 : index
    %38 = vector.load %arg1[%c0_39, %c1_40, %c2_41, %c0_42] : memref<1x18x18x4xf32, #tpu.memory_space<vmem>>, vector<1x16x16x4xf32>
    %39 = vector.shape_cast %38 : vector<1x16x16x4xf32> to vector<16x16x4xf32>
    %40 = vector.shape_cast %39 : vector<16x16x4xf32> to vector<256x4xf32>
    %c5 = arith.constant 5 : index
    %c0_43 = arith.constant 0 : index
    %c0_44 = arith.constant 0 : index
    %41 = vector.load %arg2[%c5, %c0_43, %c0_44] : memref<9x4x128xf32, #tpu.memory_space<vmem>>, vector<1x4x128xf32>
    %42 = vector.shape_cast %41 : vector<1x4x128xf32> to vector<4x128xf32>
    %cst_45 = arith.constant dense<0.000000e+00> : vector<256x128xf32>
    %43 = tpu.matmul %40, %42, %cst_45 {dimension_numbers = #tpu.dot_dimension_numbers<[1], [0], [0], [1], [0, 0, 1, 1], [], []>} : vector<256x4xf32>, vector<4x128xf32>, vector<256x128xf32> -> vector<256x128xf32>
    %44 = arith.addf %37, %43 : vector<256x128xf32>
    %c0_46 = arith.constant 0 : index
    %c2_47 = arith.constant 2 : index
    %c0_48 = arith.constant 0 : index
    %c0_49 = arith.constant 0 : index
    %45 = vector.load %arg1[%c0_46, %c2_47, %c0_48, %c0_49] : memref<1x18x18x4xf32, #tpu.memory_space<vmem>>, vector<1x16x16x4xf32>
    %46 = vector.shape_cast %45 : vector<1x16x16x4xf32> to vector<16x16x4xf32>
    %47 = vector.shape_cast %46 : vector<16x16x4xf32> to vector<256x4xf32>
    %c6 = arith.constant 6 : index
    %c0_50 = arith.constant 0 : index
    %c0_51 = arith.constant 0 : index
    %48 = vector.load %arg2[%c6, %c0_50, %c0_51] : memref<9x4x128xf32, #tpu.memory_space<vmem>>, vector<1x4x128xf32>
    %49 = vector.shape_cast %48 : vector<1x4x128xf32> to vector<4x128xf32>
    %cst_52 = arith.constant dense<0.000000e+00> : vector<256x128xf32>
    %50 = tpu.matmul %47, %49, %cst_52 {dimension_numbers = #tpu.dot_dimension_numbers<[1], [0], [0], [1], [0, 0, 1, 1], [], []>} : vector<256x4xf32>, vector<4x128xf32>, vector<256x128xf32> -> vector<256x128xf32>
    %51 = arith.addf %44, %50 : vector<256x128xf32>
    %c0_53 = arith.constant 0 : index
    %c2_54 = arith.constant 2 : index
    %c1_55 = arith.constant 1 : index
    %c0_56 = arith.constant 0 : index
    %52 = vector.load %arg1[%c0_53, %c2_54, %c1_55, %c0_56] : memref<1x18x18x4xf32, #tpu.memory_space<vmem>>, vector<1x16x16x4xf32>
    %53 = vector.shape_cast %52 : vector<1x16x16x4xf32> to vector<16x16x4xf32>
    %54 = vector.shape_cast %53 : vector<16x16x4xf32> to vector<256x4xf32>
    %c7 = arith.constant 7 : index
    %c0_57 = arith.constant 0 : index
    %c0_58 = arith.constant 0 : index
    %55 = vector.load %arg2[%c7, %c0_57, %c0_58] : memref<9x4x128xf32, #tpu.memory_space<vmem>>, vector<1x4x128xf32>
    %56 = vector.shape_cast %55 : vector<1x4x128xf32> to vector<4x128xf32>
    %cst_59 = arith.constant dense<0.000000e+00> : vector<256x128xf32>
    %57 = tpu.matmul %54, %56, %cst_59 {dimension_numbers = #tpu.dot_dimension_numbers<[1], [0], [0], [1], [0, 0, 1, 1], [], []>} : vector<256x4xf32>, vector<4x128xf32>, vector<256x128xf32> -> vector<256x128xf32>
    %58 = arith.addf %51, %57 : vector<256x128xf32>
    %c0_60 = arith.constant 0 : index
    %c2_61 = arith.constant 2 : index
    %c2_62 = arith.constant 2 : index
    %c0_63 = arith.constant 0 : index
    %59 = vector.load %arg1[%c0_60, %c2_61, %c2_62, %c0_63] : memref<1x18x18x4xf32, #tpu.memory_space<vmem>>, vector<1x16x16x4xf32>
    %60 = vector.shape_cast %59 : vector<1x16x16x4xf32> to vector<16x16x4xf32>
    %61 = vector.shape_cast %60 : vector<16x16x4xf32> to vector<256x4xf32>
    %c8 = arith.constant 8 : index
    %c0_64 = arith.constant 0 : index
    %c0_65 = arith.constant 0 : index
    %62 = vector.load %arg2[%c8, %c0_64, %c0_65] : memref<9x4x128xf32, #tpu.memory_space<vmem>>, vector<1x4x128xf32>
    %63 = vector.shape_cast %62 : vector<1x4x128xf32> to vector<4x128xf32>
    %cst_66 = arith.constant dense<0.000000e+00> : vector<256x128xf32>
    %64 = tpu.matmul %61, %63, %cst_66 {dimension_numbers = #tpu.dot_dimension_numbers<[1], [0], [0], [1], [0, 0, 1, 1], [], []>} : vector<256x4xf32>, vector<4x128xf32>, vector<256x128xf32> -> vector<256x128xf32>
    %65 = arith.addf %58, %64 : vector<256x128xf32>
    %66 = vector.broadcast %0 : vector<1x128xf32> to vector<256x128xf32>
    %67 = arith.mulf %65, %66 : vector<256x128xf32>
    %68 = vector.broadcast %1 : vector<1x128xf32> to vector<256x128xf32>
    %69 = arith.addf %67, %68 : vector<256x128xf32>
    %cst_67 = arith.constant 0.000000e+00 : f32
    %70 = vector.broadcast %cst_67 : f32 to vector<256x128xf32>
    %71 = arith.cmpf oge, %69, %70 : vector<256x128xf32>
    %cst_68 = arith.constant 1.000000e-01 : f32
    %72 = vector.broadcast %cst_68 : f32 to vector<256x128xf32>
    %73 = arith.mulf %72, %69 : vector<256x128xf32>
    %74 = arith.select %71, %69, %73 : vector<256x128xi1>, vector<256x128xf32>
    %75 = tpu.transpose %74, [1, 0] : vector<256x128xf32> -> vector<128x256xf32>
    %c0_69 = arith.constant 0 : index
    %c0_70 = arith.constant 0 : index
    %c0_71 = arith.constant 0 : index
    %76 = vector.load %arg5[%c0_69, %c0_70, %c0_71] : memref<1x128x256xf32, #tpu.memory_space<vmem>>, vector<1x128x256xf32>
    %77 = vector.shape_cast %76 : vector<1x128x256xf32> to vector<128x256xf32>
    %78 = vector.shape_cast %75 : vector<128x256xf32> to vector<1x128x256xf32>
    tpu.vector_store %arg5[%c0_69, %c0_70, %c0_71], %78 {strides = array<i32>} : memref<1x128x256xf32, #tpu.memory_space<vmem>>, vector<1x128x256xf32>,
    return
  }
  func.func @transform_0(%arg0: i32) -> (i32, i32, i32, i32) {
    %c0_i32 = arith.constant 0 : i32
    %c0_i32_0 = arith.constant 0 : i32
    %c0_i32_1 = arith.constant 0 : i32
    %c0_i32_2 = arith.constant 0 : i32
    return %arg0, %c0_i32, %c0_i32_0, %c0_i32_1 : i32, i32, i32, i32
  }
  func.func @transform_1(%arg0: i32) -> (i32, i32, i32) {
    %c0_i32 = arith.constant 0 : i32
    %c0_i32_0 = arith.constant 0 : i32
    %c0_i32_1 = arith.constant 0 : i32
    %c0_i32_2 = arith.constant 0 : i32
    return %c0_i32, %c0_i32_0, %c0_i32_1 : i32, i32, i32
  }
  func.func @transform_2(%arg0: i32) -> (i32, i32) {
    %c0_i32 = arith.constant 0 : i32
    %c0_i32_0 = arith.constant 0 : i32
    %c0_i32_1 = arith.constant 0 : i32
    return %c0_i32, %c0_i32_0 : i32, i32
  }
  func.func @transform_3(%arg0: i32) -> (i32, i32) {
    %c0_i32 = arith.constant 0 : i32
    %c0_i32_0 = arith.constant 0 : i32
    %c0_i32_1 = arith.constant 0 : i32
    return %c0_i32, %c0_i32_0 : i32, i32
  }
  func.func @transform_4(%arg0: i32) -> (i32, i32, i32) {
    %c0_i32 = arith.constant 0 : i32
    %c0_i32_0 = arith.constant 0 : i32
    %c0_i32_1 = arith.constant 0 : i32
    return %arg0, %c0_i32, %c0_i32_0 : i32, i32, i32
  }
}

</mosaic_0001>

<bundles_post_ra>
// kernel: cnn_block.2
= control target key start
LH: loop header
LB: loop body
LE: loop exit
PB: predicated region body
PF: predicated region fallthrough
CT: control target
= control target key end

     0   :  { %s5354_s12 = smov 0   ;;  %s6312_s0 = inlined_call_operand.vmem [shape: f32[2,18,18,4], index: 0, kind: input, shape index: {}]   ;;  %s6313_s1 = inlined_call_operand.vmem [shape: f32[9,4,128], index: 1, kind: input, shape index: {}]   ;;  %s6314_s2 = inlined_call_operand.vmem [shape: f32[2,1,128], index: 2, kind: output, shape index: {0}]   ;;  %s6315_s3 = inlined_call_operand.vmem [shape: f32[2,1,128], index: 3, kind: output, shape index: {1}]  }
   0x1 LB: > { %s3807_s13 = sadd.s32 4294967295, %s5332_s12   ;;  %p3811_p0 = scmp.ge.s32.totalorder %s5332_s12, 1  ;;  %s5332_s12 = sphi %s5354_s12, %s14_s12  }
   0x2   : > { %p140_p1 = scmp.lt.s32.totalorder %s5332_s12, 3 }
   0x4   : > { %p141_p2 = pnand %p3811_p0, %p140_p1 }
   0x6   : > { %144 = sbr.rel (%p141_p2) target bundleno = 539 (0x21b), region = 28 }
   0xd   : > { %v3813_v0 = vld [vmem:[%s6313_s1 + $0x4] sm:$0xf]  ;;  %vm340_vm0 = vcmask 1043456   ;;  %v5368_v1 = vld [vmem:[%s6313_s1 + $0x10] sm:$0xf]  ;;  %p165_p3 = scmp.lt.s32.totalorder %s3807_s13, 1 }
   0xe   : > { %4609 = vmatprep.subr.msk.mxu1 %vm340_vm0, %v3813_v0  ;;  %4809 = vmatprep.subr.msk.mxu0 %vm340_vm0, %v5368_v1  ;;  %v208_v2 = vld [vmem:[%s6313_s1] sm:$0xf]  ;;  %v4078_v3 = vld [vmem:[%s6313_s1 + $0x14] sm:$0xf]  ;;  %vm243_vm1 = vcmask 31744  }
   0xf   : > { %4610 = vmatpush3.msk.msra.mxu1 %vm340_vm0, %v3813_v0  ;;  %4810 = vmatpush3.msk.msra.mxu0 %vm340_vm0, %v5368_v1  ;;  %s6426_s13 = smov (!%p165_p3, %s3807_s13), 1  ;;  %v4144_v9 = vld [vmem:[%s6313_s1 + $0x18] sm:$0xf]  ;;  %v5409_v10 = vld [vmem:[%s6313_s1 + $0x8] sm:$0xf] }
  0x10   : > { %4659 = vmatprep.subr.msk.mxu1 %vm340_vm0, %v208_v2  ;;  %4859 = vmatprep.subr.msk.mxu0 %vm340_vm0, %v4078_v3  ;;  %s5317_s22 = smul.u32 432, %s6426_s13  ;;  %v5528_v28 = vld [vmem:[%s6313_s1 + $0x1c] sm:$0xf]  ;;  %v5691_v61 = vld [vmem:[%s6313_s1 + $0xc] sm:$0xf]  ;;  %s172_s11 = scalar_lea.vmem %s6314_s2, %s6426_s13 }
  0x11   : > { %s175_s16 = scalar_lea.vmem %s6315_s3, %s6426_s13 }
  0x12   : > { %s5390_s25 = scalar_lea.vmem %s6312_s0, %s5317_s22 }
  0x13   : > { %v209_v4 = vld [vmem:[%s5390_s25 + $0x1] sm:$0xff]  ;;  %v3980_v5 = vld [vmem:[%s5390_s25 + $0x19] sm:$0xff]  ;;  %v210_v6 = vld [vmem:[%s5390_s25 + $0x9] sm:$0xff] }
  0x14   : > { %4611 = vmatprep.mubr.msk.f32.mxu1 %vm243_vm1, %v209_v4  ;;  %4811 = vmatprep.mubr.msk.f32.mxu0 %vm243_vm1, %v3980_v5  ;;  %v3981_v7 = vld [vmem:[%s5390_s25 + $0x21] sm:$0xff]  ;;  %v5399_v8 = vld [vmem:[%s5390_s25 + $0x31] sm:$0xff]  ;;  %v5414_v11 = vld [vmem:[%s5390_s25 + $0x39] sm:$0xff] }
  0x15   : > { %4612 = vmatmul.mubr.msk.f32.vlgmr.msra.gmra.mrb[0].mxu1 %vm243_vm1, %v210_v6  ;;  %4812 = vmatmul.mubr.msk.f32.vlgmr.msra.gmra.mrb[0].mxu0 %vm243_vm1, %v3981_v7  ;;  %v5420_v12 = vld [vmem:[%s5390_s25 + $0x49] sm:$0xff]  ;;  %v5433_v13 = vld [vmem:[%s5390_s25 + $0x51] sm:$0xff]  ;;  %v5436_v14 = vld [vmem:[%s5390_s25 + $0x61] sm:$0xff] }
  0x16   : > { %4660 = vmatpush3.msk.msra.mxu1 %vm340_vm0, %v208_v2  ;;  %4860 = vmatpush3.msk.msra.mxu0 %vm340_vm0, %v4078_v3  ;;  %v5447_v15 = vld [vmem:[%s5390_s25 + $0x69] sm:$0xff]  ;;  %v5450_v16 = vld [vmem:[%s5390_s25 + $0x79] sm:$0xff]  ;;  %v5461_v17 = vld [vmem:[%s5390_s25 + $0x81] sm:$0xff] }
  0x17   : > { %4614 = vmatprep.mubr.msk.f32.mxu1 %vm243_vm1, %v3980_v5  ;;  %4814 = vmatprep.mubr.msk.f32.mxu0 %vm243_vm1, %v5399_v8  ;;  %v5464_v18 = vld [vmem:[%s5390_s25 + $0x91] sm:$0xff]  ;;  %v5475_v19 = vld [vmem:[%s5390_s25 + $0x99] sm:$0xff]  ;;  %v5478_v20 = vld [vmem:[%s5390_s25 + $0xa9] sm:$0xff] }
  0x18   : > { %4909 = vmatprep.subr.msk.mxu0 %vm340_vm0, %v4144_v9  ;;  %4709 = vmatprep.subr.msk.mxu1 %vm340_vm0, %v5409_v10  ;;  %v5489_v21 = vld [vmem:[%s5390_s25 + $0xb1] sm:$0xff]  ;;  %v5492_v22 = vld [vmem:[%s5390_s25 + $0xc1] sm:$0xff]  ;;  %v5503_v23 = vld [vmem:[%s5390_s25 + $0xc9] sm:$0xff] }
  0x19   : > { %4615 = vmatmul.mubr.msk.f32.gmra.mrb[2].mxu1 %vm243_vm1, %v3981_v7  ;;  %4815 = vmatmul.mubr.msk.f32.gmra.mrb[2].mxu0 %vm243_vm1, %v5414_v11  ;;  %v5506_v24 = vld [vmem:[%s5390_s25 + $0x1a] sm:$0xff]  ;;  %v5517_v25 = vld [vmem:[%s5390_s25 + $0x22] sm:$0xff]  ;;  %v5523_v27 = vld [vmem:[%s5390_s25 + $0x32] sm:$0xff] }
  0x1a   : > { %4617 = vmatprep.mubr.msk.f32.mxu1 %vm243_vm1, %v5399_v8  ;;  %4817 = vmatprep.mubr.msk.f32.mxu0 %vm243_vm1, %v5420_v12  ;;  %v5520_v26 = vld [vmem:[%s5390_s25 + $0xd9] sm:$0xff]  ;;  %v5538_v29 = vld [vmem:[%s5390_s25 + $0xe1] sm:$0xff]  ;;  %v5546_v31 = vld [vmem:[%s5390_s25 + $0xf1] sm:$0xff] }
  0x1b   : > { %6361 = vst [vmem:[#allocation2_spill] sm:$0xff] %v5538_v29  ;;  %v5541_v30 = vld [vmem:[%s5390_s25 + $0x3a] sm:$0xff]  ;;  %6362 = vst [vmem:[#allocation3_spill] sm:$0xff] %v5546_v31  ;;  %v5549_v32 = vld [vmem:[%s5390_s25 + $0x4a] sm:$0xff] }
  0x1c   : > { %v5562_v33 = vld [vmem:[%s5390_s25 + $0xf9] sm:$0xff]  ;;  %v5568_v35 = vld [vmem:[%s5390_s25 + $0x109] sm:$0xff]  ;;  %v5582_v37 = vld [vmem:[%s5390_s25 + $0x111] sm:$0xff] }
  0x1d   : > { %4618 = vmatmul.mubr.msk.f32.gmra.mrb[4].mxu1 %vm243_vm1, %v5414_v11  ;;  %4818 = vmatmul.mubr.msk.f32.gmra.mrb[4].mxu0 %vm243_vm1, %v5433_v13  ;;  %6363 = vst [vmem:[#allocation4_spill] sm:$0xff] %v5562_v33  ;;  %v5565_v34 = vld [vmem:[%s5390_s25 + $0x52] sm:$0xff]  ;;  %6364 = vst [vmem:[#allocation5_spill] sm:$0xff] %v5568_v35  ;;  %v5571_v36 = vld [vmem:[%s5390_s25 + $0x62] sm:$0xff] }
  0x1e   : > { %4620 = vmatprep.mubr.msk.f32.mxu1 %vm243_vm1, %v5420_v12  ;;  %4820 = vmatprep.mubr.msk.f32.mxu0 %vm243_vm1, %v5436_v14  ;;  %6365 = vst [vmem:[#allocation6_spill] sm:$0xff] %v5582_v37  ;;  %v5585_v38 = vld [vmem:[%s5390_s25 + $0x6a] sm:$0xff]  ;;  %v5588_v39 = vld [vmem:[%s5390_s25 + $0x121] sm:$0xff]  ;;  %v5608_v43 = vld [vmem:[%s5390_s25 + $0x139] sm:$0xff] }
  0x1f   : > { %6366 = vst [vmem:[#allocation7_spill] sm:$0xff] %v5588_v39  ;;  %v5591_v40 = vld [vmem:[%s5390_s25 + $0x7a] sm:$0xff]  ;;  %v5602_v41 = vld [vmem:[%s5390_s25 + $0x129] sm:$0xff]  ;;  %6368 = vst [vmem:[#allocation9_spill] sm:$0xff] %v5608_v43 }
  0x20   : > { %6367 = vst [vmem:[#allocation8_spill] sm:$0xff] %v5602_v41  ;;  %v5605_v42 = vld [vmem:[%s5390_s25 + $0x82] sm:$0xff]  ;;  %v5611_v44 = vld [vmem:[%s5390_s25 + $0x92] sm:$0xff]  ;;  %v5625_v46 = vld [vmem:[%s5390_s25 + $0x9a] sm:$0xff] }
  0x21   : > { %4621 = vmatmul.mubr.msk.f32.gmra.mrb[6].mxu1 %vm243_vm1, %v5433_v13  ;;  %4821 = vmatmul.mubr.msk.f32.gmra.mrb[6].mxu0 %vm243_vm1, %v5447_v15  ;;  %v5622_v45 = vld [vmem:[%s5390_s25 + $0x141] sm:$0xff]  ;;  %v5628_v47 = vld [vmem:[%s5390_s25 + $0x151] sm:$0xff]  ;;  %v5642_v49 = vld [vmem:[%s5390_s25 + $0x159] sm:$0xff] }
  0x22   : > { %4623 = vmatprep.mubr.msk.f32.mxu1 %vm243_vm1, %v5436_v14  ;;  %4823 = vmatprep.mubr.msk.f32.mxu0 %vm243_vm1, %v5450_v16  ;;  %6369 = vst [vmem:[#allocation10_spill] sm:$0xff] %v5622_v45  ;;  %6370 = vst [vmem:[#allocation11_spill] sm:$0xff] %v5628_v47  ;;  %v5631_v48 = vld [vmem:[%s5390_s25 + $0xaa] sm:$0xff]  ;;  %v5645_v50 = vld [vmem:[%s5390_s25 + $0xb2] sm:$0xff] }
  0x23   : > { %6371 = vst [vmem:[#allocation12_spill] sm:$0xff] %v5642_v49  ;;  %v5648_v51 = vld [vmem:[%s5390_s25 + $0x169] sm:$0xff]  ;;  %v5662_v53 = vld [vmem:[%s5390_s25 + $0x171] sm:$0xff]  ;;  %v176_v55 = vld [vmem:[%s5390_s25] sm:$0xff] }
  0x24   : > { %6372 = vst [vmem:[#allocation13_spill] sm:$0xff] %v5648_v51  ;;  %v5651_v52 = vld [vmem:[%s5390_s25 + $0xc2] sm:$0xff]  ;;  %6373 = vst [vmem:[#allocation14_spill] sm:$0xff] %v5662_v53  ;;  %v5665_v54 = vld [vmem:[%s5390_s25 + $0xca] sm:$0xff] }
  0x25   : > { %4624 = vmatmul.mubr.msk.f32.gmra.mrb[8].mxu1 %vm243_vm1, %v5447_v15  ;;  %4824 = vmatmul.mubr.msk.f32.gmra.mrb[8].mxu0 %vm243_vm1, %v5461_v17  ;;  %v5669_v56 = vld [vmem:[%s5390_s25 + $0xda] sm:$0xff]  ;;  %v177_v57 = vld [vmem:[%s5390_s25 + $0x8] sm:$0xff]  ;;  %v5686_v60 = vld [vmem:[%s5390_s25 + $0xf2] sm:$0xff] }
  0x26   : > { %4626 = vmatprep.mubr.msk.f32.mxu1 %vm243_vm1, %v5450_v16  ;;  %4826 = vmatprep.mubr.msk.f32.mxu0 %vm243_vm1, %v5464_v18  ;;  %v5680_v58 = vld [vmem:[%s5390_s25 + $0xe2] sm:$0xff]  ;;  %v5683_v59 = vld [vmem:[%s5390_s25 + $0x18] sm:$0xff]  ;;  %v5709_v0 = vld [vmem:[%s5390_s25 + $0x30] sm:$0xff] }
  0x27   : > { %6374 = vst [vmem:[#allocation15_spill] sm:$0xff] %v5683_v59  ;;  %v5701_v62 = vld [vmem:[%s5390_s25 + $0x20] sm:$0xff]  ;;  %6376 = vst [vmem:[#allocation17_spill] sm:$0xff] %v5709_v0  ;;  %v5712_v2 = vld [vmem:[%s5390_s25 + $0x10a] sm:$0xff] }
  0x28   : > { %6375 = vst [vmem:[#allocation16_spill] sm:$0xff] %v5701_v62  ;;  %v5704_v63 = vld [vmem:[%s5390_s25 + $0xfa] sm:$0xff]  ;;  %v5728_v4 = vld [vmem:[%s5390_s25 + $0x112] sm:$0xff]  ;;  %v5731_v5 = vld [vmem:[%s5390_s25 + $0x48] sm:$0xff] }
  0x29   : > { %4627 = vmatmul.mubr.msk.f32.gmra.mrb[10].mxu1 %vm243_vm1, %v5461_v17  ;;  %4827 = vmatmul.mubr.msk.f32.gmra.mrb[10].mxu0 %vm243_vm1, %v5475_v19  ;;  %v5725_v3 = vld [vmem:[%s5390_s25 + $0x38] sm:$0xff]  ;;  %6378 = vst [vmem:[#allocation19_spill] sm:$0xff] %v5731_v5  ;;  %v5734_v6 = vld [vmem:[%s5390_s25 + $0x122] sm:$0xff]  ;;  %v5745_v7 = vld [vmem:[%s5390_s25 + $0x50] sm:$0xff] }
  0x2a   : > { %4629 = vmatprep.mubr.msk.f32.mxu1 %vm243_vm1, %v5464_v18  ;;  %4829 = vmatprep.mubr.msk.f32.mxu0 %vm243_vm1, %v5478_v20  ;;  %6377 = vst [vmem:[#allocation18_spill] sm:$0xff] %v5725_v3  ;;  %6379 = vst [vmem:[#allocation20_spill] sm:$0xff] %v5745_v7 }
  0x2d   : > { %4630 = vmatmul.mubr.msk.f32.gmra.mrb[12].mxu1 %vm243_vm1, %v5475_v19  ;;  %4830 = vmatmul.mubr.msk.f32.gmra.mrb[12].mxu0 %vm243_vm1, %v5489_v21 }
  0x2e   : > { %4632 = vmatprep.mubr.msk.f32.mxu1 %vm243_vm1, %v5478_v20  ;;  %4832 = vmatprep.mubr.msk.f32.mxu0 %vm243_vm1, %v5492_v22 }
  0x31   : > { %4633 = vmatmul.mubr.msk.f32.gmra.mrb[14].mxu1 %vm243_vm1, %v5489_v21  ;;  %4833 = vmatmul.mubr.msk.f32.gmra.mrb[14].mxu0 %vm243_vm1, %v5503_v23 }
  0x32   : > { %4635 = vmatprep.mubr.msk.f32.mxu1 %vm243_vm1, %v5492_v22  ;;  %4861 = vmatprep.mubr.msk.f32.mxu0 %vm243_vm1, %v5506_v24 }
  0x35   : > { %4636 = vmatmul.mubr.msk.f32.gmra.mrb[16].mxu1 %vm243_vm1, %v5503_v23  ;;  %4862 = vmatmul.mubr.msk.f32.vlgmr.msra.gmra.mrb[0].mxu0 %vm243_vm1, %v5517_v25 }
  0x36   : > { %4910 = vmatpush3.msk.msra.mxu0 %vm340_vm0, %v4144_v9  ;;  %4638 = vmatprep.mubr.msk.f32.mxu1 %vm243_vm1, %v5520_v26  ;;  %v5748_v9 = vld [vmem:[%s5390_s25 + $0x12a] sm:$0xff] }
  0x37   : > { %4864 = vmatprep.mubr.msk.f32.mxu0 %vm243_vm1, %v5523_v27  ;;  %4959 = vmatprep.subr.msk.mxu0 %vm340_vm0, %v5528_v28 }
  0x39   : > { %4639 = vmatmul.mubr.msk.f32.gmra.mrb[18].mxu1 %vm243_vm1, %v5538_v29  ;;  %4865 = vmatmul.mubr.msk.f32.gmra.mrb[2].mxu0 %vm243_vm1, %v5541_v30  ;;  %v5845_v29 = vld [vmem:[%s5390_s25 + $0xd8] sm:$0xff] }
  0x3a   : > { %4641 = vmatprep.mubr.msk.f32.mxu1 %vm243_vm1, %v5546_v31  ;;  %4867 = vmatprep.mubr.msk.f32.mxu0 %vm243_vm1, %v5549_v32  ;;  %v5828_v31 = vld [vmem:[%s5390_s25 + $0x18a] sm:$0xff] }
  0x3b   : > { %6390 = vst [vmem:[#allocation31_spill] sm:$0xff] %v5828_v31 }
  0x3d   : > { %4642 = vmatmul.mubr.msk.f32.gmra.mrb[20].mxu1 %vm243_vm1, %v5562_v33  ;;  %4868 = vmatmul.mubr.msk.f32.gmra.mrb[4].mxu0 %vm243_vm1, %v5565_v34  ;;  %v5814_v33 = vld [vmem:[%s5390_s25 + $0x182] sm:$0xff] }
  0x3e   : > { %4644 = vmatprep.mubr.msk.f32.mxu1 %vm243_vm1, %v5568_v35  ;;  %4870 = vmatprep.mubr.msk.f32.mxu0 %vm243_vm1, %v5571_v36  ;;  %v5811_v35 = vld [vmem:[%s5390_s25 + $0xa8] sm:$0xff]  ;;  %6388 = vst [vmem:[#allocation29_spill] sm:$0xff] %v5814_v33 }
  0x3f   : > { %6387 = vst [vmem:[#allocation28_spill] sm:$0xff] %v5811_v35 }
  0x41   : > { %4645 = vmatmul.mubr.msk.f32.gmra.mrb[22].mxu1 %vm243_vm1, %v5582_v37  ;;  %4871 = vmatmul.mubr.msk.f32.gmra.mrb[6].mxu0 %vm243_vm1, %v5585_v38  ;;  %v5808_v37 = vld [vmem:[%s5390_s25 + $0x172] sm:$0xff] }
  0x42   : > { %4647 = vmatprep.mubr.msk.f32.mxu1 %vm243_vm1, %v5588_v39  ;;  %4873 = vmatprep.mubr.msk.f32.mxu0 %vm243_vm1, %v5591_v40  ;;  %v5805_v39 = vld [vmem:[%s5390_s25 + $0x98] sm:$0xff]  ;;  %6386 = vst [vmem:[#allocation27_spill] sm:$0xff] %v5808_v37 }
  0x43   : > { %6385 = vst [vmem:[#allocation26_spill] sm:$0xff] %v5805_v39 }
  0x45   : > { %4648 = vmatmul.mubr.msk.f32.gmra.mrb[24].mxu1 %vm243_vm1, %v5602_v41  ;;  %4874 = vmatmul.mubr.msk.f32.gmra.mrb[8].mxu0 %vm243_vm1, %v5605_v42  ;;  %v5794_v41 = vld [vmem:[%s5390_s25 + $0x16a] sm:$0xff] }
  0x46   : > { %4650 = vmatprep.mubr.msk.f32.mxu1 %vm243_vm1, %v5608_v43  ;;  %4876 = vmatprep.mubr.msk.f32.mxu0 %vm243_vm1, %v5611_v44  ;;  %v5791_v43 = vld [vmem:[%s5390_s25 + $0x90] sm:$0xff] }
  0x47   : > { %6384 = vst [vmem:[#allocation25_spill] sm:$0xff] %v5791_v43 }
  0x49   : > { %4651 = vmatmul.mubr.msk.f32.gmra.mrb[26].mxu1 %vm243_vm1, %v5622_v45  ;;  %4877 = vmatmul.mubr.msk.f32.gmra.mrb[10].mxu0 %vm243_vm1, %v5625_v46  ;;  %v5788_v45 = vld [vmem:[%s5390_s25 + $0x15a] sm:$0xff] }
  0x4a   : > { %4653 = vmatprep.mubr.msk.f32.mxu1 %vm243_vm1, %v5628_v47  ;;  %4879 = vmatprep.mubr.msk.f32.mxu0 %vm243_vm1, %v5631_v48  ;;  %v5785_v47 = vld [vmem:[%s5390_s25 + $0x80] sm:$0xff] }
  0x4b   : > { %6383 = vst [vmem:[#allocation24_spill] sm:$0xff] %v5785_v47 }
  0x4d   : > { %4654 = vmatmul.mubr.msk.f32.gmra.mrb[28].mxu1 %vm243_vm1, %v5642_v49  ;;  %4880 = vmatmul.mubr.msk.f32.gmra.mrb[12].mxu0 %vm243_vm1, %v5645_v50  ;;  %v5774_v49 = vld [vmem:[%s5390_s25 + $0x152] sm:$0xff] }
  0x4e   : > { %4656 = vmatprep.mubr.msk.f32.mxu1 %vm243_vm1, %v5648_v51  ;;  %4882 = vmatprep.mubr.msk.f32.mxu0 %vm243_vm1, %v5651_v52  ;;  %v5771_v51 = vld [vmem:[%s5390_s25 + $0x78] sm:$0xff] }
  0x4f   : > { %6382 = vst [vmem:[#allocation23_spill] sm:$0xff] %v5771_v51 }
  0x51   : > { %4657 = vmatmul.mubr.msk.f32.gmra.mrb[30].mxu1 %vm243_vm1, %v5662_v53  ;;  %4883 = vmatmul.mubr.msk.f32.gmra.mrb[14].mxu0 %vm243_vm1, %v5665_v54  ;;  %v5768_v53 = vld [vmem:[%s5390_s25 + $0x142] sm:$0xff] }
  0x52   : > { %4661 = vmatprep.mubr.msk.f32.mxu1 %vm243_vm1, %v176_v55  ;;  %4885 = vmatprep.mubr.msk.f32.mxu0 %vm243_vm1, %v5669_v56  ;;  %v5754_v55 = vld [vmem:[%s5390_s25 + $0x13a] sm:$0xff] }
  0x55   : > { %4662 = vmatmul.mubr.msk.f32.vlgmr.msra.gmra.mrb[0].mxu1 %vm243_vm1, %v177_v57  ;;  %4886 = vmatmul.mubr.msk.f32.gmra.mrb[16].mxu0 %vm243_vm1, %v5680_v58  ;;  %v5765_v57 = vld [vmem:[%s5390_s25 + $0x68] sm:$0xff] }
  0x56   : > { %4710 = vmatpush3.msk.msra.mxu1 %vm340_vm0, %v5409_v10  ;;  %4664 = vmatprep.mubr.msk.f32.mxu1 %vm243_vm1, %v5683_v59  ;;  %v5751_v10 = vld [vmem:[%s5390_s25 + $0x60] sm:$0xff]  ;;  %6381 = vst [vmem:[#allocation22_spill] sm:$0xff] %v5765_v57 }
  0x57   : > { %4888 = vmatprep.mubr.msk.f32.mxu0 %vm243_vm1, %v5686_v60  ;;  %4759 = vmatprep.subr.msk.mxu1 %vm340_vm0, %v5691_v61  ;;  %6380 = vst [vmem:[#allocation21_spill] sm:$0xff] %v5751_v10  ;;  %v5831_v59 = vld [vmem:[%s5390_s25 + $0xc0] sm:$0xff] }
  0x59   : > { %4665 = vmatmul.mubr.msk.f32.gmra.mrb[2].mxu1 %vm243_vm1, %v5701_v62  ;;  %4889 = vmatmul.mubr.msk.f32.gmra.mrb[18].mxu0 %vm243_vm1, %v5704_v63  ;;  %v5825_v62 = vld [vmem:[%s5390_s25 + $0xb0] sm:$0xff] }
  0x5a   : > { %4667 = vmatprep.mubr.msk.f32.mxu1 %vm243_vm1, %v5709_v0  ;;  %4891 = vmatprep.mubr.msk.f32.mxu0 %vm243_vm1, %v5712_v2  ;;  %6389 = vst [vmem:[#allocation30_spill] sm:$0xff] %v5825_v62 }
  0x5d   : > { %4668 = vmatmul.mubr.msk.f32.gmra.mrb[4].mxu1 %vm243_vm1, %v5725_v3  ;;  %4892 = vmatmul.mubr.msk.f32.gmra.mrb[20].mxu0 %vm243_vm1, %v5728_v4 }
  0x5e   : > { %4670 = vmatprep.mubr.msk.f32.mxu1 %vm243_vm1, %v5731_v5  ;;  %4894 = vmatprep.mubr.msk.f32.mxu0 %vm243_vm1, %v5734_v6 }
  0x61   : > { %4671 = vmatmul.mubr.msk.f32.gmra.mrb[6].mxu1 %vm243_vm1, %v5745_v7  ;;  %4895 = vmatmul.mubr.msk.f32.gmra.mrb[22].mxu0 %vm243_vm1, %v5748_v9 }
  0x62   : > { %4673 = vmatprep.mubr.msk.f32.mxu1 %vm243_vm1, %v5751_v10  ;;  %4897 = vmatprep.mubr.msk.f32.mxu0 %vm243_vm1, %v5754_v55 }
  0x65   : > { %4674 = vmatmul.mubr.msk.f32.gmra.mrb[8].mxu1 %vm243_vm1, %v5765_v57  ;;  %4898 = vmatmul.mubr.msk.f32.gmra.mrb[24].mxu0 %vm243_vm1, %v5768_v53 }
  0x66   : > { %4676 = vmatprep.mubr.msk.f32.mxu1 %vm243_vm1, %v5771_v51  ;;  %4900 = vmatprep.mubr.msk.f32.mxu0 %vm243_vm1, %v5774_v49 }
  0x69   : > { %4677 = vmatmul.mubr.msk.f32.gmra.mrb[10].mxu1 %vm243_vm1, %v5785_v47  ;;  %4901 = vmatmul.mubr.msk.f32.gmra.mrb[26].mxu0 %vm243_vm1, %v5788_v45 }
  0x6a   : > { %4679 = vmatprep.mubr.msk.f32.mxu1 %vm243_vm1, %v5791_v43  ;;  %4903 = vmatprep.mubr.msk.f32.mxu0 %vm243_vm1, %v5794_v41 }
  0x6d   : > { %4680 = vmatmul.mubr.msk.f32.gmra.mrb[12].mxu1 %vm243_vm1, %v5805_v39  ;;  %4904 = vmatmul.mubr.msk.f32.gmra.mrb[28].mxu0 %vm243_vm1, %v5808_v37  ;;  %v5850_v37 = vld [vmem:[%s6313_s1 + $0x20] sm:$0xf] }
  0x6e   : > { %4682 = vmatprep.mubr.msk.f32.mxu1 %vm243_vm1, %v5811_v35  ;;  %4906 = vmatprep.mubr.msk.f32.mxu0 %vm243_vm1, %v5814_v33  ;;  %v5842_v33 = vld [vmem:[%s5390_s25 + $0xc8] sm:$0xff] }
  0x6f   : > { %6391 = vst [vmem:[#allocation32_spill] sm:$0xff] %v5842_v33 }
  0x71   : > { %4683 = vmatmul.mubr.msk.f32.gmra.mrb[14].mxu1 %vm243_vm1, %v5825_v62  ;;  %4907 = vmatmul.mubr.msk.f32.gmra.mrb[30].mxu0 %vm243_vm1, %v5828_v31  ;;  %v5861_v31 = vld [vmem:[%s5390_s25 + $0xe0] sm:$0xff] }
  0x72   : > { %4685 = vmatprep.mubr.msk.f32.mxu1 %vm243_vm1, %v5831_v59  ;;  %4911 = vmatprep.mubr.msk.f32.mxu0 %vm243_vm1, %v5709_v0  ;;  %v5866_v0 = vld [vmem:[%s5390_s25 + $0xf0] sm:$0xff] }
  0x75   : > { %4686 = vmatmul.mubr.msk.f32.gmra.mrb[16].mxu1 %vm243_vm1, %v5842_v33  ;;  %4912 = vmatmul.mubr.msk.f32.vlgmr.msra.gmra.mrb[0].mxu0 %vm243_vm1, %v5725_v3  ;;  %v893_v3 = vld [vmem:[%s5390_s25 + $0x2] sm:$0xff] }
  0x76   : > { %4960 = vmatpush3.msk.msra.mxu0 %vm340_vm0, %v5528_v28  ;;  %4688 = vmatprep.mubr.msk.f32.mxu1 %vm243_vm1, %v5845_v29  ;;  %v5879_v28 = vld [vmem:[%s5390_s25 + $0xf8] sm:$0xff] }
  0x77   : > { %4914 = vmatprep.mubr.msk.f32.mxu0 %vm243_vm1, %v5731_v5  ;;  %5009 = vmatprep.subr.msk.mxu0 %vm340_vm0, %v5850_v37  ;;  %v5882_v5 = vld [vmem:[%s5390_s25 + $0x108] sm:$0xff] }
  0x79   : > { %4689 = vmatmul.mubr.msk.f32.gmra.mrb[18].mxu1 %vm243_vm1, %v5861_v31  ;;  %4915 = vmatmul.mubr.msk.f32.gmra.mrb[2].mxu0 %vm243_vm1, %v5745_v7  ;;  %v5893_v7 = vld [vmem:[%s5390_s25 + $0x110] sm:$0xff] }
  0x7a   : > { %4691 = vmatprep.mubr.msk.f32.mxu1 %vm243_vm1, %v5866_v0  ;;  %4917 = vmatprep.mubr.msk.f32.mxu0 %vm243_vm1, %v5751_v10  ;;  %v5896_v10 = vld [vmem:[%s5390_s25 + $0x120] sm:$0xff] }
  0x7d   : > { %4692 = vmatmul.mubr.msk.f32.gmra.mrb[20].mxu1 %vm243_vm1, %v5879_v28  ;;  %4918 = vmatmul.mubr.msk.f32.gmra.mrb[4].mxu0 %vm243_vm1, %v5765_v57  ;;  %v5907_v57 = vld [vmem:[%s5390_s25 + $0x128] sm:$0xff] }
  0x7e   : > { %4694 = vmatprep.mubr.msk.f32.mxu1 %vm243_vm1, %v5882_v5  ;;  %4920 = vmatprep.mubr.msk.f32.mxu0 %vm243_vm1, %v5771_v51  ;;  %v5910_v51 = vld [vmem:[%s5390_s25 + $0x138] sm:$0xff] }
  0x81   : > { %4695 = vmatmul.mubr.msk.f32.gmra.mrb[22].mxu1 %vm243_vm1, %v5893_v7  ;;  %4921 = vmatmul.mubr.msk.f32.gmra.mrb[6].mxu0 %vm243_vm1, %v5785_v47  ;;  %v5921_v47 = vld [vmem:[%s5390_s25 + $0x140] sm:$0xff] }
  0x82   : > { %4697 = vmatprep.mubr.msk.f32.mxu1 %vm243_vm1, %v5896_v10  ;;  %4923 = vmatprep.mubr.msk.f32.mxu0 %vm243_vm1, %v5791_v43  ;;  %v5924_v43 = vld [vmem:[%s5390_s25 + $0x150] sm:$0xff] }
  0x85   : > { %4698 = vmatmul.mubr.msk.f32.gmra.mrb[24].mxu1 %vm243_vm1, %v5907_v57  ;;  %4924 = vmatmul.mubr.msk.f32.gmra.mrb[8].mxu0 %vm243_vm1, %v5805_v39  ;;  %v5935_v39 = vld [vmem:[%s5390_s25 + $0x158] sm:$0xff] }
  0x86   : > { %4700 = vmatprep.mubr.msk.f32.mxu1 %vm243_vm1, %v5910_v51  ;;  %4926 = vmatprep.mubr.msk.f32.mxu0 %vm243_vm1, %v5811_v35  ;;  %v5938_v35 = vld [vmem:[%s5390_s25 + $0x168] sm:$0xff] }
  0x89   : > { %4701 = vmatmul.mubr.msk.f32.gmra.mrb[26].mxu1 %vm243_vm1, %v5921_v47  ;;  %4927 = vmatmul.mubr.msk.f32.gmra.mrb[10].mxu0 %vm243_vm1, %v5825_v62  ;;  %v5949_v62 = vld [vmem:[%s5390_s25 + $0x170] sm:$0xff] }
  0x8a   : > { %4703 = vmatprep.mubr.msk.f32.mxu1 %vm243_vm1, %v5924_v43  ;;  %4929 = vmatprep.mubr.msk.f32.mxu0 %vm243_vm1, %v5831_v59 }
  0x8d   : > { %4704 = vmatmul.mubr.msk.f32.gmra.mrb[28].mxu1 %vm243_vm1, %v5935_v39  ;;  %4930 = vmatmul.mubr.msk.f32.gmra.mrb[12].mxu0 %vm243_vm1, %v5842_v33  ;;  %v894_v33 = vld [vmem:[%s5390_s25 + $0xa] sm:$0xff] }
  0x8e   : > { %4706 = vmatprep.mubr.msk.f32.mxu1 %vm243_vm1, %v5938_v35  ;;  %4932 = vmatprep.mubr.msk.f32.mxu0 %vm243_vm1, %v5845_v29 }
  0x91   : > { %4707 = vmatmul.mubr.msk.f32.gmra.mrb[30].mxu1 %vm243_vm1, %v5949_v62  ;;  %4933 = vmatmul.mubr.msk.f32.gmra.mrb[14].mxu0 %vm243_vm1, %v5861_v31 }
  0x92   : > { %4711 = vmatprep.mubr.msk.f32.mxu1 %vm243_vm1, %v893_v3  ;;  %4935 = vmatprep.mubr.msk.f32.mxu0 %vm243_vm1, %v5866_v0  ;;  %v6408_v3 = vld [vmem:[#allocation22_spill] sm:$0xff] }
  0x95   : > { %4712 = vmatmul.mubr.msk.f32.vlgmr.msra.gmra.mrb[0].mxu1 %vm243_vm1, %v894_v33  ;;  %4936 = vmatmul.mubr.msk.f32.gmra.mrb[16].mxu0 %vm243_vm1, %v5879_v28  ;;  %v4142_v33 = vld [vmem:[%s5390_s25 + $0x198] sm:$0xff] }
  0x96   : > { %4760 = vmatpush3.msk.msra.mxu1 %vm340_vm0, %v5691_v61  ;;  %4714 = vmatprep.mubr.msk.f32.mxu1 %vm243_vm1, %v5506_v24  ;;  %v6004_v24 = vld [vmem:[%s5390_s25 + $0x180] sm:$0xff] }
  0x97   : > { %4938 = vmatprep.mubr.msk.f32.mxu0 %vm243_vm1, %v5882_v5  ;;  %5059 = vmatprep.subr.msk.mxu1 %vm340_vm0, %v5368_v1  ;;  %v4143_v61 = vld [vmem:[%s5390_s25 + $0x1a0] sm:$0xff] }
  0x99   : > { %4715 = vmatmul.mubr.msk.f32.gmra.mrb[2].mxu1 %vm243_vm1, %v5517_v25  ;;  %4939 = vmatmul.mubr.msk.f32.gmra.mrb[18].mxu0 %vm243_vm1, %v5893_v7  ;;  %v6015_v25 = vld [vmem:[%s5390_s25 + $0x188] sm:$0xff] }
  0x9a   : > { %4717 = vmatprep.mubr.msk.f32.mxu1 %vm243_vm1, %v5523_v27  ;;  %4941 = vmatprep.mubr.msk.f32.mxu0 %vm243_vm1, %v5896_v10 }
  0x9d   : > { %4718 = vmatmul.mubr.msk.f32.gmra.mrb[4].mxu1 %vm243_vm1, %v5541_v30  ;;  %4942 = vmatmul.mubr.msk.f32.gmra.mrb[20].mxu0 %vm243_vm1, %v5907_v57 }
  0x9e   : > { %4720 = vmatprep.mubr.msk.f32.mxu1 %vm243_vm1, %v5549_v32  ;;  %4944 = vmatprep.mubr.msk.f32.mxu0 %vm243_vm1, %v5910_v51 }
  0xa1   : > { %4721 = vmatmul.mubr.msk.f32.gmra.mrb[6].mxu1 %vm243_vm1, %v5565_v34  ;;  %4945 = vmatmul.mubr.msk.f32.gmra.mrb[22].mxu0 %vm243_vm1, %v5921_v47 }
  0xa2   : > { %4723 = vmatprep.mubr.msk.f32.mxu1 %vm243_vm1, %v5571_v36  ;;  %4947 = vmatprep.mubr.msk.f32.mxu0 %vm243_vm1, %v5924_v43 }
  0xa5   : > { %4724 = vmatmul.mubr.msk.f32.gmra.mrb[8].mxu1 %vm243_vm1, %v5585_v38  ;;  %4948 = vmatmul.mubr.msk.f32.gmra.mrb[24].mxu0 %vm243_vm1, %v5935_v39 }
  0xa6   : > { %4726 = vmatprep.mubr.msk.f32.mxu1 %vm243_vm1, %v5591_v40  ;;  %4950 = vmatprep.mubr.msk.f32.mxu0 %vm243_vm1, %v5938_v35 }
  0xa9   : > { %4727 = vmatmul.mubr.msk.f32.gmra.mrb[10].mxu1 %vm243_vm1, %v5605_v42  ;;  %4951 = vmatmul.mubr.msk.f32.gmra.mrb[26].mxu0 %vm243_vm1, %v5949_v62 }
  0xaa   : > { %4729 = vmatprep.mubr.msk.f32.mxu1 %vm243_vm1, %v5611_v44  ;;  %4953 = vmatprep.mubr.msk.f32.mxu0 %vm243_vm1, %v6004_v24 }
  0xad   : > { %4730 = vmatmul.mubr.msk.f32.gmra.mrb[12].mxu1 %vm243_vm1, %v5625_v46  ;;  %4954 = vmatmul.mubr.msk.f32.gmra.mrb[28].mxu0 %vm243_vm1, %v6015_v25 }
  0xae   : > { %4732 = vmatprep.mubr.msk.f32.mxu1 %vm243_vm1, %v5631_v48  ;;  %4956 = vmatprep.mubr.msk.f32.mxu0 %vm243_vm1, %v4142_v33  ;;  %v6409_v33 = vld [vmem:[#allocation10_spill] sm:$0xff] }
  0xb1   : > { %4733 = vmatmul.mubr.msk.f32.gmra.mrb[14].mxu1 %vm243_vm1, %v5645_v50  ;;  %4957 = vmatmul.mubr.msk.f32.gmra.mrb[30].mxu0 %vm243_vm1, %v4143_v61  ;;  %v6410_v61 = vld [vmem:[#allocation23_spill] sm:$0xff] }
  0xb2   : > { %4735 = vmatprep.mubr.msk.f32.mxu1 %vm243_vm1, %v5651_v52  ;;  %4961 = vmatprep.mubr.msk.f32.mxu0 %vm243_vm1, %v5399_v8  ;;  %v6392_v8 = vld [vmem:[#allocation27_spill] sm:$0xff] }
  0xb5   : > { %4736 = vmatmul.mubr.msk.f32.gmra.mrb[16].mxu1 %vm243_vm1, %v5665_v54  ;;  %4962 = vmatmul.mubr.msk.f32.vlgmr.msra.gmra.mrb[0].mxu0 %vm243_vm1, %v5414_v11  ;;  %v6393_v11 = vld [vmem:[#allocation2_spill] sm:$0xff] }
  0xb6   : > { %5010 = vmatpush3.msk.msra.mxu0 %vm340_vm0, %v5850_v37  ;;  %4738 = vmatprep.mubr.msk.f32.mxu1 %vm243_vm1, %v5669_v56  ;;  %v6407_v37 = vld [vmem:[#allocation9_spill] sm:$0xff] }
  0xb7   : > { %4964 = vmatprep.mubr.msk.f32.mxu0 %vm243_vm1, %v5420_v12  ;;  %v6394_v12 = vld [vmem:[#allocation15_spill] sm:$0xff] }
  0xb9   : > { %4739 = vmatmul.mubr.msk.f32.gmra.mrb[18].mxu1 %vm243_vm1, %v5680_v58  ;;  %4965 = vmatmul.mubr.msk.f32.gmra.mrb[2].mxu0 %vm243_vm1, %v5433_v13  ;;  %v6395_v13 = vld [vmem:[#allocation3_spill] sm:$0xff] }
  0xba   : > { %4741 = vmatprep.mubr.msk.f32.mxu1 %vm243_vm1, %v5686_v60  ;;  %4967 = vmatprep.mubr.msk.f32.mxu0 %vm243_vm1, %v5436_v14  ;;  %v6396_v14 = vld [vmem:[#allocation16_spill] sm:$0xff] }
  0xbd   : > { %4742 = vmatmul.mubr.msk.f32.gmra.mrb[20].mxu1 %vm243_vm1, %v5704_v63  ;;  %4968 = vmatmul.mubr.msk.f32.gmra.mrb[4].mxu0 %vm243_vm1, %v5447_v15  ;;  %v6397_v15 = vld [vmem:[#allocation4_spill] sm:$0xff] }
  0xbe   : > { %4744 = vmatprep.mubr.msk.f32.mxu1 %vm243_vm1, %v5712_v2  ;;  %4970 = vmatprep.mubr.msk.f32.mxu0 %vm243_vm1, %v5450_v16  ;;  %v6398_v16 = vld [vmem:[#allocation17_spill] sm:$0xff] }
  0xc1   : > { %4745 = vmatmul.mubr.msk.f32.gmra.mrb[22].mxu1 %vm243_vm1, %v5728_v4  ;;  %4971 = vmatmul.mubr.msk.f32.gmra.mrb[6].mxu0 %vm243_vm1, %v5461_v17  ;;  %v6399_v17 = vld [vmem:[#allocation5_spill] sm:$0xff] }
  0xc2   : > { %4747 = vmatprep.mubr.msk.f32.mxu1 %vm243_vm1, %v5734_v6  ;;  %4973 = vmatprep.mubr.msk.f32.mxu0 %vm243_vm1, %v5464_v18  ;;  %v6400_v18 = vld [vmem:[#allocation18_spill] sm:$0xff] }
  0xc5   : > { %4748 = vmatmul.mubr.msk.f32.gmra.mrb[24].mxu1 %vm243_vm1, %v5748_v9  ;;  %4974 = vmatmul.mubr.msk.f32.gmra.mrb[8].mxu0 %vm243_vm1, %v5475_v19  ;;  %v6401_v19 = vld [vmem:[#allocation6_spill] sm:$0xff] }
  0xc6   : > { %4750 = vmatprep.mubr.msk.f32.mxu1 %vm243_vm1, %v5754_v55  ;;  %4976 = vmatprep.mubr.msk.f32.mxu0 %vm243_vm1, %v5478_v20  ;;  %v6402_v20 = vld [vmem:[#allocation19_spill] sm:$0xff] }
  0xc9   : > { %4751 = vmatmul.mubr.msk.f32.gmra.mrb[26].mxu1 %vm243_vm1, %v5768_v53  ;;  %4977 = vmatmul.mubr.msk.f32.gmra.mrb[10].mxu0 %vm243_vm1, %v5489_v21  ;;  %v6403_v21 = vld [vmem:[#allocation7_spill] sm:$0xff] }
  0xca   : > { %4753 = vmatprep.mubr.msk.f32.mxu1 %vm243_vm1, %v5774_v49  ;;  %4979 = vmatprep.mubr.msk.f32.mxu0 %vm243_vm1, %v5492_v22  ;;  %v6405_v22 = vld [vmem:[#allocation8_spill] sm:$0xff] }
  0xcd   : > { %4754 = vmatmul.mubr.msk.f32.gmra.mrb[28].mxu1 %vm243_vm1, %v5788_v45  ;;  %4980 = vmatmul.mubr.msk.f32.gmra.mrb[12].mxu0 %vm243_vm1, %v5503_v23  ;;  %v6406_v23 = vld [vmem:[#allocation21_spill] sm:$0xff] }
  0xce   : > { %4756 = vmatprep.mubr.msk.f32.mxu1 %vm243_vm1, %v5794_v41  ;;  %4982 = vmatprep.mubr.msk.f32.mxu0 %vm243_vm1, %v5520_v26 }
  0xd1   : > { %4757 = vmatmul.mubr.msk.f32.gmra.mrb[30].mxu1 %vm243_vm1, %v6392_v8  ;;  %4983 = vmatmul.mubr.msk.f32.gmra.mrb[14].mxu0 %vm243_vm1, %v6393_v11  ;;  %v6419_v8 = vld [vmem:[#allocation30_spill] sm:$0xff] }
  0xd2   : > { %4761 = vmatprep.mubr.msk.f32.mxu1 %vm243_vm1, %v6394_v12  ;;  %4985 = vmatprep.mubr.msk.f32.mxu0 %vm243_vm1, %v6395_v13  ;;  %v6411_v12 = vld [vmem:[#allocation11_spill] sm:$0xff] }
  0xd5   : > { %4762 = vmatmul.mubr.msk.f32.vlgmr.msra.gmra.mrb[0].mxu1 %vm243_vm1, %v6396_v14  ;;  %4986 = vmatmul.mubr.msk.f32.gmra.mrb[16].mxu0 %vm243_vm1, %v6397_v15  ;;  %v6412_v14 = vld [vmem:[#allocation24_spill] sm:$0xff] }
  0xd6   : > { %5060 = vmatpush3.msk.msra.mxu1 %vm340_vm0, %v5368_v1  ;;  %4764 = vmatprep.mubr.msk.f32.mxu1 %vm243_vm1, %v6398_v16  ;;  %v6404_v1 = vld [vmem:[#allocation20_spill] sm:$0xff] }
  0xd7   : > { %4988 = vmatprep.mubr.msk.f32.mxu0 %vm243_vm1, %v6399_v17  ;;  %v6413_v16 = vld [vmem:[#allocation12_spill] sm:$0xff] }
  0xd9   : > { %4765 = vmatmul.mubr.msk.f32.gmra.mrb[2].mxu1 %vm243_vm1, %v6400_v18  ;;  %4989 = vmatmul.mubr.msk.f32.gmra.mrb[18].mxu0 %vm243_vm1, %v6401_v19  ;;  %v6414_v18 = vld [vmem:[#allocation25_spill] sm:$0xff] }
  0xda   : > { %4767 = vmatprep.mubr.msk.f32.mxu1 %vm243_vm1, %v6402_v20  ;;  %4991 = vmatprep.mubr.msk.f32.mxu0 %vm243_vm1, %v6403_v21  ;;  %v6415_v20 = vld [vmem:[#allocation13_spill] sm:$0xff] }
  0xdd   : > { %4768 = vmatmul.mubr.msk.f32.gmra.mrb[4].mxu1 %vm243_vm1, %v6404_v1  ;;  %4992 = vmatmul.mubr.msk.f32.gmra.mrb[20].mxu0 %vm243_vm1, %v6405_v22  ;;  %v6142_v1 = vld [vmem:[%s5390_s25 + $0x181] sm:$0xff] }
  0xde   : > { %4770 = vmatprep.mubr.msk.f32.mxu1 %vm243_vm1, %v6406_v23  ;;  %4994 = vmatprep.mubr.msk.f32.mxu0 %vm243_vm1, %v6407_v37  ;;  %v6416_v23 = vld [vmem:[#allocation26_spill] sm:$0xff] }
  0xe1   : > { %4771 = vmatmul.mubr.msk.f32.gmra.mrb[6].mxu1 %vm243_vm1, %v6408_v3  ;;  %4995 = vmatmul.mubr.msk.f32.gmra.mrb[22].mxu0 %vm243_vm1, %v6409_v33  ;;  %v6417_v3 = vld [vmem:[#allocation14_spill] sm:$0xff] }
  0xe2   : > { %4773 = vmatprep.mubr.msk.f32.mxu1 %vm243_vm1, %v6410_v61  ;;  %4997 = vmatprep.mubr.msk.f32.mxu0 %vm243_vm1, %v6411_v12  ;;  %v6418_v61 = vld [vmem:[#allocation28_spill] sm:$0xff] }
  0xe5   : > { %4774 = vmatmul.mubr.msk.f32.gmra.mrb[8].mxu1 %vm243_vm1, %v6412_v14  ;;  %4998 = vmatmul.mubr.msk.f32.gmra.mrb[24].mxu0 %vm243_vm1, %v6413_v16  ;;  %v6153_v14 = vld [vmem:[%s5390_s25 + $0x189] sm:$0xff] }
  0xe6   : > { %4776 = vmatprep.mubr.msk.f32.mxu1 %vm243_vm1, %v6414_v18  ;;  %5000 = vmatprep.mubr.msk.f32.mxu0 %vm243_vm1, %v6415_v20  ;;  %v4208_v18 = vld [vmem:[%s5390_s25 + $0x199] sm:$0xff] }
  0xe9   : > { %4777 = vmatmul.mubr.msk.f32.gmra.mrb[10].mxu1 %vm243_vm1, %v6416_v23  ;;  %5001 = vmatmul.mubr.msk.f32.gmra.mrb[26].mxu0 %vm243_vm1, %v6417_v3  ;;  %v4209_v23 = vld [vmem:[%s5390_s25 + $0x1a1] sm:$0xff]  ;;  %v6420_v3 = vld [vmem:[#allocation32_spill] sm:$0xff] }
  0xea   : > { %4779 = vmatprep.mubr.msk.f32.mxu1 %vm243_vm1, %v6418_v61  ;;  %5003 = vmatprep.mubr.msk.f32.mxu0 %vm243_vm1, %v6142_v1 }
  0xed   : > { %4780 = vmatmul.mubr.msk.f32.gmra.mrb[12].mxu1 %vm243_vm1, %v6419_v8  ;;  %5004 = vmatmul.mubr.msk.f32.gmra.mrb[28].mxu0 %vm243_vm1, %v6153_v14 }
  0xee   : > { %4782 = vmatprep.mubr.msk.f32.mxu1 %vm243_vm1, %v5831_v59  ;;  %5006 = vmatprep.mubr.msk.f32.mxu0 %vm243_vm1, %v4208_v18 }
  0xf1   : > { %4783 = vmatmul.mubr.msk.f32.gmra.mrb[14].mxu1 %vm243_vm1, %v6420_v3  ;;  %5007 = vmatmul.mubr.msk.f32.gmra.mrb[30].mxu0 %vm243_vm1, %v4209_v23 }
  0xf2   : > { %4785 = vmatprep.mubr.msk.f32.mxu1 %vm243_vm1, %v5845_v29  ;;  %5011 = vmatprep.mubr.msk.f32.mxu0 %vm243_vm1, %v5523_v27  ;;  %v6422_v27 = vld [vmem:[#allocation29_spill] sm:$0xff] }
  0xf3   : > { %v4274_v29 = vld [vmem:[%s5390_s25 + $0x19a] sm:$0xff] }
  0xf5   : > { %4786 = vmatmul.mubr.msk.f32.gmra.mrb[16].mxu1 %vm243_vm1, %v5861_v31  ;;  %5012 = vmatmul.mubr.msk.f32.vlgmr.msra.gmra.mrb[0].mxu0 %vm243_vm1, %v5541_v30  ;;  %v6423_v30 = vld [vmem:[#allocation14_spill] sm:$0xff]  ;;  %v6424_v31 = vld [vmem:[#allocation31_spill] sm:$0xff] }
  0xf6   : > { %4788 = vmatprep.mubr.msk.f32.mxu1 %vm243_vm1, %v5866_v0  ;;  %5014 = vmatprep.mubr.msk.f32.mxu0 %vm243_vm1, %v5549_v32  ;;  %v4275_v32 = vld [vmem:[%s5390_s25 + $0x1a2] sm:$0xff] }
  0xf9   : > { %4789 = vmatmul.mubr.msk.f32.gmra.mrb[18].mxu1 %vm243_vm1, %v5879_v28  ;;  %5015 = vmatmul.mubr.msk.f32.gmra.mrb[2].mxu0 %vm243_vm1, %v5565_v34 }
  0xfa   : > { %4791 = vmatprep.mubr.msk.f32.mxu1 %vm243_vm1, %v5882_v5  ;;  %5017 = vmatprep.mubr.msk.f32.mxu0 %vm243_vm1, %v5571_v36 }
  0xfd   : > { %4792 = vmatmul.mubr.msk.f32.gmra.mrb[20].mxu1 %vm243_vm1, %v5893_v7  ;;  %5018 = vmatmul.mubr.msk.f32.gmra.mrb[4].mxu0 %vm243_vm1, %v5585_v38 }
  0xfe   : > { %4794 = vmatprep.mubr.msk.f32.mxu1 %vm243_vm1, %v5896_v10  ;;  %5020 = vmatprep.mubr.msk.f32.mxu0 %vm243_vm1, %v5591_v40 }
 0x101   : > { %4795 = vmatmul.mubr.msk.f32.gmra.mrb[22].mxu1 %vm243_vm1, %v5907_v57  ;;  %5021 = vmatmul.mubr.msk.f32.gmra.mrb[6].mxu0 %vm243_vm1, %v5605_v42 }
 0x102   : > { %4797 = vmatprep.mubr.msk.f32.mxu1 %vm243_vm1, %v5910_v51  ;;  %5023 = vmatprep.mubr.msk.f32.mxu0 %vm243_vm1, %v5611_v44 }
 0x105   : > { %4798 = vmatmul.mubr.msk.f32.gmra.mrb[24].mxu1 %vm243_vm1, %v5921_v47  ;;  %5024 = vmatmul.mubr.msk.f32.gmra.mrb[8].mxu0 %vm243_vm1, %v5625_v46 }
 0x106   : > { %4800 = vmatprep.mubr.msk.f32.mxu1 %vm243_vm1, %v5924_v43  ;;  %5026 = vmatprep.mubr.msk.f32.mxu0 %vm243_vm1, %v5631_v48 }
 0x109   : > { %4801 = vmatmul.mubr.msk.f32.gmra.mrb[26].mxu1 %vm243_vm1, %v5935_v39  ;;  %5027 = vmatmul.mubr.msk.f32.gmra.mrb[10].mxu0 %vm243_vm1, %v5645_v50 }
 0x10a   : > { %4803 = vmatprep.mubr.msk.f32.mxu1 %vm243_vm1, %v5938_v35  ;;  %5029 = vmatprep.mubr.msk.f32.mxu0 %vm243_vm1, %v5651_v52 }
 0x10d   : > { %4804 = vmatmul.mubr.msk.f32.gmra.mrb[28].mxu1 %vm243_vm1, %v5949_v62  ;;  %5030 = vmatmul.mubr.msk.f32.gmra.mrb[12].mxu0 %vm243_vm1, %v5665_v54 }
 0x10e   : > { %4806 = vmatprep.mubr.msk.f32.mxu1 %vm243_vm1, %v6004_v24  ;;  %5032 = vmatprep.mubr.msk.f32.mxu0 %vm243_vm1, %v5669_v56 }
 0x111   : > { %4807 = vmatmul.mubr.msk.f32.gmra.mrb[30].mxu1 %vm243_vm1, %v6015_v25  ;;  %5033 = vmatmul.mubr.msk.f32.gmra.mrb[14].mxu0 %vm243_vm1, %v5680_v58 }
 0x112   : > { %4835 = vmatprep.mubr.msk.f32.mxu1 %vm243_vm1, %v5520_v26  ;;  %5035 = vmatprep.mubr.msk.f32.mxu0 %vm243_vm1, %v5686_v60  ;;  %v6421_v26 = vld [vmem:[#allocation27_spill] sm:$0xff] }
 0x115   : > { %4836 = vmatmul.mubr.msk.f32.vlgmr.msra.gmra.mrb[16].mxu1 %vm243_vm1, %v6393_v11  ;;  %5036 = vmatmul.mubr.msk.f32.gmra.mrb[16].mxu0 %vm243_vm1, %v5704_v63 }
 0x116   : > { %4838 = vmatprep.mubr.msk.f32.mxu1 %vm243_vm1, %v6395_v13  ;;  %5038 = vmatprep.mubr.msk.f32.mxu0 %vm243_vm1, %v5712_v2 }
 0x119   : > { %4839 = vmatmul.mubr.msk.f32.gmra.mrb[18].mxu1 %vm243_vm1, %v6397_v15  ;;  %5039 = vmatmul.mubr.msk.f32.gmra.mrb[18].mxu0 %vm243_vm1, %v5728_v4 }
 0x11a   : > { %4841 = vmatprep.mubr.msk.f32.mxu1 %vm243_vm1, %v6399_v17  ;;  %5041 = vmatprep.mubr.msk.f32.mxu0 %vm243_vm1, %v5734_v6 }
 0x11d   : > { %4842 = vmatmul.mubr.msk.f32.gmra.mrb[20].mxu1 %vm243_vm1, %v6401_v19  ;;  %5042 = vmatmul.mubr.msk.f32.gmra.mrb[20].mxu0 %vm243_vm1, %v5748_v9 }
 0x11e   : > { %4844 = vmatprep.mubr.msk.f32.mxu1 %vm243_vm1, %v6403_v21  ;;  %5044 = vmatprep.mubr.msk.f32.mxu0 %vm243_vm1, %v5754_v55 }
 0x121   : > { %4845 = vmatmul.mubr.msk.f32.gmra.mrb[22].mxu1 %vm243_vm1, %v6405_v22  ;;  %5045 = vmatmul.mubr.msk.f32.gmra.mrb[22].mxu0 %vm243_vm1, %v5768_v53 }
 0x122   : > { %4847 = vmatprep.mubr.msk.f32.mxu1 %vm243_vm1, %v6407_v37  ;;  %5047 = vmatprep.mubr.msk.f32.mxu0 %vm243_vm1, %v5774_v49 }
 0x125   : > { %4848 = vmatmul.mubr.msk.f32.gmra.mrb[24].mxu1 %vm243_vm1, %v6409_v33  ;;  %5048 = vmatmul.mubr.msk.f32.gmra.mrb[24].mxu0 %vm243_vm1, %v5788_v45 }
 0x126   : > { %4850 = vmatprep.mubr.msk.f32.mxu1 %vm243_vm1, %v6411_v12  ;;  %5050 = vmatprep.mubr.msk.f32.mxu0 %vm243_vm1, %v5794_v41 }
 0x129   : > { %4851 = vmatmul.mubr.msk.f32.gmra.mrb[26].mxu1 %vm243_vm1, %v6413_v16  ;;  %5051 = vmatmul.mubr.msk.f32.gmra.mrb[26].mxu0 %vm243_vm1, %v6421_v26 }
 0x12a   : > { %4853 = vmatprep.mubr.msk.f32.mxu1 %vm243_vm1, %v6415_v20  ;;  %5053 = vmatprep.mubr.msk.f32.mxu0 %vm243_vm1, %v6422_v27 }
 0x12d   : > { %4854 = vmatmul.mubr.msk.f32.gmra.mrb[28].mxu1 %vm243_vm1, %v6423_v30  ;;  %5054 = vmatmul.mubr.msk.f32.gmra.mrb[28].mxu0 %vm243_vm1, %v6424_v31 }
 0x12e   : > { %4856 = vmatprep.mubr.msk.f32.mxu1 %vm243_vm1, %v6142_v1  ;;  %5056 = vmatprep.mubr.msk.f32.mxu0 %vm243_vm1, %v4274_v29 }
 0x131   : > { %4857 = vmatmul.mubr.msk.f32.gmra.mrb[30].mxu1 %vm243_vm1, %v6153_v14  ;;  %5057 = vmatmul.mubr.msk.f32.gmra.mrb[30].mxu0 %vm243_vm1, %v4275_v32 }
 0x1a8   : > { %v4763_v34 = vpop.f32.mrb[0].mxu1 }
 0x1a9   : > { %v1483_v35 = vpop.f32.mrb[1].mxu1 }
 0x1ac   : > { %v4766_v36 = vpop.f32.mrb[2].mxu1 }
 0x1ad   : > { %v1493_v38 = vpop.f32.mrb[3].mxu1 }
 0x1b0   : > { %v4769_v39 = vpop.f32.mrb[4].mxu1 }
 0x1b1   : > { %v1503_v40 = vpop.f32.mrb[5].mxu1 }
 0x1b4   : > { %v4772_v41 = vpop.f32.mrb[6].mxu1 }
 0x1b5   : > { %v1513_v42 = vpop.f32.mrb[7].mxu1 }
 0x1b8   : > { %v4775_v43 = vpop.f32.mrb[8].mxu1 }
 0x1b9   : > { %v1523_v44 = vpop.f32.mrb[9].mxu1 }
 0x1bc   : > { %v4778_v45 = vpop.f32.mrb[10].mxu1 }
 0x1bd   : > { %v1533_v46 = vpop.f32.mrb[11].mxu1 }
 0x1c0   : > { %v4781_v47 = vpop.f32.mrb[12].mxu1 }
 0x1c1   : > { %v1543_v48 = vpop.f32.mrb[13].mxu1 }
 0x1c4   : > { %v6295_v49 = vpop.f32.mrb[14].mxu1 }
 0x1c5   : > { %v6297_v50 = vpop.f32.mrb[15].mxu1 }
 0x1c8   : > { %v5013_v51 = vpop.f32.mrb[0].mxu0 }
 0x1c9   : > { %v5061_v52 = vadd.f32 %v5013_v51, %v4763_v34  ;;  %v3434_v53 = vpop.f32.mrb[1].mxu0 }
 0x1ca   : > { %v5062_v54 = vadd.f32 %v3434_v53, %v1483_v35 }
 0x1cb   : > { %v3664_v56 = vmul.f32 %v5061_v52, %v5061_v52 }
 0x1cc   : > { %v3625_v58 = vadd.f32 %v5062_v54, %v5061_v52  ;;  %v3663_v59 = vmul.f32 %v5062_v54, %v5062_v54  ;;  %v5016_v60 = vpop.f32.mrb[2].mxu0 }
 0x1cd   : > { %v5063_v62 = vadd.f32 %v5016_v60, %v4766_v36  ;;  %v3444_v63 = vpop.f32.mrb[3].mxu0 }
 0x1ce   : > { %v3695_v0 = vadd.f32 %v3664_v56, %v3663_v59  ;;  %v5064_v2 = vadd.f32 %v3444_v63, %v1493_v38 }
 0x1cf   : > { %v3666_v10 = vmul.f32 %v5063_v62, %v5063_v62 }
 0x1d0   : > { %v3626_v4 = vadd.f32 %v5064_v2, %v3625_v58  ;;  %v3665_v5 = vmul.f32 %v5064_v2, %v5064_v2  ;;  %v5019_v6 = vpop.f32.mrb[4].mxu0 }
 0x1d1   : > { %v5065_v7 = vadd.f32 %v5019_v6, %v4769_v39  ;;  %v3454_v9 = vpop.f32.mrb[5].mxu0 }
 0x1d2   : > { %v3696_v55 = vadd.f32 %v3695_v0, %v3665_v5  ;;  %v5066_v57 = vadd.f32 %v3454_v9, %v1503_v40  ;;  %v3627_v28 = vadd.f32 %v5063_v62, %v3626_v4 }
 0x1d3   : > { %v3668_v17 = vmul.f32 %v5065_v7, %v5065_v7 }
 0x1d4   : > { %v3628_v24 = vadd.f32 %v5066_v57, %v3627_v28  ;;  %v3667_v25 = vmul.f32 %v5066_v57, %v5066_v57  ;;  %v3697_v8 = vadd.f32 %v3696_v55, %v3666_v10  ;;  %v5022_v11 = vpop.f32.mrb[6].mxu0 }
 0x1d5   : > { %v5067_v13 = vadd.f32 %v5022_v11, %v4772_v41  ;;  %v3464_v15 = vpop.f32.mrb[7].mxu0 }
 0x1d6   : > { %v3698_v19 = vadd.f32 %v3697_v8, %v3667_v25  ;;  %v5068_v21 = vadd.f32 %v3464_v15, %v1513_v42  ;;  %v3629_v22 = vadd.f32 %v5065_v7, %v3628_v24 }
 0x1d7   : > { %v3670_v3 = vmul.f32 %v5067_v13, %v5067_v13 }
 0x1d8   : > { %v3630_v37 = vadd.f32 %v5068_v21, %v3629_v22  ;;  %v3669_v33 = vmul.f32 %v5068_v21, %v5068_v21  ;;  %v3699_v12 = vadd.f32 %v3698_v19, %v3668_v17  ;;  %v5025_v16 = vpop.f32.mrb[8].mxu0 }
 0x1d9   : > { %v5069_v20 = vadd.f32 %v5025_v16, %v4775_v43  ;;  %v3474_v1 = vpop.f32.mrb[9].mxu0 }
 0x1da   : > { %v3700_v61 = vadd.f32 %v3699_v12, %v3669_v33  ;;  %v5070_v14 = vadd.f32 %v3474_v1, %v1523_v44  ;;  %v3631_v18 = vadd.f32 %v5067_v13, %v3630_v37 }
 0x1db   : > { %v3672_v32 = vmul.f32 %v5069_v20, %v5069_v20 }
 0x1dc   : > { %v3632_v23 = vadd.f32 %v5070_v14, %v3631_v18  ;;  %v3671_v26 = vmul.f32 %v5070_v14, %v5070_v14  ;;  %v3701_v27 = vadd.f32 %v3700_v61, %v3670_v3  ;;  %v5028_v29 = vpop.f32.mrb[10].mxu0 }
 0x1dd   : > { %v5071_v30 = vadd.f32 %v5028_v29, %v4778_v45  ;;  %v3484_v31 = vpop.f32.mrb[11].mxu0 }
 0x1de   : > { %v3702_v34 = vadd.f32 %v3701_v27, %v3671_v26  ;;  %v5072_v35 = vadd.f32 %v3484_v31, %v1533_v46  ;;  %v3633_v36 = vadd.f32 %v5069_v20, %v3632_v23 }
 0x1df   : > { %v3674_v51 = vmul.f32 %v5071_v30, %v5071_v30 }
 0x1e0   : > { %v3634_v38 = vadd.f32 %v5072_v35, %v3633_v36  ;;  %v3673_v39 = vmul.f32 %v5072_v35, %v5072_v35  ;;  %v3703_v40 = vadd.f32 %v3702_v34, %v3672_v32  ;;  %v5031_v41 = vpop.f32.mrb[12].mxu0 }
 0x1e1   : > { %v5073_v42 = vadd.f32 %v5031_v41, %v4781_v47  ;;  %v3494_v43 = vpop.f32.mrb[13].mxu0 }
 0x1e2   : > { %v3704_v52 = vadd.f32 %v3703_v40, %v3673_v39  ;;  %v5074_v44 = vadd.f32 %v3494_v43, %v1543_v48  ;;  %v3635_v53 = vadd.f32 %v5071_v30, %v3634_v38 }
 0x1e3   : > { %v3676_v62 = vmul.f32 %v5073_v42, %v5073_v42 }
 0x1e4   : > { %v3636_v54 = vadd.f32 %v5074_v44, %v3635_v53  ;;  %v3675_v56 = vmul.f32 %v5074_v44, %v5074_v44  ;;  %v3705_v58 = vadd.f32 %v3704_v52, %v3674_v51  ;;  %v5034_v59 = vpop.f32.mrb[14].mxu0 }
 0x1e5   : > { %v5075_v45 = vadd.f32 %v5034_v59, %v6295_v49  ;;  %v3504_v60 = vpop.f32.mrb[15].mxu0 }
 0x1e6   : > { %v3706_v46 = vadd.f32 %v3705_v58, %v3675_v56  ;;  %v5076_v63 = vadd.f32 %v3504_v60, %v6297_v50  ;;  %v3637_v0 = vadd.f32 %v5073_v42, %v3636_v54 }
 0x1e7   : > { %v3678_v10 = vmul.f32 %v5075_v45, %v5075_v45 }
 0x1e8   : > { %v3638_v2 = vadd.f32 %v5076_v63, %v3637_v0  ;;  %v3677_v4 = vmul.f32 %v5076_v63, %v5076_v63  ;;  %v3707_v47 = vadd.f32 %v3706_v46, %v3676_v62  ;;  %v4837_v5 = vpop.f32.mrb[16].mxu1  ;;  %v5037_v6 = vpop.f32.mrb[16].mxu0 }
 0x1e9   : > { %v5077_v7 = vadd.f32 %v5037_v6, %v4837_v5  ;;  %v1953_v48 = vpop.f32.mrb[17].mxu1  ;;  %v3514_v9 = vpop.f32.mrb[17].mxu0 }
 0x1ea   : > { %v3708_v55 = vadd.f32 %v3707_v47, %v3677_v4  ;;  %v5078_v57 = vadd.f32 %v3514_v9, %v1953_v48  ;;  %v3639_v28 = vadd.f32 %v5075_v45, %v3638_v2 }
 0x1eb   : > { %v3680_v17 = vmul.f32 %v5077_v7, %v5077_v7 }
 0x1ec   : > { %v3640_v24 = vadd.f32 %v5078_v57, %v3639_v28  ;;  %v3679_v49 = vmul.f32 %v5078_v57, %v5078_v57  ;;  %v3709_v25 = vadd.f32 %v3708_v55, %v3678_v10  ;;  %v4840_v8 = vpop.f32.mrb[18].mxu1  ;;  %v5040_v11 = vpop.f32.mrb[18].mxu0 }
 0x1ed   : > { %v5079_v13 = vadd.f32 %v5040_v11, %v4840_v8  ;;  %v1963_v50 = vpop.f32.mrb[19].mxu1  ;;  %v3524_v15 = vpop.f32.mrb[19].mxu0 }
 0x1ee   : > { %v3710_v19 = vadd.f32 %v3709_v25, %v3679_v49  ;;  %v5080_v21 = vadd.f32 %v3524_v15, %v1963_v50  ;;  %v3641_v22 = vadd.f32 %v5077_v7, %v3640_v24 }
 0x1ef   : > { %v3682_v14 = vmul.f32 %v5079_v13, %v5079_v13 }
 0x1f0   : > { %v3642_v37 = vadd.f32 %v5080_v21, %v3641_v22  ;;  %v3681_v33 = vmul.f32 %v5080_v21, %v5080_v21  ;;  %v3711_v12 = vadd.f32 %v3710_v19, %v3680_v17  ;;  %v4843_v16 = vpop.f32.mrb[20].mxu1  ;;  %v5043_v20 = vpop.f32.mrb[20].mxu0 }
 0x1f1   : > { %v5081_v1 = vadd.f32 %v5043_v20, %v4843_v16  ;;  %v1973_v3 = vpop.f32.mrb[21].mxu1  ;;  %v3534_v61 = vpop.f32.mrb[21].mxu0 }
 0x1f2   : > { %v3712_v18 = vadd.f32 %v3711_v12, %v3681_v33  ;;  %v5082_v23 = vadd.f32 %v3534_v61, %v1973_v3  ;;  %v3643_v26 = vadd.f32 %v5079_v13, %v3642_v37 }
 0x1f3   : > { %v3684_v38 = vmul.f32 %v5081_v1, %v5081_v1 }
 0x1f4   : > { %v3644_v27 = vadd.f32 %v5082_v23, %v3643_v26  ;;  %v3683_v29 = vmul.f32 %v5082_v23, %v5082_v23  ;;  %v3713_v30 = vadd.f32 %v3712_v18, %v3682_v14  ;;  %v4846_v31 = vpop.f32.mrb[22].mxu1  ;;  %v5046_v32 = vpop.f32.mrb[22].mxu0 }
 0x1f5   : > { %v5083_v34 = vadd.f32 %v5046_v32, %v4846_v31  ;;  %v1983_v35 = vpop.f32.mrb[23].mxu1  ;;  %v3544_v36 = vpop.f32.mrb[23].mxu0 }
 0x1f6   : > { %v3714_v39 = vadd.f32 %v3713_v30, %v3683_v29  ;;  %v5084_v40 = vadd.f32 %v3544_v36, %v1983_v35  ;;  %v3645_v41 = vadd.f32 %v5081_v1, %v3644_v27 }
 0x1f7   : > { %v3686_v58 = vmul.f32 %v5083_v34, %v5083_v34 }
 0x1f8   : > { %v3646_v42 = vadd.f32 %v5084_v40, %v3645_v41  ;;  %v3685_v43 = vmul.f32 %v5084_v40, %v5084_v40  ;;  %v3715_v51 = vadd.f32 %v3714_v39, %v3684_v38  ;;  %v4849_v52 = vpop.f32.mrb[24].mxu1  ;;  %v5049_v44 = vpop.f32.mrb[24].mxu0 }
 0x1f9   : > { %v5085_v53 = vadd.f32 %v5049_v44, %v4849_v52  ;;  %v1993_v54 = vpop.f32.mrb[25].mxu1  ;;  %v3554_v56 = vpop.f32.mrb[25].mxu0 }
 0x1fa   : > { %v3716_v59 = vadd.f32 %v3715_v51, %v3685_v43  ;;  %v5086_v45 = vadd.f32 %v3554_v56, %v1993_v54  ;;  %v3647_v60 = vadd.f32 %v5083_v34, %v3646_v42 }
 0x1fb   : > { %v3688_v6 = vmul.f32 %v5085_v53, %v5085_v53 }
 0x1fc   : > { %v3648_v62 = vadd.f32 %v5086_v45, %v3647_v60  ;;  %v3687_v46 = vmul.f32 %v5086_v45, %v5086_v45  ;;  %v3717_v63 = vadd.f32 %v3716_v59, %v3686_v58  ;;  %v4852_v0 = vpop.f32.mrb[26].mxu1  ;;  %v5052_v2 = vpop.f32.mrb[26].mxu0 }
 0x1fd   : > { %v5087_v4 = vadd.f32 %v5052_v2, %v4852_v0  ;;  %v2003_v47 = vpop.f32.mrb[27].mxu1  ;;  %v3564_v5 = vpop.f32.mrb[27].mxu0 }
 0x1fe   : > { %v3718_v7 = vadd.f32 %v3717_v63, %v3687_v46  ;;  %v5088_v48 = vadd.f32 %v3564_v5, %v2003_v47  ;;  %v3649_v9 = vadd.f32 %v5085_v53, %v3648_v62 }
 0x1ff   : > { %v3690_v11 = vmul.f32 %v5087_v4, %v5087_v4 }
 0x200   : > { %v3650_v10 = vadd.f32 %v5088_v48, %v3649_v9  ;;  %v3689_v55 = vmul.f32 %v5088_v48, %v5088_v48  ;;  %v3719_v57 = vadd.f32 %v3718_v7, %v3688_v6  ;;  %v4855_v28 = vpop.f32.mrb[28].mxu1  ;;  %v5055_v24 = vpop.f32.mrb[28].mxu0 }
 0x201   : > { %v5089_v49 = vadd.f32 %v5055_v24, %v4855_v28  ;;  %v2013_v25 = vpop.f32.mrb[29].mxu1  ;;  %v3574_v8 = vpop.f32.mrb[29].mxu0 }
 0x202   : > { %v3720_v13 = vadd.f32 %v3719_v57, %v3689_v55  ;;  %v5090_v50 = vadd.f32 %v3574_v8, %v2013_v25  ;;  %v3651_v15 = vadd.f32 %v5087_v4, %v3650_v10 }
 0x203   : > { %v3692_v20 = vmul.f32 %v5089_v49, %v5089_v49 }
 0x204   : > { %v3652_v17 = vadd.f32 %v5090_v50, %v3651_v15  ;;  %v3691_v19 = vmul.f32 %v5090_v50, %v5090_v50  ;;  %v3721_v21 = vadd.f32 %v3720_v13, %v3690_v11  ;;  %v4858_v22 = vpop.f32.mrb[30].mxu1  ;;  %v5058_v37 = vpop.f32.mrb[30].mxu0 }
 0x205   : > { %v5091_v33 = vadd.f32 %v5058_v37, %v4858_v22  ;;  %v2023_v12 = vpop.f32.mrb[31].mxu1  ;;  %v3584_v16 = vpop.f32.mrb[31].mxu0 }
 0x206   : > { %v3722_v1 = vadd.f32 %v3721_v21, %v3691_v19  ;;  %v5092_v3 = vadd.f32 %v3584_v16, %v2023_v12  ;;  %v3653_v61 = vadd.f32 %v5089_v49, %v3652_v17 }
 0x207   : > { %v3694_v26 = vmul.f32 %v5091_v33, %v5091_v33 }
 0x208   : > { %v3654_v14 = vadd.f32 %v5092_v3, %v3653_v61  ;;  %v3693_v18 = vmul.f32 %v5092_v3, %v5092_v3  ;;  %v3723_v23 = vadd.f32 %v3722_v1, %v3692_v20 }
 0x20a   : > { %v3655_v27 = vadd.f32 %v5091_v33, %v3654_v14  ;;  %v3724_v29 = vadd.f32 %v3723_v23, %v3693_v18 }
 0x20c   : > { %v3656_v30 = vrot.slane %v3655_v27, 4  ;;  %v3725_v31 = vadd.f32 %v3724_v29, %v3694_v26 }
 0x20e   : > { %v3657_v32 = vadd.f32 %v3656_v30, %v3655_v27  ;;  %v3726_v34 = vrot.slane %v3725_v31, 4 }
 0x210   : > { %v3658_v35 = vrot.slane %v3657_v32, 2  ;;  %v3727_v36 = vadd.f32 %v3726_v34, %v3725_v31 }
 0x212   : > { %v3659_v38 = vadd.f32 %v3658_v35, %v3657_v32  ;;  %v3728_v39 = vrot.slane %v3727_v36, 2 }
 0x214   : > { %v3660_v40 = vrot.slane %v3659_v38, 1  ;;  %v3729_v41 = vadd.f32 %v3728_v39, %v3727_v36 }
 0x216   : > { %v3661_v42 = vadd.f32 %v3660_v40, %v3659_v38  ;;  %v3730_v43 = vrot.slane %v3729_v41, 1 }
 0x218   : > { %v3731_v51 = vadd.f32 %v3730_v43, %v3729_v41  ;;  %3733 = vst [vmem:[%s172_s11] sm:$0x1] %v3661_v42 }
 0x21a   : > { %3734 = vst [vmem:[%s175_s16] sm:$0x1] %v3731_v51 }
 0x21b PF: > { %s14_s12 = sadd.s32 1, %s5332_s12  }
 0x21c   : > { %p11_p4 = scmp.ge.s32.totalorder %s14_s12, 4  }
 0x21e   :  { %13 = sbr.rel (!%p11_p4) target bundleno = 1 (0x1), region = 80 }

// kernel: cnn_block.3
= control target key start
LH: loop header
LB: loop body
LE: loop exit
PB: predicated region body
PF: predicated region fallthrough
CT: control target
= control target key end

     0   :  { %s5529_s15 = smov 0   ;;  %s6631_s0 = inlined_call_operand.vmem [shape: f32[2,18,18,4], index: 0, kind: input, shape index: {}]   ;;  %s6632_s1 = inlined_call_operand.vmem [shape: f32[9,4,128], index: 1, kind: input, shape index: {}]   ;;  %s6633_s2 = inlined_call_operand.vmem [shape: f32[1,128], index: 2, kind: input, shape index: {}]   ;;  %s6634_s3 = inlined_call_operand.vmem [shape: f32[1,128], index: 3, kind: input, shape index: {}]   ;;  %s6635_s4 = inlined_call_operand.vmem [shape: f32[2,128,256], index: 4, kind: output, shape index: {}]  }
   0x1 LB: > { %s3972_s16 = sadd.s32 4294967295, %s5502_s15   ;;  %p3976_p0 = scmp.ge.s32.totalorder %s5502_s15, 1  ;;  %s5502_s15 = sphi %s5529_s15, %s14_s15  }
   0x2   : > { %p162_p1 = scmp.lt.s32.totalorder %s5502_s15, 3 }
   0x4   : > { %p163_p2 = pnand %p3976_p0, %p162_p1 }
   0x6   : > { %166 = sbr.rel (%p163_p2) target bundleno = 689 (0x2b1), region = 36 }
   0xd   : > { %v3980_v0 = vld [vmem:[%s6632_s1 + $0x4] sm:$0xf]  ;;  %vm364_vm0 = vcmask 1043456   ;;  %v5543_v1 = vld [vmem:[%s6632_s1 + $0x10] sm:$0xf]  ;;  %p188_p3 = scmp.lt.s32.totalorder %s3972_s16, 1 }
   0xe   : > { %4779 = vmatprep.subr.msk.mxu1 %vm364_vm0, %v3980_v0  ;;  %4979 = vmatprep.subr.msk.mxu0 %vm364_vm0, %v5543_v1  ;;  %v232_v2 = vld [vmem:[%s6632_s1] sm:$0xf]  ;;  %v4245_v3 = vld [vmem:[%s6632_s1 + $0x14] sm:$0xf]  ;;  %vm267_vm1 = vcmask 31744  }
   0xf   : > { %4780 = vmatpush3.msk.msra.mxu1 %vm364_vm0, %v3980_v0  ;;  %4980 = vmatpush3.msk.msra.mxu0 %vm364_vm0, %v5543_v1  ;;  %s6746_s16 = smov (!%p188_p3, %s3972_s16), 1  ;;  %v4311_v9 = vld [vmem:[%s6632_s1 + $0x18] sm:$0xf]  ;;  %v5584_v10 = vld [vmem:[%s6632_s1 + $0x8] sm:$0xf] }
  0x10   : > { %4829 = vmatprep.subr.msk.mxu1 %vm364_vm0, %v232_v2  ;;  %5029 = vmatprep.subr.msk.mxu0 %vm364_vm0, %v4245_v3  ;;  %s5487_s25 = smul.u32 432, %s6746_s16  ;;  %v5703_v28 = vld [vmem:[%s6632_s1 + $0x1c] sm:$0xf]  ;;  %v5866_v61 = vld [vmem:[%s6632_s1 + $0xc] sm:$0xf]  ;;  %s4481_s19 = sshll.u32 %s6746_s16, 8 }
  0x11   : > { %s6594_s22 = scalar_lea.vmem %s6635_s4, %s4481_s19 }
  0x12   : > { %s5565_s28 = scalar_lea.vmem %s6631_s0, %s5487_s25 }
  0x13   : > { %v233_v4 = vld [vmem:[%s5565_s28 + $0x1] sm:$0xff]  ;;  %v4147_v5 = vld [vmem:[%s5565_s28 + $0x19] sm:$0xff]  ;;  %v234_v6 = vld [vmem:[%s5565_s28 + $0x9] sm:$0xff] }
  0x14   : > { %4781 = vmatprep.mubr.msk.f32.mxu1 %vm267_vm1, %v233_v4  ;;  %4981 = vmatprep.mubr.msk.f32.mxu0 %vm267_vm1, %v4147_v5  ;;  %v4148_v7 = vld [vmem:[%s5565_s28 + $0x21] sm:$0xff]  ;;  %v5574_v8 = vld [vmem:[%s5565_s28 + $0x31] sm:$0xff]  ;;  %v5589_v11 = vld [vmem:[%s5565_s28 + $0x39] sm:$0xff] }
  0x15   : > { %4782 = vmatmul.mubr.msk.f32.vlgmr.msra.gmra.mrb[0].mxu1 %vm267_vm1, %v234_v6  ;;  %4982 = vmatmul.mubr.msk.f32.vlgmr.msra.gmra.mrb[0].mxu0 %vm267_vm1, %v4148_v7  ;;  %v5595_v12 = vld [vmem:[%s5565_s28 + $0x49] sm:$0xff]  ;;  %v5608_v13 = vld [vmem:[%s5565_s28 + $0x51] sm:$0xff]  ;;  %v5611_v14 = vld [vmem:[%s5565_s28 + $0x61] sm:$0xff] }
  0x16   : > { %4830 = vmatpush3.msk.msra.mxu1 %vm364_vm0, %v232_v2  ;;  %5030 = vmatpush3.msk.msra.mxu0 %vm364_vm0, %v4245_v3  ;;  %v5622_v15 = vld [vmem:[%s5565_s28 + $0x69] sm:$0xff]  ;;  %v5625_v16 = vld [vmem:[%s5565_s28 + $0x79] sm:$0xff]  ;;  %v5636_v17 = vld [vmem:[%s5565_s28 + $0x81] sm:$0xff] }
  0x17   : > { %4784 = vmatprep.mubr.msk.f32.mxu1 %vm267_vm1, %v4147_v5  ;;  %4984 = vmatprep.mubr.msk.f32.mxu0 %vm267_vm1, %v5574_v8  ;;  %v5639_v18 = vld [vmem:[%s5565_s28 + $0x91] sm:$0xff]  ;;  %v5650_v19 = vld [vmem:[%s5565_s28 + $0x99] sm:$0xff]  ;;  %v5653_v20 = vld [vmem:[%s5565_s28 + $0xa9] sm:$0xff] }
  0x18   : > { %5079 = vmatprep.subr.msk.mxu0 %vm364_vm0, %v4311_v9  ;;  %4879 = vmatprep.subr.msk.mxu1 %vm364_vm0, %v5584_v10  ;;  %v5664_v21 = vld [vmem:[%s5565_s28 + $0xb1] sm:$0xff]  ;;  %v5667_v22 = vld [vmem:[%s5565_s28 + $0xc1] sm:$0xff]  ;;  %v5678_v23 = vld [vmem:[%s5565_s28 + $0xc9] sm:$0xff] }
  0x19   : > { %4785 = vmatmul.mubr.msk.f32.gmra.mrb[2].mxu1 %vm267_vm1, %v4148_v7  ;;  %4985 = vmatmul.mubr.msk.f32.gmra.mrb[2].mxu0 %vm267_vm1, %v5589_v11  ;;  %v5681_v24 = vld [vmem:[%s5565_s28 + $0x1a] sm:$0xff]  ;;  %v5692_v25 = vld [vmem:[%s5565_s28 + $0x22] sm:$0xff]  ;;  %v5698_v27 = vld [vmem:[%s5565_s28 + $0x32] sm:$0xff] }
  0x1a   : > { %4787 = vmatprep.mubr.msk.f32.mxu1 %vm267_vm1, %v5574_v8  ;;  %4987 = vmatprep.mubr.msk.f32.mxu0 %vm267_vm1, %v5595_v12  ;;  %v5695_v26 = vld [vmem:[%s5565_s28 + $0xd9] sm:$0xff]  ;;  %v5713_v29 = vld [vmem:[%s5565_s28 + $0xe1] sm:$0xff]  ;;  %v5721_v31 = vld [vmem:[%s5565_s28 + $0xf1] sm:$0xff] }
  0x1b   : > { %6681 = vst [vmem:[#allocation2_spill] sm:$0xff] %v5713_v29  ;;  %v5716_v30 = vld [vmem:[%s5565_s28 + $0x3a] sm:$0xff]  ;;  %6682 = vst [vmem:[#allocation3_spill] sm:$0xff] %v5721_v31  ;;  %v5724_v32 = vld [vmem:[%s5565_s28 + $0x4a] sm:$0xff] }
  0x1c   : > { %v5737_v33 = vld [vmem:[%s5565_s28 + $0xf9] sm:$0xff]  ;;  %v5743_v35 = vld [vmem:[%s5565_s28 + $0x109] sm:$0xff]  ;;  %v5757_v37 = vld [vmem:[%s5565_s28 + $0x111] sm:$0xff] }
  0x1d   : > { %4788 = vmatmul.mubr.msk.f32.gmra.mrb[4].mxu1 %vm267_vm1, %v5589_v11  ;;  %4988 = vmatmul.mubr.msk.f32.gmra.mrb[4].mxu0 %vm267_vm1, %v5608_v13  ;;  %6683 = vst [vmem:[#allocation4_spill] sm:$0xff] %v5737_v33  ;;  %v5740_v34 = vld [vmem:[%s5565_s28 + $0x52] sm:$0xff]  ;;  %6684 = vst [vmem:[#allocation5_spill] sm:$0xff] %v5743_v35  ;;  %v5746_v36 = vld [vmem:[%s5565_s28 + $0x62] sm:$0xff] }
  0x1e   : > { %4790 = vmatprep.mubr.msk.f32.mxu1 %vm267_vm1, %v5595_v12  ;;  %4990 = vmatprep.mubr.msk.f32.mxu0 %vm267_vm1, %v5611_v14  ;;  %6685 = vst [vmem:[#allocation6_spill] sm:$0xff] %v5757_v37  ;;  %v5760_v38 = vld [vmem:[%s5565_s28 + $0x6a] sm:$0xff]  ;;  %v5763_v39 = vld [vmem:[%s5565_s28 + $0x121] sm:$0xff]  ;;  %v5783_v43 = vld [vmem:[%s5565_s28 + $0x139] sm:$0xff] }
  0x1f   : > { %6686 = vst [vmem:[#allocation7_spill] sm:$0xff] %v5763_v39  ;;  %v5766_v40 = vld [vmem:[%s5565_s28 + $0x7a] sm:$0xff]  ;;  %v5777_v41 = vld [vmem:[%s5565_s28 + $0x129] sm:$0xff]  ;;  %6688 = vst [vmem:[#allocation9_spill] sm:$0xff] %v5783_v43 }
  0x20   : > { %6687 = vst [vmem:[#allocation8_spill] sm:$0xff] %v5777_v41  ;;  %v5780_v42 = vld [vmem:[%s5565_s28 + $0x82] sm:$0xff]  ;;  %v5786_v44 = vld [vmem:[%s5565_s28 + $0x92] sm:$0xff]  ;;  %v5800_v46 = vld [vmem:[%s5565_s28 + $0x9a] sm:$0xff] }
  0x21   : > { %4791 = vmatmul.mubr.msk.f32.gmra.mrb[6].mxu1 %vm267_vm1, %v5608_v13  ;;  %4991 = vmatmul.mubr.msk.f32.gmra.mrb[6].mxu0 %vm267_vm1, %v5622_v15  ;;  %v5797_v45 = vld [vmem:[%s5565_s28 + $0x141] sm:$0xff]  ;;  %v5803_v47 = vld [vmem:[%s5565_s28 + $0x151] sm:$0xff]  ;;  %v5817_v49 = vld [vmem:[%s5565_s28 + $0x159] sm:$0xff] }
  0x22   : > { %4793 = vmatprep.mubr.msk.f32.mxu1 %vm267_vm1, %v5611_v14  ;;  %4993 = vmatprep.mubr.msk.f32.mxu0 %vm267_vm1, %v5625_v16  ;;  %6689 = vst [vmem:[#allocation10_spill] sm:$0xff] %v5797_v45  ;;  %6690 = vst [vmem:[#allocation11_spill] sm:$0xff] %v5803_v47  ;;  %v5806_v48 = vld [vmem:[%s5565_s28 + $0xaa] sm:$0xff]  ;;  %v5820_v50 = vld [vmem:[%s5565_s28 + $0xb2] sm:$0xff] }
  0x23   : > { %6691 = vst [vmem:[#allocation12_spill] sm:$0xff] %v5817_v49  ;;  %v5823_v51 = vld [vmem:[%s5565_s28 + $0x169] sm:$0xff]  ;;  %v5837_v53 = vld [vmem:[%s5565_s28 + $0x171] sm:$0xff]  ;;  %v200_v55 = vld [vmem:[%s5565_s28] sm:$0xff] }
  0x24   : > { %6692 = vst [vmem:[#allocation13_spill] sm:$0xff] %v5823_v51  ;;  %v5826_v52 = vld [vmem:[%s5565_s28 + $0xc2] sm:$0xff]  ;;  %6693 = vst [vmem:[#allocation14_spill] sm:$0xff] %v5837_v53  ;;  %v5840_v54 = vld [vmem:[%s5565_s28 + $0xca] sm:$0xff] }
  0x25   : > { %4794 = vmatmul.mubr.msk.f32.gmra.mrb[8].mxu1 %vm267_vm1, %v5622_v15  ;;  %4994 = vmatmul.mubr.msk.f32.gmra.mrb[8].mxu0 %vm267_vm1, %v5636_v17  ;;  %v5844_v56 = vld [vmem:[%s5565_s28 + $0xda] sm:$0xff]  ;;  %v201_v57 = vld [vmem:[%s5565_s28 + $0x8] sm:$0xff]  ;;  %v5861_v60 = vld [vmem:[%s5565_s28 + $0xf2] sm:$0xff] }
  0x26   : > { %4796 = vmatprep.mubr.msk.f32.mxu1 %vm267_vm1, %v5625_v16  ;;  %4996 = vmatprep.mubr.msk.f32.mxu0 %vm267_vm1, %v5639_v18  ;;  %v5855_v58 = vld [vmem:[%s5565_s28 + $0xe2] sm:$0xff]  ;;  %v5858_v59 = vld [vmem:[%s5565_s28 + $0x18] sm:$0xff]  ;;  %v5884_v0 = vld [vmem:[%s5565_s28 + $0x30] sm:$0xff] }
  0x27   : > { %6694 = vst [vmem:[#allocation15_spill] sm:$0xff] %v5858_v59  ;;  %v5876_v62 = vld [vmem:[%s5565_s28 + $0x20] sm:$0xff]  ;;  %6696 = vst [vmem:[#allocation17_spill] sm:$0xff] %v5884_v0  ;;  %v5887_v2 = vld [vmem:[%s5565_s28 + $0x10a] sm:$0xff] }
  0x28   : > { %6695 = vst [vmem:[#allocation16_spill] sm:$0xff] %v5876_v62  ;;  %v5879_v63 = vld [vmem:[%s5565_s28 + $0xfa] sm:$0xff]  ;;  %v5903_v4 = vld [vmem:[%s5565_s28 + $0x112] sm:$0xff]  ;;  %v5906_v5 = vld [vmem:[%s5565_s28 + $0x48] sm:$0xff] }
  0x29   : > { %4797 = vmatmul.mubr.msk.f32.gmra.mrb[10].mxu1 %vm267_vm1, %v5636_v17  ;;  %4997 = vmatmul.mubr.msk.f32.gmra.mrb[10].mxu0 %vm267_vm1, %v5650_v19  ;;  %v5900_v3 = vld [vmem:[%s5565_s28 + $0x38] sm:$0xff]  ;;  %6698 = vst [vmem:[#allocation19_spill] sm:$0xff] %v5906_v5  ;;  %v5909_v6 = vld [vmem:[%s5565_s28 + $0x122] sm:$0xff]  ;;  %v5920_v7 = vld [vmem:[%s5565_s28 + $0x50] sm:$0xff] }
  0x2a   : > { %4799 = vmatprep.mubr.msk.f32.mxu1 %vm267_vm1, %v5639_v18  ;;  %4999 = vmatprep.mubr.msk.f32.mxu0 %vm267_vm1, %v5653_v20  ;;  %6697 = vst [vmem:[#allocation18_spill] sm:$0xff] %v5900_v3  ;;  %6699 = vst [vmem:[#allocation20_spill] sm:$0xff] %v5920_v7 }
  0x2d   : > { %4800 = vmatmul.mubr.msk.f32.gmra.mrb[12].mxu1 %vm267_vm1, %v5650_v19  ;;  %5000 = vmatmul.mubr.msk.f32.gmra.mrb[12].mxu0 %vm267_vm1, %v5664_v21 }
  0x2e   : > { %4802 = vmatprep.mubr.msk.f32.mxu1 %vm267_vm1, %v5653_v20  ;;  %5002 = vmatprep.mubr.msk.f32.mxu0 %vm267_vm1, %v5667_v22 }
  0x31   : > { %4803 = vmatmul.mubr.msk.f32.gmra.mrb[14].mxu1 %vm267_vm1, %v5664_v21  ;;  %5003 = vmatmul.mubr.msk.f32.gmra.mrb[14].mxu0 %vm267_vm1, %v5678_v23 }
  0x32   : > { %4805 = vmatprep.mubr.msk.f32.mxu1 %vm267_vm1, %v5667_v22  ;;  %5031 = vmatprep.mubr.msk.f32.mxu0 %vm267_vm1, %v5681_v24 }
  0x35   : > { %4806 = vmatmul.mubr.msk.f32.gmra.mrb[16].mxu1 %vm267_vm1, %v5678_v23  ;;  %5032 = vmatmul.mubr.msk.f32.vlgmr.msra.gmra.mrb[0].mxu0 %vm267_vm1, %v5692_v25 }
  0x36   : > { %5080 = vmatpush3.msk.msra.mxu0 %vm364_vm0, %v4311_v9  ;;  %4808 = vmatprep.mubr.msk.f32.mxu1 %vm267_vm1, %v5695_v26  ;;  %v5923_v9 = vld [vmem:[%s5565_s28 + $0x12a] sm:$0xff] }
  0x37   : > { %5034 = vmatprep.mubr.msk.f32.mxu0 %vm267_vm1, %v5698_v27  ;;  %5129 = vmatprep.subr.msk.mxu0 %vm364_vm0, %v5703_v28 }
  0x39   : > { %4809 = vmatmul.mubr.msk.f32.gmra.mrb[18].mxu1 %vm267_vm1, %v5713_v29  ;;  %5035 = vmatmul.mubr.msk.f32.gmra.mrb[2].mxu0 %vm267_vm1, %v5716_v30  ;;  %v6020_v29 = vld [vmem:[%s5565_s28 + $0xd8] sm:$0xff] }
  0x3a   : > { %4811 = vmatprep.mubr.msk.f32.mxu1 %vm267_vm1, %v5721_v31  ;;  %5037 = vmatprep.mubr.msk.f32.mxu0 %vm267_vm1, %v5724_v32  ;;  %v6003_v31 = vld [vmem:[%s5565_s28 + $0x18a] sm:$0xff] }
  0x3b   : > { %6710 = vst [vmem:[#allocation31_spill] sm:$0xff] %v6003_v31 }
  0x3d   : > { %4812 = vmatmul.mubr.msk.f32.gmra.mrb[20].mxu1 %vm267_vm1, %v5737_v33  ;;  %5038 = vmatmul.mubr.msk.f32.gmra.mrb[4].mxu0 %vm267_vm1, %v5740_v34  ;;  %v5989_v33 = vld [vmem:[%s5565_s28 + $0x182] sm:$0xff] }
  0x3e   : > { %4814 = vmatprep.mubr.msk.f32.mxu1 %vm267_vm1, %v5743_v35  ;;  %5040 = vmatprep.mubr.msk.f32.mxu0 %vm267_vm1, %v5746_v36  ;;  %v5986_v35 = vld [vmem:[%s5565_s28 + $0xa8] sm:$0xff]  ;;  %6708 = vst [vmem:[#allocation29_spill] sm:$0xff] %v5989_v33 }
  0x3f   : > { %6707 = vst [vmem:[#allocation28_spill] sm:$0xff] %v5986_v35 }
  0x41   : > { %4815 = vmatmul.mubr.msk.f32.gmra.mrb[22].mxu1 %vm267_vm1, %v5757_v37  ;;  %5041 = vmatmul.mubr.msk.f32.gmra.mrb[6].mxu0 %vm267_vm1, %v5760_v38  ;;  %v5983_v37 = vld [vmem:[%s5565_s28 + $0x172] sm:$0xff] }
  0x42   : > { %4817 = vmatprep.mubr.msk.f32.mxu1 %vm267_vm1, %v5763_v39  ;;  %5043 = vmatprep.mubr.msk.f32.mxu0 %vm267_vm1, %v5766_v40  ;;  %v5980_v39 = vld [vmem:[%s5565_s28 + $0x98] sm:$0xff]  ;;  %6706 = vst [vmem:[#allocation27_spill] sm:$0xff] %v5983_v37 }
  0x43   : > { %6705 = vst [vmem:[#allocation26_spill] sm:$0xff] %v5980_v39 }
  0x45   : > { %4818 = vmatmul.mubr.msk.f32.gmra.mrb[24].mxu1 %vm267_vm1, %v5777_v41  ;;  %5044 = vmatmul.mubr.msk.f32.gmra.mrb[8].mxu0 %vm267_vm1, %v5780_v42  ;;  %v5969_v41 = vld [vmem:[%s5565_s28 + $0x16a] sm:$0xff] }
  0x46   : > { %4820 = vmatprep.mubr.msk.f32.mxu1 %vm267_vm1, %v5783_v43  ;;  %5046 = vmatprep.mubr.msk.f32.mxu0 %vm267_vm1, %v5786_v44  ;;  %v5966_v43 = vld [vmem:[%s5565_s28 + $0x90] sm:$0xff] }
  0x47   : > { %6704 = vst [vmem:[#allocation25_spill] sm:$0xff] %v5966_v43 }
  0x49   : > { %4821 = vmatmul.mubr.msk.f32.gmra.mrb[26].mxu1 %vm267_vm1, %v5797_v45  ;;  %5047 = vmatmul.mubr.msk.f32.gmra.mrb[10].mxu0 %vm267_vm1, %v5800_v46  ;;  %v5963_v45 = vld [vmem:[%s5565_s28 + $0x15a] sm:$0xff] }
  0x4a   : > { %4823 = vmatprep.mubr.msk.f32.mxu1 %vm267_vm1, %v5803_v47  ;;  %5049 = vmatprep.mubr.msk.f32.mxu0 %vm267_vm1, %v5806_v48  ;;  %v5960_v47 = vld [vmem:[%s5565_s28 + $0x80] sm:$0xff] }
  0x4b   : > { %6703 = vst [vmem:[#allocation24_spill] sm:$0xff] %v5960_v47 }
  0x4d   : > { %4824 = vmatmul.mubr.msk.f32.gmra.mrb[28].mxu1 %vm267_vm1, %v5817_v49  ;;  %5050 = vmatmul.mubr.msk.f32.gmra.mrb[12].mxu0 %vm267_vm1, %v5820_v50  ;;  %v5949_v49 = vld [vmem:[%s5565_s28 + $0x152] sm:$0xff] }
  0x4e   : > { %4826 = vmatprep.mubr.msk.f32.mxu1 %vm267_vm1, %v5823_v51  ;;  %5052 = vmatprep.mubr.msk.f32.mxu0 %vm267_vm1, %v5826_v52  ;;  %v5946_v51 = vld [vmem:[%s5565_s28 + $0x78] sm:$0xff] }
  0x4f   : > { %6702 = vst [vmem:[#allocation23_spill] sm:$0xff] %v5946_v51 }
  0x51   : > { %4827 = vmatmul.mubr.msk.f32.gmra.mrb[30].mxu1 %vm267_vm1, %v5837_v53  ;;  %5053 = vmatmul.mubr.msk.f32.gmra.mrb[14].mxu0 %vm267_vm1, %v5840_v54  ;;  %v5943_v53 = vld [vmem:[%s5565_s28 + $0x142] sm:$0xff] }
  0x52   : > { %4831 = vmatprep.mubr.msk.f32.mxu1 %vm267_vm1, %v200_v55  ;;  %5055 = vmatprep.mubr.msk.f32.mxu0 %vm267_vm1, %v5844_v56  ;;  %v5929_v55 = vld [vmem:[%s5565_s28 + $0x13a] sm:$0xff] }
  0x55   : > { %4832 = vmatmul.mubr.msk.f32.vlgmr.msra.gmra.mrb[0].mxu1 %vm267_vm1, %v201_v57  ;;  %5056 = vmatmul.mubr.msk.f32.gmra.mrb[16].mxu0 %vm267_vm1, %v5855_v58  ;;  %v5940_v57 = vld [vmem:[%s5565_s28 + $0x68] sm:$0xff] }
  0x56   : > { %4880 = vmatpush3.msk.msra.mxu1 %vm364_vm0, %v5584_v10  ;;  %4834 = vmatprep.mubr.msk.f32.mxu1 %vm267_vm1, %v5858_v59  ;;  %v5926_v10 = vld [vmem:[%s5565_s28 + $0x60] sm:$0xff]  ;;  %6701 = vst [vmem:[#allocation22_spill] sm:$0xff] %v5940_v57 }
  0x57   : > { %5058 = vmatprep.mubr.msk.f32.mxu0 %vm267_vm1, %v5861_v60  ;;  %4929 = vmatprep.subr.msk.mxu1 %vm364_vm0, %v5866_v61  ;;  %6700 = vst [vmem:[#allocation21_spill] sm:$0xff] %v5926_v10  ;;  %v6006_v59 = vld [vmem:[%s5565_s28 + $0xc0] sm:$0xff] }
  0x59   : > { %4835 = vmatmul.mubr.msk.f32.gmra.mrb[2].mxu1 %vm267_vm1, %v5876_v62  ;;  %5059 = vmatmul.mubr.msk.f32.gmra.mrb[18].mxu0 %vm267_vm1, %v5879_v63  ;;  %v6000_v62 = vld [vmem:[%s5565_s28 + $0xb0] sm:$0xff] }
  0x5a   : > { %4837 = vmatprep.mubr.msk.f32.mxu1 %vm267_vm1, %v5884_v0  ;;  %5061 = vmatprep.mubr.msk.f32.mxu0 %vm267_vm1, %v5887_v2  ;;  %6709 = vst [vmem:[#allocation30_spill] sm:$0xff] %v6000_v62 }
  0x5d   : > { %4838 = vmatmul.mubr.msk.f32.gmra.mrb[4].mxu1 %vm267_vm1, %v5900_v3  ;;  %5062 = vmatmul.mubr.msk.f32.gmra.mrb[20].mxu0 %vm267_vm1, %v5903_v4 }
  0x5e   : > { %4840 = vmatprep.mubr.msk.f32.mxu1 %vm267_vm1, %v5906_v5  ;;  %5064 = vmatprep.mubr.msk.f32.mxu0 %vm267_vm1, %v5909_v6 }
  0x61   : > { %4841 = vmatmul.mubr.msk.f32.gmra.mrb[6].mxu1 %vm267_vm1, %v5920_v7  ;;  %5065 = vmatmul.mubr.msk.f32.gmra.mrb[22].mxu0 %vm267_vm1, %v5923_v9 }
  0x62   : > { %4843 = vmatprep.mubr.msk.f32.mxu1 %vm267_vm1, %v5926_v10  ;;  %5067 = vmatprep.mubr.msk.f32.mxu0 %vm267_vm1, %v5929_v55 }
  0x65   : > { %4844 = vmatmul.mubr.msk.f32.gmra.mrb[8].mxu1 %vm267_vm1, %v5940_v57  ;;  %5068 = vmatmul.mubr.msk.f32.gmra.mrb[24].mxu0 %vm267_vm1, %v5943_v53 }
  0x66   : > { %4846 = vmatprep.mubr.msk.f32.mxu1 %vm267_vm1, %v5946_v51  ;;  %5070 = vmatprep.mubr.msk.f32.mxu0 %vm267_vm1, %v5949_v49 }
  0x69   : > { %4847 = vmatmul.mubr.msk.f32.gmra.mrb[10].mxu1 %vm267_vm1, %v5960_v47  ;;  %5071 = vmatmul.mubr.msk.f32.gmra.mrb[26].mxu0 %vm267_vm1, %v5963_v45 }
  0x6a   : > { %4849 = vmatprep.mubr.msk.f32.mxu1 %vm267_vm1, %v5966_v43  ;;  %5073 = vmatprep.mubr.msk.f32.mxu0 %vm267_vm1, %v5969_v41 }
  0x6d   : > { %4850 = vmatmul.mubr.msk.f32.gmra.mrb[12].mxu1 %vm267_vm1, %v5980_v39  ;;  %5074 = vmatmul.mubr.msk.f32.gmra.mrb[28].mxu0 %vm267_vm1, %v5983_v37  ;;  %v6025_v37 = vld [vmem:[%s6632_s1 + $0x20] sm:$0xf] }
  0x6e   : > { %4852 = vmatprep.mubr.msk.f32.mxu1 %vm267_vm1, %v5986_v35  ;;  %5076 = vmatprep.mubr.msk.f32.mxu0 %vm267_vm1, %v5989_v33  ;;  %v6017_v33 = vld [vmem:[%s5565_s28 + $0xc8] sm:$0xff] }
  0x6f   : > { %6711 = vst [vmem:[#allocation32_spill] sm:$0xff] %v6017_v33 }
  0x71   : > { %4853 = vmatmul.mubr.msk.f32.gmra.mrb[14].mxu1 %vm267_vm1, %v6000_v62  ;;  %5077 = vmatmul.mubr.msk.f32.gmra.mrb[30].mxu0 %vm267_vm1, %v6003_v31  ;;  %v6036_v31 = vld [vmem:[%s5565_s28 + $0xe0] sm:$0xff] }
  0x72   : > { %4855 = vmatprep.mubr.msk.f32.mxu1 %vm267_vm1, %v6006_v59  ;;  %5081 = vmatprep.mubr.msk.f32.mxu0 %vm267_vm1, %v5884_v0  ;;  %v6041_v0 = vld [vmem:[%s5565_s28 + $0xf0] sm:$0xff] }
  0x75   : > { %4856 = vmatmul.mubr.msk.f32.gmra.mrb[16].mxu1 %vm267_vm1, %v6017_v33  ;;  %5082 = vmatmul.mubr.msk.f32.vlgmr.msra.gmra.mrb[0].mxu0 %vm267_vm1, %v5900_v3  ;;  %v917_v3 = vld [vmem:[%s5565_s28 + $0x2] sm:$0xff] }
  0x76   : > { %5130 = vmatpush3.msk.msra.mxu0 %vm364_vm0, %v5703_v28  ;;  %4858 = vmatprep.mubr.msk.f32.mxu1 %vm267_vm1, %v6020_v29  ;;  %v6054_v28 = vld [vmem:[%s5565_s28 + $0xf8] sm:$0xff] }
  0x77   : > { %5084 = vmatprep.mubr.msk.f32.mxu0 %vm267_vm1, %v5906_v5  ;;  %5179 = vmatprep.subr.msk.mxu0 %vm364_vm0, %v6025_v37  ;;  %v6057_v5 = vld [vmem:[%s5565_s28 + $0x108] sm:$0xff] }
  0x79   : > { %4859 = vmatmul.mubr.msk.f32.gmra.mrb[18].mxu1 %vm267_vm1, %v6036_v31  ;;  %5085 = vmatmul.mubr.msk.f32.gmra.mrb[2].mxu0 %vm267_vm1, %v5920_v7  ;;  %v6068_v7 = vld [vmem:[%s5565_s28 + $0x110] sm:$0xff] }
  0x7a   : > { %4861 = vmatprep.mubr.msk.f32.mxu1 %vm267_vm1, %v6041_v0  ;;  %5087 = vmatprep.mubr.msk.f32.mxu0 %vm267_vm1, %v5926_v10  ;;  %v6071_v10 = vld [vmem:[%s5565_s28 + $0x120] sm:$0xff] }
  0x7d   : > { %4862 = vmatmul.mubr.msk.f32.gmra.mrb[20].mxu1 %vm267_vm1, %v6054_v28  ;;  %5088 = vmatmul.mubr.msk.f32.gmra.mrb[4].mxu0 %vm267_vm1, %v5940_v57  ;;  %v6082_v57 = vld [vmem:[%s5565_s28 + $0x128] sm:$0xff] }
  0x7e   : > { %4864 = vmatprep.mubr.msk.f32.mxu1 %vm267_vm1, %v6057_v5  ;;  %5090 = vmatprep.mubr.msk.f32.mxu0 %vm267_vm1, %v5946_v51  ;;  %v6085_v51 = vld [vmem:[%s5565_s28 + $0x138] sm:$0xff] }
  0x81   : > { %4865 = vmatmul.mubr.msk.f32.gmra.mrb[22].mxu1 %vm267_vm1, %v6068_v7  ;;  %5091 = vmatmul.mubr.msk.f32.gmra.mrb[6].mxu0 %vm267_vm1, %v5960_v47  ;;  %v6096_v47 = vld [vmem:[%s5565_s28 + $0x140] sm:$0xff] }
  0x82   : > { %4867 = vmatprep.mubr.msk.f32.mxu1 %vm267_vm1, %v6071_v10  ;;  %5093 = vmatprep.mubr.msk.f32.mxu0 %vm267_vm1, %v5966_v43  ;;  %v6099_v43 = vld [vmem:[%s5565_s28 + $0x150] sm:$0xff] }
  0x85   : > { %4868 = vmatmul.mubr.msk.f32.gmra.mrb[24].mxu1 %vm267_vm1, %v6082_v57  ;;  %5094 = vmatmul.mubr.msk.f32.gmra.mrb[8].mxu0 %vm267_vm1, %v5980_v39  ;;  %v6110_v39 = vld [vmem:[%s5565_s28 + $0x158] sm:$0xff] }
  0x86   : > { %4870 = vmatprep.mubr.msk.f32.mxu1 %vm267_vm1, %v6085_v51  ;;  %5096 = vmatprep.mubr.msk.f32.mxu0 %vm267_vm1, %v5986_v35  ;;  %v6113_v35 = vld [vmem:[%s5565_s28 + $0x168] sm:$0xff] }
  0x89   : > { %4871 = vmatmul.mubr.msk.f32.gmra.mrb[26].mxu1 %vm267_vm1, %v6096_v47  ;;  %5097 = vmatmul.mubr.msk.f32.gmra.mrb[10].mxu0 %vm267_vm1, %v6000_v62  ;;  %v6124_v62 = vld [vmem:[%s5565_s28 + $0x170] sm:$0xff] }
  0x8a   : > { %4873 = vmatprep.mubr.msk.f32.mxu1 %vm267_vm1, %v6099_v43  ;;  %5099 = vmatprep.mubr.msk.f32.mxu0 %vm267_vm1, %v6006_v59 }
  0x8d   : > { %4874 = vmatmul.mubr.msk.f32.gmra.mrb[28].mxu1 %vm267_vm1, %v6110_v39  ;;  %5100 = vmatmul.mubr.msk.f32.gmra.mrb[12].mxu0 %vm267_vm1, %v6017_v33  ;;  %v918_v33 = vld [vmem:[%s5565_s28 + $0xa] sm:$0xff] }
  0x8e   : > { %4876 = vmatprep.mubr.msk.f32.mxu1 %vm267_vm1, %v6113_v35  ;;  %5102 = vmatprep.mubr.msk.f32.mxu0 %vm267_vm1, %v6020_v29 }
  0x91   : > { %4877 = vmatmul.mubr.msk.f32.gmra.mrb[30].mxu1 %vm267_vm1, %v6124_v62  ;;  %5103 = vmatmul.mubr.msk.f32.gmra.mrb[14].mxu0 %vm267_vm1, %v6036_v31 }
  0x92   : > { %4881 = vmatprep.mubr.msk.f32.mxu1 %vm267_vm1, %v917_v3  ;;  %5105 = vmatprep.mubr.msk.f32.mxu0 %vm267_vm1, %v6041_v0  ;;  %v6728_v3 = vld [vmem:[#allocation22_spill] sm:$0xff] }
  0x95   : > { %4882 = vmatmul.mubr.msk.f32.vlgmr.msra.gmra.mrb[0].mxu1 %vm267_vm1, %v918_v33  ;;  %5106 = vmatmul.mubr.msk.f32.gmra.mrb[16].mxu0 %vm267_vm1, %v6054_v28  ;;  %v4309_v33 = vld [vmem:[%s5565_s28 + $0x198] sm:$0xff] }
  0x96   : > { %4930 = vmatpush3.msk.msra.mxu1 %vm364_vm0, %v5866_v61  ;;  %4884 = vmatprep.mubr.msk.f32.mxu1 %vm267_vm1, %v5681_v24  ;;  %v6179_v24 = vld [vmem:[%s5565_s28 + $0x180] sm:$0xff] }
  0x97   : > { %5108 = vmatprep.mubr.msk.f32.mxu0 %vm267_vm1, %v6057_v5  ;;  %5229 = vmatprep.subr.msk.mxu1 %vm364_vm0, %v5543_v1  ;;  %v4310_v61 = vld [vmem:[%s5565_s28 + $0x1a0] sm:$0xff] }
  0x99   : > { %4885 = vmatmul.mubr.msk.f32.gmra.mrb[2].mxu1 %vm267_vm1, %v5692_v25  ;;  %5109 = vmatmul.mubr.msk.f32.gmra.mrb[18].mxu0 %vm267_vm1, %v6068_v7  ;;  %v6190_v25 = vld [vmem:[%s5565_s28 + $0x188] sm:$0xff] }
  0x9a   : > { %4887 = vmatprep.mubr.msk.f32.mxu1 %vm267_vm1, %v5698_v27  ;;  %5111 = vmatprep.mubr.msk.f32.mxu0 %vm267_vm1, %v6071_v10 }
  0x9d   : > { %4888 = vmatmul.mubr.msk.f32.gmra.mrb[4].mxu1 %vm267_vm1, %v5716_v30  ;;  %5112 = vmatmul.mubr.msk.f32.gmra.mrb[20].mxu0 %vm267_vm1, %v6082_v57 }
  0x9e   : > { %4890 = vmatprep.mubr.msk.f32.mxu1 %vm267_vm1, %v5724_v32  ;;  %5114 = vmatprep.mubr.msk.f32.mxu0 %vm267_vm1, %v6085_v51 }
  0xa1   : > { %4891 = vmatmul.mubr.msk.f32.gmra.mrb[6].mxu1 %vm267_vm1, %v5740_v34  ;;  %5115 = vmatmul.mubr.msk.f32.gmra.mrb[22].mxu0 %vm267_vm1, %v6096_v47 }
  0xa2   : > { %4893 = vmatprep.mubr.msk.f32.mxu1 %vm267_vm1, %v5746_v36  ;;  %5117 = vmatprep.mubr.msk.f32.mxu0 %vm267_vm1, %v6099_v43 }
  0xa5   : > { %4894 = vmatmul.mubr.msk.f32.gmra.mrb[8].mxu1 %vm267_vm1, %v5760_v38  ;;  %5118 = vmatmul.mubr.msk.f32.gmra.mrb[24].mxu0 %vm267_vm1, %v6110_v39 }
  0xa6   : > { %4896 = vmatprep.mubr.msk.f32.mxu1 %vm267_vm1, %v5766_v40  ;;  %5120 = vmatprep.mubr.msk.f32.mxu0 %vm267_vm1, %v6113_v35 }
  0xa9   : > { %4897 = vmatmul.mubr.msk.f32.gmra.mrb[10].mxu1 %vm267_vm1, %v5780_v42  ;;  %5121 = vmatmul.mubr.msk.f32.gmra.mrb[26].mxu0 %vm267_vm1, %v6124_v62 }
  0xaa   : > { %4899 = vmatprep.mubr.msk.f32.mxu1 %vm267_vm1, %v5786_v44  ;;  %5123 = vmatprep.mubr.msk.f32.mxu0 %vm267_vm1, %v6179_v24 }
  0xad   : > { %4900 = vmatmul.mubr.msk.f32.gmra.mrb[12].mxu1 %vm267_vm1, %v5800_v46  ;;  %5124 = vmatmul.mubr.msk.f32.gmra.mrb[28].mxu0 %vm267_vm1, %v6190_v25 }
  0xae   : > { %4902 = vmatprep.mubr.msk.f32.mxu1 %vm267_vm1, %v5806_v48  ;;  %5126 = vmatprep.mubr.msk.f32.mxu0 %vm267_vm1, %v4309_v33  ;;  %v6729_v33 = vld [vmem:[#allocation10_spill] sm:$0xff] }
  0xb1   : > { %4903 = vmatmul.mubr.msk.f32.gmra.mrb[14].mxu1 %vm267_vm1, %v5820_v50  ;;  %5127 = vmatmul.mubr.msk.f32.gmra.mrb[30].mxu0 %vm267_vm1, %v4310_v61  ;;  %v6730_v61 = vld [vmem:[#allocation23_spill] sm:$0xff] }
  0xb2   : > { %4905 = vmatprep.mubr.msk.f32.mxu1 %vm267_vm1, %v5826_v52  ;;  %5131 = vmatprep.mubr.msk.f32.mxu0 %vm267_vm1, %v5574_v8  ;;  %v6712_v8 = vld [vmem:[#allocation27_spill] sm:$0xff] }
  0xb5   : > { %4906 = vmatmul.mubr.msk.f32.gmra.mrb[16].mxu1 %vm267_vm1, %v5840_v54  ;;  %5132 = vmatmul.mubr.msk.f32.vlgmr.msra.gmra.mrb[0].mxu0 %vm267_vm1, %v5589_v11  ;;  %v6713_v11 = vld [vmem:[#allocation2_spill] sm:$0xff] }
  0xb6   : > { %5180 = vmatpush3.msk.msra.mxu0 %vm364_vm0, %v6025_v37  ;;  %4908 = vmatprep.mubr.msk.f32.mxu1 %vm267_vm1, %v5844_v56  ;;  %v6727_v37 = vld [vmem:[#allocation9_spill] sm:$0xff] }
  0xb7   : > { %5134 = vmatprep.mubr.msk.f32.mxu0 %vm267_vm1, %v5595_v12  ;;  %v6714_v12 = vld [vmem:[#allocation15_spill] sm:$0xff] }
  0xb9   : > { %4909 = vmatmul.mubr.msk.f32.gmra.mrb[18].mxu1 %vm267_vm1, %v5855_v58  ;;  %5135 = vmatmul.mubr.msk.f32.gmra.mrb[2].mxu0 %vm267_vm1, %v5608_v13  ;;  %v6715_v13 = vld [vmem:[#allocation3_spill] sm:$0xff] }
  0xba   : > { %4911 = vmatprep.mubr.msk.f32.mxu1 %vm267_vm1, %v5861_v60  ;;  %5137 = vmatprep.mubr.msk.f32.mxu0 %vm267_vm1, %v5611_v14  ;;  %v6716_v14 = vld [vmem:[#allocation16_spill] sm:$0xff] }
  0xbd   : > { %4912 = vmatmul.mubr.msk.f32.gmra.mrb[20].mxu1 %vm267_vm1, %v5879_v63  ;;  %5138 = vmatmul.mubr.msk.f32.gmra.mrb[4].mxu0 %vm267_vm1, %v5622_v15  ;;  %v6717_v15 = vld [vmem:[#allocation4_spill] sm:$0xff] }
  0xbe   : > { %4914 = vmatprep.mubr.msk.f32.mxu1 %vm267_vm1, %v5887_v2  ;;  %5140 = vmatprep.mubr.msk.f32.mxu0 %vm267_vm1, %v5625_v16  ;;  %v6718_v16 = vld [vmem:[#allocation17_spill] sm:$0xff] }
  0xc1   : > { %4915 = vmatmul.mubr.msk.f32.gmra.mrb[22].mxu1 %vm267_vm1, %v5903_v4  ;;  %5141 = vmatmul.mubr.msk.f32.gmra.mrb[6].mxu0 %vm267_vm1, %v5636_v17  ;;  %v6719_v17 = vld [vmem:[#allocation5_spill] sm:$0xff] }
  0xc2   : > { %4917 = vmatprep.mubr.msk.f32.mxu1 %vm267_vm1, %v5909_v6  ;;  %5143 = vmatprep.mubr.msk.f32.mxu0 %vm267_vm1, %v5639_v18  ;;  %v6720_v18 = vld [vmem:[#allocation18_spill] sm:$0xff] }
  0xc5   : > { %4918 = vmatmul.mubr.msk.f32.gmra.mrb[24].mxu1 %vm267_vm1, %v5923_v9  ;;  %5144 = vmatmul.mubr.msk.f32.gmra.mrb[8].mxu0 %vm267_vm1, %v5650_v19  ;;  %v6721_v19 = vld [vmem:[#allocation6_spill] sm:$0xff] }
  0xc6   : > { %4920 = vmatprep.mubr.msk.f32.mxu1 %vm267_vm1, %v5929_v55  ;;  %5146 = vmatprep.mubr.msk.f32.mxu0 %vm267_vm1, %v5653_v20  ;;  %v6722_v20 = vld [vmem:[#allocation19_spill] sm:$0xff] }
  0xc9   : > { %4921 = vmatmul.mubr.msk.f32.gmra.mrb[26].mxu1 %vm267_vm1, %v5943_v53  ;;  %5147 = vmatmul.mubr.msk.f32.gmra.mrb[10].mxu0 %vm267_vm1, %v5664_v21  ;;  %v6723_v21 = vld [vmem:[#allocation7_spill] sm:$0xff] }
  0xca   : > { %4923 = vmatprep.mubr.msk.f32.mxu1 %vm267_vm1, %v5949_v49  ;;  %5149 = vmatprep.mubr.msk.f32.mxu0 %vm267_vm1, %v5667_v22  ;;  %v6725_v22 = vld [vmem:[#allocation8_spill] sm:$0xff] }
  0xcd   : > { %4924 = vmatmul.mubr.msk.f32.gmra.mrb[28].mxu1 %vm267_vm1, %v5963_v45  ;;  %5150 = vmatmul.mubr.msk.f32.gmra.mrb[12].mxu0 %vm267_vm1, %v5678_v23  ;;  %v6726_v23 = vld [vmem:[#allocation21_spill] sm:$0xff] }
  0xce   : > { %4926 = vmatprep.mubr.msk.f32.mxu1 %vm267_vm1, %v5969_v41  ;;  %5152 = vmatprep.mubr.msk.f32.mxu0 %vm267_vm1, %v5695_v26 }
  0xd1   : > { %4927 = vmatmul.mubr.msk.f32.gmra.mrb[30].mxu1 %vm267_vm1, %v6712_v8  ;;  %5153 = vmatmul.mubr.msk.f32.gmra.mrb[14].mxu0 %vm267_vm1, %v6713_v11  ;;  %v6739_v8 = vld [vmem:[#allocation30_spill] sm:$0xff] }
  0xd2   : > { %4931 = vmatprep.mubr.msk.f32.mxu1 %vm267_vm1, %v6714_v12  ;;  %5155 = vmatprep.mubr.msk.f32.mxu0 %vm267_vm1, %v6715_v13  ;;  %v6731_v12 = vld [vmem:[#allocation11_spill] sm:$0xff] }
  0xd5   : > { %4932 = vmatmul.mubr.msk.f32.vlgmr.msra.gmra.mrb[0].mxu1 %vm267_vm1, %v6716_v14  ;;  %5156 = vmatmul.mubr.msk.f32.gmra.mrb[16].mxu0 %vm267_vm1, %v6717_v15  ;;  %v6732_v14 = vld [vmem:[#allocation24_spill] sm:$0xff] }
  0xd6   : > { %5230 = vmatpush3.msk.msra.mxu1 %vm364_vm0, %v5543_v1  ;;  %4934 = vmatprep.mubr.msk.f32.mxu1 %vm267_vm1, %v6718_v16  ;;  %v6724_v1 = vld [vmem:[#allocation20_spill] sm:$0xff] }
  0xd7   : > { %5158 = vmatprep.mubr.msk.f32.mxu0 %vm267_vm1, %v6719_v17  ;;  %v6733_v16 = vld [vmem:[#allocation12_spill] sm:$0xff] }
  0xd9   : > { %4935 = vmatmul.mubr.msk.f32.gmra.mrb[2].mxu1 %vm267_vm1, %v6720_v18  ;;  %5159 = vmatmul.mubr.msk.f32.gmra.mrb[18].mxu0 %vm267_vm1, %v6721_v19  ;;  %v6734_v18 = vld [vmem:[#allocation25_spill] sm:$0xff] }
  0xda   : > { %4937 = vmatprep.mubr.msk.f32.mxu1 %vm267_vm1, %v6722_v20  ;;  %5161 = vmatprep.mubr.msk.f32.mxu0 %vm267_vm1, %v6723_v21  ;;  %v6735_v20 = vld [vmem:[#allocation13_spill] sm:$0xff] }
  0xdd   : > { %4938 = vmatmul.mubr.msk.f32.gmra.mrb[4].mxu1 %vm267_vm1, %v6724_v1  ;;  %5162 = vmatmul.mubr.msk.f32.gmra.mrb[20].mxu0 %vm267_vm1, %v6725_v22  ;;  %v6317_v1 = vld [vmem:[%s5565_s28 + $0x181] sm:$0xff] }
  0xde   : > { %4940 = vmatprep.mubr.msk.f32.mxu1 %vm267_vm1, %v6726_v23  ;;  %5164 = vmatprep.mubr.msk.f32.mxu0 %vm267_vm1, %v6727_v37  ;;  %v6736_v23 = vld [vmem:[#allocation26_spill] sm:$0xff] }
  0xe1   : > { %4941 = vmatmul.mubr.msk.f32.gmra.mrb[6].mxu1 %vm267_vm1, %v6728_v3  ;;  %5165 = vmatmul.mubr.msk.f32.gmra.mrb[22].mxu0 %vm267_vm1, %v6729_v33  ;;  %v6737_v3 = vld [vmem:[#allocation14_spill] sm:$0xff] }
  0xe2   : > { %4943 = vmatprep.mubr.msk.f32.mxu1 %vm267_vm1, %v6730_v61  ;;  %5167 = vmatprep.mubr.msk.f32.mxu0 %vm267_vm1, %v6731_v12  ;;  %v6738_v61 = vld [vmem:[#allocation28_spill] sm:$0xff] }
  0xe5   : > { %4944 = vmatmul.mubr.msk.f32.gmra.mrb[8].mxu1 %vm267_vm1, %v6732_v14  ;;  %5168 = vmatmul.mubr.msk.f32.gmra.mrb[24].mxu0 %vm267_vm1, %v6733_v16  ;;  %v6328_v14 = vld [vmem:[%s5565_s28 + $0x189] sm:$0xff] }
  0xe6   : > { %4946 = vmatprep.mubr.msk.f32.mxu1 %vm267_vm1, %v6734_v18  ;;  %5170 = vmatprep.mubr.msk.f32.mxu0 %vm267_vm1, %v6735_v20  ;;  %v4375_v18 = vld [vmem:[%s5565_s28 + $0x199] sm:$0xff] }
  0xe9   : > { %4947 = vmatmul.mubr.msk.f32.gmra.mrb[10].mxu1 %vm267_vm1, %v6736_v23  ;;  %5171 = vmatmul.mubr.msk.f32.gmra.mrb[26].mxu0 %vm267_vm1, %v6737_v3  ;;  %v4376_v23 = vld [vmem:[%s5565_s28 + $0x1a1] sm:$0xff]  ;;  %v6740_v3 = vld [vmem:[#allocation32_spill] sm:$0xff] }
  0xea   : > { %4949 = vmatprep.mubr.msk.f32.mxu1 %vm267_vm1, %v6738_v61  ;;  %5173 = vmatprep.mubr.msk.f32.mxu0 %vm267_vm1, %v6317_v1 }
  0xed   : > { %4950 = vmatmul.mubr.msk.f32.gmra.mrb[12].mxu1 %vm267_vm1, %v6739_v8  ;;  %5174 = vmatmul.mubr.msk.f32.gmra.mrb[28].mxu0 %vm267_vm1, %v6328_v14 }
  0xee   : > { %4952 = vmatprep.mubr.msk.f32.mxu1 %vm267_vm1, %v6006_v59  ;;  %5176 = vmatprep.mubr.msk.f32.mxu0 %vm267_vm1, %v4375_v18 }
  0xf1   : > { %4953 = vmatmul.mubr.msk.f32.gmra.mrb[14].mxu1 %vm267_vm1, %v6740_v3  ;;  %5177 = vmatmul.mubr.msk.f32.gmra.mrb[30].mxu0 %vm267_vm1, %v4376_v23 }
  0xf2   : > { %4955 = vmatprep.mubr.msk.f32.mxu1 %vm267_vm1, %v6020_v29  ;;  %5181 = vmatprep.mubr.msk.f32.mxu0 %vm267_vm1, %v5698_v27  ;;  %v6742_v27 = vld [vmem:[#allocation29_spill] sm:$0xff] }
  0xf3   : > { %v4441_v29 = vld [vmem:[%s5565_s28 + $0x19a] sm:$0xff] }
  0xf5   : > { %4956 = vmatmul.mubr.msk.f32.gmra.mrb[16].mxu1 %vm267_vm1, %v6036_v31  ;;  %5182 = vmatmul.mubr.msk.f32.vlgmr.msra.gmra.mrb[0].mxu0 %vm267_vm1, %v5716_v30  ;;  %v6743_v30 = vld [vmem:[#allocation14_spill] sm:$0xff]  ;;  %v6744_v31 = vld [vmem:[#allocation31_spill] sm:$0xff] }
  0xf6   : > { %4958 = vmatprep.mubr.msk.f32.mxu1 %vm267_vm1, %v6041_v0  ;;  %5184 = vmatprep.mubr.msk.f32.mxu0 %vm267_vm1, %v5724_v32  ;;  %v4442_v32 = vld [vmem:[%s5565_s28 + $0x1a2] sm:$0xff] }
  0xf9   : > { %4959 = vmatmul.mubr.msk.f32.gmra.mrb[18].mxu1 %vm267_vm1, %v6054_v28  ;;  %5185 = vmatmul.mubr.msk.f32.gmra.mrb[2].mxu0 %vm267_vm1, %v5740_v34 }
  0xfa   : > { %4961 = vmatprep.mubr.msk.f32.mxu1 %vm267_vm1, %v6057_v5  ;;  %5187 = vmatprep.mubr.msk.f32.mxu0 %vm267_vm1, %v5746_v36 }
  0xfd   : > { %4962 = vmatmul.mubr.msk.f32.gmra.mrb[20].mxu1 %vm267_vm1, %v6068_v7  ;;  %5188 = vmatmul.mubr.msk.f32.gmra.mrb[4].mxu0 %vm267_vm1, %v5760_v38 }
  0xfe   : > { %4964 = vmatprep.mubr.msk.f32.mxu1 %vm267_vm1, %v6071_v10  ;;  %5190 = vmatprep.mubr.msk.f32.mxu0 %vm267_vm1, %v5766_v40 }
 0x101   : > { %4965 = vmatmul.mubr.msk.f32.gmra.mrb[22].mxu1 %vm267_vm1, %v6082_v57  ;;  %5191 = vmatmul.mubr.msk.f32.gmra.mrb[6].mxu0 %vm267_vm1, %v5780_v42 }
 0x102   : > { %4967 = vmatprep.mubr.msk.f32.mxu1 %vm267_vm1, %v6085_v51  ;;  %5193 = vmatprep.mubr.msk.f32.mxu0 %vm267_vm1, %v5786_v44  ;;  %v6481_v51 = vld [vmem:[%s6633_s2] ss:$0 sm:$0xff] }
 0x105   : > { %4968 = vmatmul.mubr.msk.f32.gmra.mrb[24].mxu1 %vm267_vm1, %v6096_v47  ;;  %5194 = vmatmul.mubr.msk.f32.gmra.mrb[8].mxu0 %vm267_vm1, %v5800_v46 }
 0x106   : > { %4970 = vmatprep.mubr.msk.f32.mxu1 %vm267_vm1, %v6099_v43  ;;  %5196 = vmatprep.mubr.msk.f32.mxu0 %vm267_vm1, %v5806_v48 }
 0x109   : > { %4971 = vmatmul.mubr.msk.f32.gmra.mrb[26].mxu1 %vm267_vm1, %v6110_v39  ;;  %5197 = vmatmul.mubr.msk.f32.gmra.mrb[10].mxu0 %vm267_vm1, %v5820_v50 }
 0x10a   : > { %4973 = vmatprep.mubr.msk.f32.mxu1 %vm267_vm1, %v6113_v35  ;;  %5199 = vmatprep.mubr.msk.f32.mxu0 %vm267_vm1, %v5826_v52 }
 0x10d   : > { %4974 = vmatmul.mubr.msk.f32.gmra.mrb[28].mxu1 %vm267_vm1, %v6124_v62  ;;  %5200 = vmatmul.mubr.msk.f32.gmra.mrb[12].mxu0 %vm267_vm1, %v5840_v54 }
 0x10e   : > { %4976 = vmatprep.mubr.msk.f32.mxu1 %vm267_vm1, %v6179_v24  ;;  %5202 = vmatprep.mubr.msk.f32.mxu0 %vm267_vm1, %v5844_v56 }
 0x111   : > { %4977 = vmatmul.mubr.msk.f32.gmra.mrb[30].mxu1 %vm267_vm1, %v6190_v25  ;;  %5203 = vmatmul.mubr.msk.f32.gmra.mrb[14].mxu0 %vm267_vm1, %v5855_v58  ;;  %v6486_v58 = vld [vmem:[%s6634_s3] ss:$0 sm:$0xff] }
 0x112   : > { %5005 = vmatprep.mubr.msk.f32.mxu1 %vm267_vm1, %v5695_v26  ;;  %5205 = vmatprep.mubr.msk.f32.mxu0 %vm267_vm1, %v5861_v60  ;;  %v6741_v26 = vld [vmem:[#allocation27_spill] sm:$0xff] }
 0x115   : > { %5006 = vmatmul.mubr.msk.f32.vlgmr.msra.gmra.mrb[16].mxu1 %vm267_vm1, %v6713_v11  ;;  %5206 = vmatmul.mubr.msk.f32.gmra.mrb[16].mxu0 %vm267_vm1, %v5879_v63 }
 0x116   : > { %5008 = vmatprep.mubr.msk.f32.mxu1 %vm267_vm1, %v6715_v13  ;;  %5208 = vmatprep.mubr.msk.f32.mxu0 %vm267_vm1, %v5887_v2 }
 0x119   : > { %5009 = vmatmul.mubr.msk.f32.gmra.mrb[18].mxu1 %vm267_vm1, %v6717_v15  ;;  %5209 = vmatmul.mubr.msk.f32.gmra.mrb[18].mxu0 %vm267_vm1, %v5903_v4 }
 0x11a   : > { %5011 = vmatprep.mubr.msk.f32.mxu1 %vm267_vm1, %v6719_v17  ;;  %5211 = vmatprep.mubr.msk.f32.mxu0 %vm267_vm1, %v5909_v6 }
 0x11d   : > { %5012 = vmatmul.mubr.msk.f32.gmra.mrb[20].mxu1 %vm267_vm1, %v6721_v19  ;;  %5212 = vmatmul.mubr.msk.f32.gmra.mrb[20].mxu0 %vm267_vm1, %v5923_v9 }
 0x11e   : > { %5014 = vmatprep.mubr.msk.f32.mxu1 %vm267_vm1, %v6723_v21  ;;  %5214 = vmatprep.mubr.msk.f32.mxu0 %vm267_vm1, %v5929_v55 }
 0x121   : > { %5015 = vmatmul.mubr.msk.f32.gmra.mrb[22].mxu1 %vm267_vm1, %v6725_v22  ;;  %5215 = vmatmul.mubr.msk.f32.gmra.mrb[22].mxu0 %vm267_vm1, %v5943_v53 }
 0x122   : > { %5017 = vmatprep.mubr.msk.f32.mxu1 %vm267_vm1, %v6727_v37  ;;  %5217 = vmatprep.mubr.msk.f32.mxu0 %vm267_vm1, %v5949_v49 }
 0x125   : > { %5018 = vmatmul.mubr.msk.f32.gmra.mrb[24].mxu1 %vm267_vm1, %v6729_v33  ;;  %5218 = vmatmul.mubr.msk.f32.gmra.mrb[24].mxu0 %vm267_vm1, %v5963_v45 }
 0x126   : > { %5020 = vmatprep.mubr.msk.f32.mxu1 %vm267_vm1, %v6731_v12  ;;  %5220 = vmatprep.mubr.msk.f32.mxu0 %vm267_vm1, %v5969_v41 }
 0x129   : > { %5021 = vmatmul.mubr.msk.f32.gmra.mrb[26].mxu1 %vm267_vm1, %v6733_v16  ;;  %5221 = vmatmul.mubr.msk.f32.gmra.mrb[26].mxu0 %vm267_vm1, %v6741_v26 }
 0x12a   : > { %5023 = vmatprep.mubr.msk.f32.mxu1 %vm267_vm1, %v6735_v20  ;;  %5223 = vmatprep.mubr.msk.f32.mxu0 %vm267_vm1, %v6742_v27 }
 0x12d   : > { %5024 = vmatmul.mubr.msk.f32.gmra.mrb[28].mxu1 %vm267_vm1, %v6743_v30  ;;  %5224 = vmatmul.mubr.msk.f32.gmra.mrb[28].mxu0 %vm267_vm1, %v6744_v31 }
 0x12e   : > { %5026 = vmatprep.mubr.msk.f32.mxu1 %vm267_vm1, %v6317_v1  ;;  %5226 = vmatprep.mubr.msk.f32.mxu0 %vm267_vm1, %v4441_v29 }
 0x131   : > { %5027 = vmatmul.mubr.msk.f32.gmra.mrb[30].mxu1 %vm267_vm1, %v6328_v14  ;;  %5227 = vmatmul.mubr.msk.f32.gmra.mrb[30].mxu0 %vm267_vm1, %v4442_v32 }
 0x1a8   : > { %v4933_v34 = vpop.f32.mrb[0].mxu1 }
 0x1a9   : > { %v1507_v35 = vpop.f32.mrb[1].mxu1 }
 0x1ac   : > { %v4936_v36 = vpop.f32.mrb[2].mxu1 }
 0x1ad   : > { %v1517_v38 = vpop.f32.mrb[3].mxu1 }
 0x1b0   : > { %v4939_v39 = vpop.f32.mrb[4].mxu1 }
 0x1b1   : > { %v1527_v40 = vpop.f32.mrb[5].mxu1 }
 0x1b4   : > { %v4942_v41 = vpop.f32.mrb[6].mxu1 }
 0x1b5   : > { %v1537_v42 = vpop.f32.mrb[7].mxu1 }
 0x1b8   : > { %v4945_v43 = vpop.f32.mrb[8].mxu1 }
 0x1b9   : > { %v1547_v44 = vpop.f32.mrb[9].mxu1 }
 0x1bc   : > { %v4948_v45 = vpop.f32.mrb[10].mxu1 }
 0x1bd   : > { %v1557_v46 = vpop.f32.mrb[11].mxu1 }
 0x1c0   : > { %v6470_v47 = vpop.f32.mrb[12].mxu1 }
 0x1c1   : > { %v6472_v48 = vpop.f32.mrb[13].mxu1 }
 0x1c4   : > { %v6474_v49 = vpop.f32.mrb[14].mxu1 }
 0x1c5   : > { %v6476_v50 = vpop.f32.mrb[15].mxu1 }
 0x1c8   : > { %v5183_v52 = vpop.f32.mrb[0].mxu0 }
 0x1c9   : > { %v5231_v53 = vadd.f32 %v5183_v52, %v4933_v34  ;;  %v3458_v54 = vpop.f32.mrb[1].mxu0 }
 0x1ca   : > { %v5232_v56 = vadd.f32 %v3458_v54, %v1507_v35 }
 0x1cb   : > { %v3656_v59 = vmul.f32 %v5231_v53, %v6481_v51 }
 0x1cc   : > { %v3655_v60 = vmul.f32 %v5232_v56, %v6481_v51  ;;  %v5186_v62 = vpop.f32.mrb[2].mxu0 }
 0x1cd   : > { %v5233_v63 = vadd.f32 %v5186_v62, %v4936_v36  ;;  %v3468_v0 = vpop.f32.mrb[3].mxu0  ;;  %v3694_v2 = vadd.f32 %v6486_v58, %v3656_v59 }
 0x1ce   : > { %v5234_v4 = vadd.f32 %v3468_v0, %v1517_v38  ;;  %v3693_v5 = vadd.f32 %v6486_v58, %v3655_v60 }
 0x1cf   : > { %v3658_v10 = vmul.f32 %v5233_v63, %v6481_v51  ;;  %v3758_v8 = vmul.f32 0.1, %v3694_v2  ;;  %vm3726_vm3 = vcmp.ge.f32.partialorder %v3694_v2, 0.0 }
 0x1d0   : > { %v3657_v6 = vmul.f32 %v5234_v4, %v6481_v51  ;;  %v5189_v7 = vpop.f32.mrb[4].mxu0  ;;  %vm3725_vm2 = vcmp.ge.f32.partialorder %v3693_v5, 0.0  ;;  %v3757_v9 = vmul.f32 0.1, %v3693_v5 }
 0x1d1   : > { %v5235_v55 = vadd.f32 %v5189_v7, %v4939_v39  ;;  %v3478_v57 = vpop.f32.mrb[5].mxu0  ;;  %v3696_v13 = vadd.f32 %v6486_v58, %v3658_v10  ;;  %v3790_v22 = vsel %vm3726_vm3, %v3694_v2, %v3758_v8 }
 0x1d2   : > { %v3695_v28 = vadd.f32 %v6486_v58, %v3657_v6  ;;  %v5236_v24 = vadd.f32 %v3478_v57, %v1527_v40  ;;  %v3789_v25 = vsel %vm3725_vm2, %v3693_v5, %v3757_v9 }
 0x1d3   : > { %3821 = vxpose.xlu0.b32.start [1/16] %v3789_v25, 128  ;;  %v3660_v12 = vmul.f32 %v5235_v55, %v6481_v51  ;;  %v3760_v14 = vmul.f32 0.1, %v3696_v13  ;;  %vm3728_vm5 = vcmp.ge.f32.partialorder %v3696_v13, 0.0 }
 0x1d4   : > { %v5192_v11 = vpop.f32.mrb[6].mxu0  ;;  %v3659_v19 = vmul.f32 %v5236_v24, %v6481_v51  ;;  %v3759_v37 = vmul.f32 0.1, %v3695_v28  ;;  %vm3727_vm4 = vcmp.ge.f32.partialorder %v3695_v28, 0.0 }
 0x1d5   : > { %v5237_v15 = vadd.f32 %v5192_v11, %v4942_v41  ;;  %v3488_v17 = vpop.f32.mrb[7].mxu0  ;;  %v3698_v23 = vadd.f32 %v6486_v58, %v3660_v12  ;;  %v3792_v31 = vsel %vm3728_vm5, %v3696_v13, %v3760_v14 }
 0x1d6   : > { %v5238_v21 = vadd.f32 %v3488_v17, %v1537_v42  ;;  %v3697_v1 = vadd.f32 %v6486_v58, %v3659_v19  ;;  %v3791_v61 = vsel %vm3727_vm4, %v3695_v28, %v3759_v37 }
 0x1d7   : > { %3822 = vxpose.xlu0.b32.cont [2/16] %v3790_v22, 128  ;;  %v3662_v35 = vmul.f32 %v5237_v15, %v6481_v51  ;;  %v3762_v42 = vmul.f32 0.1, %v3698_v23  ;;  %vm3730_vm7 = vcmp.ge.f32.partialorder %v3698_v23, 0.0 }
 0x1d8   : > { %v5195_v33 = vpop.f32.mrb[8].mxu0  ;;  %v3661_v29 = vmul.f32 %v5238_v21, %v6481_v51  ;;  %v3761_v32 = vmul.f32 0.1, %v3697_v1  ;;  %vm3729_vm6 = vcmp.ge.f32.partialorder %v3697_v1, 0.0 }
 0x1d9   : > { %v5239_v16 = vadd.f32 %v5195_v33, %v4945_v43  ;;  %v3498_v20 = vpop.f32.mrb[9].mxu0  ;;  %v3794_v53 = vsel %vm3730_vm7, %v3698_v23, %v3762_v42 }
 0x1da   : > { %v5240_v3 = vadd.f32 %v3498_v20, %v1547_v44  ;;  %v3699_v39 = vadd.f32 %v6486_v58, %v3661_v29  ;;  %v3793_v41 = vsel %vm3729_vm6, %v3697_v1, %v3761_v32  ;;  %v3700_v44 = vadd.f32 %v6486_v58, %v3662_v35 }
 0x1db   : > { %3823 = vxpose.xlu0.b32.cont [3/16] %v3791_v61, 128 }
 0x1dc   : > { %v5198_v18 = vpop.f32.mrb[10].mxu0  ;;  %v3763_v54 = vmul.f32 0.1, %v3699_v39  ;;  %vm3731_vm8 = vcmp.ge.f32.partialorder %v3699_v39, 0.0  ;;  %v3764_v2 = vmul.f32 0.1, %v3700_v44 }
 0x1dd   : > { %v5241_v26 = vadd.f32 %v5198_v18, %v4948_v45  ;;  %v3508_v27 = vpop.f32.mrb[11].mxu0  ;;  %v3663_v45 = vmul.f32 %v5240_v3, %v6481_v51  ;;  %vm3732_vm9 = vcmp.ge.f32.partialorder %v3700_v44, 0.0 }
 0x1de   : > { %v5242_v30 = vadd.f32 %v3508_v27, %v1557_v46  ;;  %v3795_v4 = vsel %vm3731_vm8, %v3699_v39, %v3763_v54  ;;  %v3796_v24 = vsel %vm3732_vm9, %v3700_v44, %v3764_v2 }
 0x1df   : > { %3824 = vxpose.xlu0.b32.cont [4/16] %v3792_v31, 128  ;;  %v3701_v60 = vadd.f32 %v6486_v58, %v3663_v45  ;;  %v3666_v15 = vmul.f32 %v5241_v26, %v6481_v51 }
 0x1e0   : > { %v5201_v34 = vpop.f32.mrb[12].mxu0  ;;  %v3665_v10 = vmul.f32 %v5242_v30, %v6481_v51 }
 0x1e1   : > { %v6503_v36 = vadd.f32 %v5201_v34, %v6470_v47  ;;  %v3518_v38 = vpop.f32.mrb[13].mxu0  ;;  %v3765_v25 = vmul.f32 0.1, %v3701_v60  ;;  %vm3733_vm10 = vcmp.ge.f32.partialorder %v3701_v60, 0.0  ;;  %v3704_v26 = vadd.f32 %v6486_v58, %v3666_v15 }
 0x1e2   : > { %v6507_v40 = vadd.f32 %v3518_v38, %v6472_v48  ;;  %v3664_v48 = vmul.f32 %v5239_v16, %v6481_v51  ;;  %v3703_v33 = vadd.f32 %v6486_v58, %v3665_v10 }
 0x1e3   : > { %3825 = vxpose.xlu0.b32.cont [5/16] %v3793_v41, 128  ;;  %v3797_v3 = vsel %vm3733_vm10, %v3701_v60, %v3765_v25  ;;  %v3668_v45 = vmul.f32 %v6503_v36, %v6481_v51  ;;  %vm3736_vm0 = vcmp.ge.f32.partialorder %v3704_v26, 0.0 }
 0x1e4   : > { %v5204_v43 = vpop.f32.mrb[14].mxu0  ;;  %v3667_v27 = vmul.f32 %v6507_v40, %v6481_v51  ;;  %vm3735_vm14 = vcmp.ge.f32.partialorder %v3703_v33, 0.0  ;;  %v3767_v39 = vmul.f32 0.1, %v3703_v33  ;;  %v3768_v40 = vmul.f32 0.1, %v3704_v26 }
 0x1e5   : > { %v6512_v46 = vadd.f32 %v5204_v43, %v6474_v49  ;;  %v3528_v47 = vpop.f32.mrb[15].mxu0 }
 0x1e6   : > { %v6515_v52 = vadd.f32 %v3528_v47, %v6476_v50  ;;  %v3702_v50 = vadd.f32 %v6486_v58, %v3664_v48  ;;  %v3705_v47 = vadd.f32 %v6486_v58, %v3667_v27 }
 0x1e7   : > { %3826 = vxpose.xlu0.b32.cont [6/16] %v3794_v53, 128 }
 0x1e8   : > { %v5007_v56 = vpop.f32.mrb[16].mxu1  ;;  %v5207_v59 = vpop.f32.mrb[16].mxu0  ;;  %v3766_v17 = vmul.f32 0.1, %v3702_v50  ;;  %vm3734_vm12 = vcmp.ge.f32.partialorder %v3702_v50, 0.0  ;;  %vm3737_vm2 = vcmp.ge.f32.partialorder %v3705_v47, 0.0 }
 0x1e9   : > { %v5247_v62 = vadd.f32 %v5207_v59, %v5007_v56  ;;  %v1977_v63 = vpop.f32.mrb[17].mxu1  ;;  %v3538_v0 = vpop.f32.mrb[17].mxu0  ;;  %v3769_v10 = vmul.f32 0.1, %v3705_v47 }
 0x1ea   : > { %v5248_v49 = vadd.f32 %v3538_v0, %v1977_v63  ;;  %v3798_v31 = vsel %vm3734_vm12, %v3702_v50, %v3766_v17  ;;  %v3800_v50 = vsel %vm3736_vm0, %v3704_v26, %v3768_v40  ;;  %v3670_v17 = vmul.f32 %v6512_v46, %v6481_v51 }
 0x1eb   : > { %v3672_v5 = vmul.f32 %v5247_v62, %v6481_v51  ;;  %3827 = vxpose.xlu0.b32.cont [7/16] %v3795_v4, 128  ;;  %v3799_v62 = vsel %vm3735_vm14, %v3703_v33, %v3767_v39 }
 0x1ec   : > { %v3671_v6 = vmul.f32 %v5248_v49, %v6481_v51  ;;  %v5010_v7 = vpop.f32.mrb[18].mxu1  ;;  %v5210_v9 = vpop.f32.mrb[18].mxu0  ;;  %v3706_v49 = vadd.f32 %v6486_v58, %v3668_v45 }
 0x1ed   : > { %v5249_v55 = vadd.f32 %v5210_v9, %v5010_v7  ;;  %v1987_v57 = vpop.f32.mrb[19].mxu1  ;;  %v3548_v28 = vpop.f32.mrb[19].mxu0  ;;  %v3710_v8 = vadd.f32 %v6486_v58, %v3672_v5  ;;  %v3669_v5 = vmul.f32 %v6515_v52, %v6481_v51 }
 0x1ee   : > { %v5250_v11 = vadd.f32 %v3548_v28, %v1987_v57  ;;  %v3709_v13 = vadd.f32 %v6486_v58, %v3671_v6  ;;  %vm3738_vm4 = vcmp.ge.f32.partialorder %v3706_v49, 0.0 }
 0x1ef   : > { %3828 = vxpose.xlu0.b32.cont [8/16] %v3796_v24, 128  ;;  %v3674_v12 = vmul.f32 %v5249_v55, %v6481_v51  ;;  %v3774_v23 = vmul.f32 0.1, %v3710_v8  ;;  %vm3742_vm13 = vcmp.ge.f32.partialorder %v3710_v8, 0.0 }
 0x1f0   : > { %v3673_v19 = vmul.f32 %v5250_v11, %v6481_v51  ;;  %v5013_v21 = vpop.f32.mrb[20].mxu1  ;;  %v5213_v22 = vpop.f32.mrb[20].mxu0  ;;  %vm3741_vm11 = vcmp.ge.f32.partialorder %v3709_v13, 0.0  ;;  %v3773_v37 = vmul.f32 0.1, %v3709_v13 }
 0x1f1   : > { %v5251_v16 = vadd.f32 %v5213_v22, %v5013_v21  ;;  %v1997_v20 = vpop.f32.mrb[21].mxu1  ;;  %v3558_v1 = vpop.f32.mrb[21].mxu0  ;;  %v3712_v32 = vadd.f32 %v6486_v58, %v3674_v12  ;;  %v3806_v43 = vsel %vm3742_vm13, %v3710_v8, %v3774_v23  ;;  %v3707_v21 = vadd.f32 %v6486_v58, %v3669_v5 }
 0x1f2   : > { %v3711_v61 = vadd.f32 %v6486_v58, %v3673_v19  ;;  %v5252_v14 = vadd.f32 %v3558_v1, %v1997_v20  ;;  %v3805_v18 = vsel %vm3741_vm11, %v3709_v13, %v3773_v37  ;;  %v3801_v12 = vsel %vm3737_vm2, %v3705_v47, %v3769_v10 }
 0x1f3   : > { %3829 = vxpose.xlu0.b32.cont [9/16] %v3797_v3, 128  ;;  %3853 = vxpose.xlu1.b32.start [1/16] %v3805_v18, 128  ;;  %v3676_v48 = vmul.f32 %v5251_v16, %v6481_v51  ;;  %v3776_v63 = vmul.f32 0.1, %v3712_v32  ;;  %vm3744_vm1 = vcmp.ge.f32.partialorder %v3712_v32, 0.0  ;;  %v3770_v16 = vmul.f32 0.1, %v3706_v49 }
 0x1f4   : > { %v5016_v29 = vpop.f32.mrb[22].mxu1  ;;  %v5216_v30 = vpop.f32.mrb[22].mxu0  ;;  %v3675_v41 = vmul.f32 %v5252_v14, %v6481_v51  ;;  %v3775_v44 = vmul.f32 0.1, %v3711_v61  ;;  %vm3743_vm15 = vcmp.ge.f32.partialorder %v3711_v61, 0.0  ;;  %vm3739_vm6 = vcmp.ge.f32.partialorder %v3707_v21, 0.0 }
 0x1f5   : > { %v5253_v34 = vadd.f32 %v5216_v30, %v5016_v29  ;;  %v2007_v35 = vpop.f32.mrb[23].mxu1  ;;  %v3568_v38 = vpop.f32.mrb[23].mxu0  ;;  %v3714_v55 = vadd.f32 %v6486_v58, %v3676_v48  ;;  %v3808_v8 = vsel %vm3744_vm1, %v3712_v32, %v3776_v63  ;;  %v3708_v30 = vadd.f32 %v6486_v58, %v3670_v17 }
 0x1f6   : > { %v5254_v42 = vadd.f32 %v3568_v38, %v2007_v35  ;;  %v3713_v0 = vadd.f32 %v6486_v58, %v3675_v41  ;;  %v3807_v2 = vsel %vm3743_vm15, %v3711_v61, %v3775_v44  ;;  %v3802_v35 = vsel %vm3738_vm4, %v3706_v49, %v3770_v16 }
 0x1f7   : > { %3830 = vxpose.xlu0.b32.cont [10/16] %v3798_v31, 128  ;;  %3854 = vxpose.xlu1.b32.cont [2/16] %v3806_v43, 128  ;;  %v3678_v20 = vmul.f32 %v5253_v34, %v6481_v51  ;;  %v3778_v14 = vmul.f32 0.1, %v3714_v55  ;;  %vm3746_vm5 = vcmp.ge.f32.partialorder %v3714_v55, 0.0  ;;  %v3771_v44 = vmul.f32 0.1, %v3707_v21 }
 0x1f8   : > { %v5019_v53 = vpop.f32.mrb[24].mxu1  ;;  %v5219_v54 = vpop.f32.mrb[24].mxu0  ;;  %v3677_v11 = vmul.f32 %v5254_v42, %v6481_v51  ;;  %v3777_v15 = vmul.f32 0.1, %v3713_v0  ;;  %vm3745_vm3 = vcmp.ge.f32.partialorder %v3713_v0, 0.0  ;;  %vm3740_vm8 = vcmp.ge.f32.partialorder %v3708_v30, 0.0 }
 0x1f9   : > { %v5255_v56 = vadd.f32 %v5219_v54, %v5019_v53  ;;  %v2017_v59 = vpop.f32.mrb[25].mxu1  ;;  %v3578_v60 = vpop.f32.mrb[25].mxu0  ;;  %v3716_v38 = vadd.f32 %v6486_v58, %v3678_v20  ;;  %v3810_v47 = vsel %vm3746_vm5, %v3714_v55, %v3778_v14 }
 0x1fa   : > { %v5256_v36 = vadd.f32 %v3578_v60, %v2017_v59  ;;  %v3715_v18 = vadd.f32 %v6486_v58, %v3677_v11  ;;  %v3809_v27 = vsel %vm3745_vm3, %v3713_v0, %v3777_v15  ;;  %v3772_v59 = vmul.f32 0.1, %v3708_v30 }
 0x1fb   : > { %v3680_v4 = vmul.f32 %v5255_v56, %v6481_v51  ;;  %3831 = vxpose.xlu0.b32.cont [11/16] %v3799_v62, 128  ;;  %3855 = vxpose.xlu1.b32.cont [3/16] %v3807_v2, 128  ;;  %v3803_v62 = vsel %vm3739_vm6, %v3707_v21, %v3771_v44  ;;  %v3780_v0 = vmul.f32 0.1, %v3716_v38  ;;  %vm3748_vm9 = vcmp.ge.f32.partialorder %v3716_v38, 0.0 }
 0x1fc   : > { %v3679_v6 = vmul.f32 %v5256_v36, %v6481_v51  ;;  %v5022_v7 = vpop.f32.mrb[26].mxu1  ;;  %v5222_v9 = vpop.f32.mrb[26].mxu0  ;;  %v3779_v53 = vmul.f32 0.1, %v3715_v18  ;;  %vm3747_vm7 = vcmp.ge.f32.partialorder %v3715_v18, 0.0  ;;  %v3804_v36 = vsel %vm3740_vm8, %v3708_v30, %v3772_v59 }
 0x1fd   : > { %v6550_v57 = vadd.f32 %v6486_v58, %v3680_v4  ;;  %v5257_v28 = vadd.f32 %v5222_v9, %v5022_v7  ;;  %v2027_v24 = vpop.f32.mrb[27].mxu1  ;;  %v3588_v25 = vpop.f32.mrb[27].mxu0  ;;  %v3812_v2 = vsel %vm3748_vm9, %v3716_v38, %v3780_v0 }
 0x1fe   : > { %v6555_v52 = vadd.f32 %v6486_v58, %v3679_v6  ;;  %v5258_v13 = vadd.f32 %v3588_v25, %v2027_v24  ;;  %v3811_v63 = vsel %vm3747_vm7, %v3715_v18, %v3779_v53 }
 0x1ff   : > { %v3682_v19 = vmul.f32 %v5257_v28, %v6481_v51  ;;  %3832 = vxpose.xlu0.b32.cont [12/16] %v3800_v50, 128  ;;  %3856 = vxpose.xlu1.b32.cont [4/16] %v3808_v8, 128  ;;  %v3782_v4 = vmul.f32 0.1, %v6550_v57  ;;  %vm3750_vm11 = vcmp.ge.f32.partialorder %v6550_v57, 0.0 }
 0x200   : > { %v3681_v22 = vmul.f32 %v5258_v13, %v6481_v51  ;;  %v5025_v37 = vpop.f32.mrb[28].mxu1  ;;  %v5225_v33 = vpop.f32.mrb[28].mxu0  ;;  %v3781_v49 = vmul.f32 0.1, %v6555_v52  ;;  %vm3749_vm10 = vcmp.ge.f32.partialorder %v6555_v52, 0.0 }
 0x201   : > { %v6565_v1 = vadd.f32 %v6486_v58, %v3682_v19  ;;  %v5259_v46 = vadd.f32 %v5225_v33, %v5025_v37  ;;  %v2037_v3 = vpop.f32.mrb[29].mxu1  ;;  %v3598_v61 = vpop.f32.mrb[29].mxu0 }
 0x202   : > { %v3719_v23 = vadd.f32 %v6486_v58, %v3681_v22  ;;  %v5260_v26 = vadd.f32 %v3598_v61, %v2037_v3 }
 0x203   : > { %v3684_v29 = vmul.f32 %v5259_v46, %v6481_v51  ;;  %3833 = vxpose.xlu0.b32.cont [13/16] %v3801_v12, 128  ;;  %3857 = vxpose.xlu1.b32.cont [5/16] %v3809_v27, 128  ;;  %v3784_v6 = vmul.f32 0.1, %v6565_v1  ;;  %vm3752_vm13 = vcmp.ge.f32.partialorder %v6565_v1, 0.0 }
 0x204   : > { %v3683_v31 = vmul.f32 %v5260_v26, %v6481_v51  ;;  %v5028_v32 = vpop.f32.mrb[30].mxu1  ;;  %v5228_v34 = vpop.f32.mrb[30].mxu0  ;;  %v3783_v50 = vmul.f32 0.1, %v3719_v23  ;;  %vm3751_vm12 = vcmp.ge.f32.partialorder %v3719_v23, 0.0 }
 0x205   : > { %v3722_v39 = vadd.f32 %v6486_v58, %v3684_v29  ;;  %v5261_v41 = vadd.f32 %v5228_v34, %v5028_v32  ;;  %v2047_v42 = vpop.f32.mrb[31].mxu1  ;;  %v3608_v43 = vpop.f32.mrb[31].mxu0  ;;  %v3816_v7 = vsel %vm3752_vm13, %v6565_v1, %v3784_v6 }
 0x206   : > { %v3721_v45 = vadd.f32 %v6486_v58, %v3683_v31  ;;  %v5262_v40 = vadd.f32 %v3608_v43, %v2047_v42  ;;  %v3815_v5 = vsel %vm3751_vm12, %v3719_v23, %v3783_v50 }
 0x207   : > { %v3686_v54 = vmul.f32 %v5261_v41, %v6481_v51  ;;  %3834 = vxpose.xlu0.b32.cont [14/16] %v3802_v35, 128  ;;  %3858 = vxpose.xlu1.b32.cont [6/16] %v3810_v47, 128  ;;  %v3786_v55 = vmul.f32 0.1, %v3722_v39  ;;  %vm3754_vm15 = vcmp.ge.f32.partialorder %v3722_v39, 0.0 }
 0x208   : > { %v3685_v48 = vmul.f32 %v5262_v40, %v6481_v51  ;;  %v3813_v51 = vsel %vm3749_vm10, %v6555_v52, %v3781_v49  ;;  %v3785_v9 = vmul.f32 0.1, %v3721_v45  ;;  %vm3753_vm14 = vcmp.ge.f32.partialorder %v3721_v45, 0.0 }
 0x209   : > { %v3724_v56 = vadd.f32 %v6486_v58, %v3686_v54 }
 0x20a   : > { %v3723_v60 = vadd.f32 %v6486_v58, %v3685_v48  ;;  %v3814_v58 = vsel %vm3750_vm11, %v6550_v57, %v3782_v4  ;;  %v3817_v10 = vsel %vm3753_vm14, %v3721_v45, %v3785_v9  ;;  %v3818_v57 = vsel %vm3754_vm15, %v3722_v39, %v3786_v55 }
 0x20b   : > { %3835 = vxpose.xlu0.b32.cont [15/16] %v3803_v62, 128  ;;  %3859 = vxpose.xlu1.b32.cont [7/16] %v3811_v63, 128  ;;  %v3788_v25 = vmul.f32 0.1, %v3724_v56  ;;  %vm3756_vm1 = vcmp.ge.f32.partialorder %v3724_v56, 0.0 }
 0x20c   : > { %v3787_v28 = vmul.f32 0.1, %v3723_v60  ;;  %vm3755_vm0 = vcmp.ge.f32.partialorder %v3723_v60, 0.0 }
 0x20d   : > { %v3820_v8 = vsel %vm3756_vm1, %v3724_v56, %v3788_v25 }
 0x20e   : > { %v3819_v24 = vsel %vm3755_vm0, %v3723_v60, %v3787_v28 }
 0x20f   : > { %3836 = vxpose.xlu0.b32.end [16/16] %v3804_v36, 128  ;;  %3860 = vxpose.xlu1.b32.cont [8/16] %v3812_v2, 128 }
 0x213   : > { %3861 = vxpose.xlu1.b32.cont [9/16] %v3813_v51, 128 }
 0x217   : > { %3862 = vxpose.xlu1.b32.cont [10/16] %v3814_v58, 128 }
 0x21b   : > { %3863 = vxpose.xlu1.b32.cont [11/16] %v3815_v5, 128 }
 0x21f   : > { %3864 = vxpose.xlu1.b32.cont [12/16] %v3816_v7, 128 }
 0x223   : > { %3865 = vxpose.xlu1.b32.cont [13/16] %v3817_v10, 128 }
 0x227   : > { %3866 = vxpose.xlu1.b32.cont [14/16] %v3818_v57, 128 }
 0x22b   : > { %3867 = vxpose.xlu1.b32.cont [15/16] %v3819_v24, 128 }
 0x22f   : > { %3868 = vxpose.xlu1.b32.end [16/16] %v3820_v8, 128 }
 0x253   : > { %v3837_v11 = vpop.trf.xlu0 }
 0x254   : > { %3885 = vst [vmem:[%s6594_s22] sm:$0xff] %v3837_v11 }
 0x257   : > { %v3838_v52 = vpop.trf.xlu0 }
 0x258   : > { %3887 = vst [vmem:[%s6594_s22 + $0x10] sm:$0xff] %v3838_v52 }
 0x25b   : > { %v3839_v13 = vpop.trf.xlu0 }
 0x25c   : > { %3889 = vst [vmem:[%s6594_s22 + $0x20] sm:$0xff] %v3839_v13 }
 0x25f   : > { %v3840_v15 = vpop.trf.xlu0 }
 0x260   : > { %3891 = vst [vmem:[%s6594_s22 + $0x30] sm:$0xff] %v3840_v15 }
 0x263   : > { %v3841_v17 = vpop.trf.xlu0 }
 0x264   : > { %3893 = vst [vmem:[%s6594_s22 + $0x40] sm:$0xff] %v3841_v17 }
 0x267   : > { %v3842_v19 = vpop.trf.xlu0 }
 0x268   : > { %3895 = vst [vmem:[%s6594_s22 + $0x50] sm:$0xff] %v3842_v19 }
 0x26b   : > { %v3843_v21 = vpop.trf.xlu0 }
 0x26c   : > { %3897 = vst [vmem:[%s6594_s22 + $0x60] sm:$0xff] %v3843_v21 }
 0x26f   : > { %v3844_v22 = vpop.trf.xlu0 }
 0x270   : > { %3899 = vst [vmem:[%s6594_s22 + $0x70] sm:$0xff] %v3844_v22 }
 0x273   : > { %v3869_v37 = vpop.trf.xlu1  ;;  %v3845_v33 = vpop.trf.xlu0 }
 0x274   : > { %3886 = vst [vmem:[%s6594_s22 + $0x8] sm:$0xff] %v3869_v37  ;;  %3901 = vst [vmem:[%s6594_s22 + $0x80] sm:$0xff] %v3845_v33 }
 0x277   : > { %v3870_v12 = vpop.trf.xlu1  ;;  %v3846_v16 = vpop.trf.xlu0 }
 0x278   : > { %3888 = vst [vmem:[%s6594_s22 + $0x18] sm:$0xff] %v3870_v12  ;;  %3903 = vst [vmem:[%s6594_s22 + $0x90] sm:$0xff] %v3846_v16 }
 0x27b   : > { %v3871_v20 = vpop.trf.xlu1  ;;  %v3847_v1 = vpop.trf.xlu0 }
 0x27c   : > { %3890 = vst [vmem:[%s6594_s22 + $0x28] sm:$0xff] %v3871_v20  ;;  %3905 = vst [vmem:[%s6594_s22 + $0xa0] sm:$0xff] %v3847_v1 }
 0x27f   : > { %v3872_v46 = vpop.trf.xlu1  ;;  %v3848_v3 = vpop.trf.xlu0 }
 0x280   : > { %3892 = vst [vmem:[%s6594_s22 + $0x38] sm:$0xff] %v3872_v46  ;;  %3907 = vst [vmem:[%s6594_s22 + $0xb0] sm:$0xff] %v3848_v3 }
 0x283   : > { %v3873_v61 = vpop.trf.xlu1  ;;  %v3849_v14 = vpop.trf.xlu0 }
 0x284   : > { %3894 = vst [vmem:[%s6594_s22 + $0x48] sm:$0xff] %v3873_v61  ;;  %3909 = vst [vmem:[%s6594_s22 + $0xc0] sm:$0xff] %v3849_v14 }
 0x287   : > { %v3874_v18 = vpop.trf.xlu1  ;;  %v3850_v23 = vpop.trf.xlu0 }
 0x288   : > { %3896 = vst [vmem:[%s6594_s22 + $0x58] sm:$0xff] %v3874_v18  ;;  %3911 = vst [vmem:[%s6594_s22 + $0xd0] sm:$0xff] %v3850_v23 }
 0x28b   : > { %v3875_v26 = vpop.trf.xlu1  ;;  %v3851_v27 = vpop.trf.xlu0 }
 0x28c   : > { %3898 = vst [vmem:[%s6594_s22 + $0x68] sm:$0xff] %v3875_v26  ;;  %3913 = vst [vmem:[%s6594_s22 + $0xe0] sm:$0xff] %v3851_v27 }
 0x28f   : > { %v3876_v29 = vpop.trf.xlu1  ;;  %v3852_v30 = vpop.trf.xlu0 }
 0x290   : > { %3900 = vst [vmem:[%s6594_s22 + $0x78] sm:$0xff] %v3876_v29  ;;  %3915 = vst [vmem:[%s6594_s22 + $0xf0] sm:$0xff] %v3852_v30 }
 0x293   : > { %v3877_v31 = vpop.trf.xlu1 }
 0x294   : > { %3902 = vst [vmem:[%s6594_s22 + $0x88] sm:$0xff] %v3877_v31 }
 0x297   : > { %v3878_v32 = vpop.trf.xlu1 }
 0x298   : > { %3904 = vst [vmem:[%s6594_s22 + $0x98] sm:$0xff] %v3878_v32 }
 0x29b   : > { %v3879_v34 = vpop.trf.xlu1 }
 0x29c   : > { %3906 = vst [vmem:[%s6594_s22 + $0xa8] sm:$0xff] %v3879_v34 }
 0x29f   : > { %v3880_v35 = vpop.trf.xlu1 }
 0x2a0   : > { %3908 = vst [vmem:[%s6594_s22 + $0xb8] sm:$0xff] %v3880_v35 }
 0x2a3   : > { %v3881_v38 = vpop.trf.xlu1 }
 0x2a4   : > { %3910 = vst [vmem:[%s6594_s22 + $0xc8] sm:$0xff] %v3881_v38 }
 0x2a7   : > { %v3882_v39 = vpop.trf.xlu1 }
 0x2a8   : > { %3912 = vst [vmem:[%s6594_s22 + $0xd8] sm:$0xff] %v3882_v39 }
 0x2ab   : > { %v3883_v41 = vpop.trf.xlu1 }
 0x2ac   : > { %3914 = vst [vmem:[%s6594_s22 + $0xe8] sm:$0xff] %v3883_v41 }
 0x2af   : > { %v3884_v42 = vpop.trf.xlu1 }
 0x2b0   : > { %3916 = vst [vmem:[%s6594_s22 + $0xf8] sm:$0xff] %v3884_v42 }
 0x2b1 PF: > { %s14_s15 = sadd.s32 1, %s5502_s15  }
 0x2b2   : > { %p11_p4 = scmp.ge.s32.totalorder %s14_s15, 4  }
 0x2b4   :  { %13 = sbr.rel (!%p11_p4) target bundleno = 1 (0x1), region = 76 }

</bundles_post_ra>
